<compile_context>
chip_gen: v7x
topology: tpu7x:2x2x1
jax: 0.10.0
libtpu: 0.0.40
codegen_flags: <defaults>
</compile_context>

<pallas_src>
import jax
import jax.numpy as jnp
from jax.experimental import pallas as pl
from jax.experimental.pallas import tpu as pltpu

EPS = 1e-6


def _prod(shape):
    n = 1
    for s in shape:
        n *= int(s)
    return n


def _layer_norm(x, g, b):
    # Annotated-Transformer LayerNorm: unbiased std (n-1), eps added to std.
    mean = jnp.mean(x, axis=-1, keepdims=True)
    d = x.shape[-1]
    var = jnp.sum((x - mean) ** 2, axis=-1, keepdims=True) / (d - 1)
    std = jnp.sqrt(var)
    return g * (x - mean) / (std + EPS) + b


def _split_heads(m, n_heads):
    """(N, D) f32 -> (H, N, dk) bf16 via static lane-chunk slices + stack."""
    d = m.shape[-1]
    dk = d // n_heads
    return jnp.stack(
        [m[:, h * dk:(h + 1) * dk] for h in range(n_heads)], axis=0
    ).astype(jnp.bfloat16)


# ----------------------------------------------------------------------------
# Fused decoder kernel (one pallas_call for the full stack)
# ----------------------------------------------------------------------------
def _attention_sublayer(y, kv, bias, qkv_ref, wo_ref, b_ref, n_heads):
    """Multi-head attention over a (B_t, T, D) activation block.

    y      : (B_t, T, D) f32 queries (already layer-normed)
    kv     : (B_t, S, D) f32 key/value source (y itself for self-attention)
    bias   : (B_t, T, S) or (B_t, 1, S) additive mask bias (0 attend / -1e9 masked)
    qkv_ref: block (1, 3, D, D) bf16 = [Wq*scale, Wk, Wv]  (1/sqrt(dk) pre-folded)
    wo_ref : block (1, H, dk, D) bf16 = Wo split per head
    b_ref  : block (1, 4, D) f32     = [bq*scale, bk, bv, bo]
    """
    bsz, t, d = y.shape
    s_len = kv.shape[1]

    # Full-width projections on all (batch*seq) rows at once -> larger MXU M.
    y2 = y.reshape(bsz * t, d).astype(jnp.bfloat16)
    kv2 = kv.reshape(bsz * s_len, d).astype(jnp.bfloat16)
    q = jnp.dot(y2, qkv_ref[0, 0], preferred_element_type=jnp.float32) + b_ref[0, 0:1, :]
    k = jnp.dot(kv2, qkv_ref[0, 1], preferred_element_type=jnp.float32) + b_ref[0, 1:2, :]
    v = jnp.dot(kv2, qkv_ref[0, 2], preferred_element_type=jnp.float32) + b_ref[0, 2:3, :]

    qh = _split_heads(q, n_heads)   # (H, B_t*T, dk)
    kh = _split_heads(k, n_heads)   # (H, B_t*S, dk)
    vh = _split_heads(v, n_heads)   # (H, B_t*S, dk)

    wo = wo_ref[0]                  # (H, dk, D) bf16
    outs = []
    for b in range(bsz):            # B_t is small/static; see TODO on T/B tiling
        qb = qh[:, b * t:(b + 1) * t, :]
        kb = kh[:, b * s_len:(b + 1) * s_len, :]
        vb = vh[:, b * s_len:(b + 1) * s_len, :]

        # Head-batched MXU contractions (scale already folded into Wq/bq).
        sc = jnp.einsum("htd,hsd->hts", qb, kb,
                        preferred_element_type=jnp.float32)
        sc = sc + bias[b][None, :, :]

        # Manual softmax: exp + approximate reciprocal both run on the EUP.
        m = jnp.max(sc, axis=-1, keepdims=True)
        p = jnp.exp(sc - m)
        p = p * pl.reciprocal(jnp.sum(p, axis=-1, keepdims=True), approx=True)

        o = jnp.einsum("hts,hsd->htd", p.astype(jnp.bfloat16), vb,
                       preferred_element_type=jnp.float32)          # (H, T, dk)
        # Per-head output projection with Wo packed (H, dk, D); summing over
        # heads is equivalent to concat-along-lanes followed by (T,D)@(D,D).
        ob = jnp.einsum("htd,hdn->htn", o.astype(jnp.bfloat16), wo,
                        preferred_element_type=jnp.float32)          # (H, T, D)
        outs.append(jnp.sum(ob, axis=0))                             # (T, D)

    return jnp.stack(outs, axis=0) + b_ref[0, 3:4, :]                # (B_t, T, D)


def make_decoder_kernel(n_heads):
    def kernel(x_ref, mem_ref, tgtb_ref, srcb_ref,
               ln_g_ref, ln_b_ref,
               sa_qkv_ref, sa_wo_ref, sa_b_ref,
               ca_qkv_ref, ca_wo_ref, ca_b_ref,
               ff_w1_ref, ff_b1_ref, ff_w2_ref, ff_b2_ref,
               fn_g_ref, fn_b_ref,
               out_ref, act_ref):
        layer = pl.program_id(1)

        # Load the activation block into VMEM scratch once per batch block; it
        # stays resident there across every decoder layer (no HBM round trips).
        @pl.when(layer == 0)
        def _():
            act_ref[...] = x_ref[...]

        x = act_ref[...]            # (B_t, T, D) f32
        mem = mem_ref[...]          # (B_t, S, D) f32
        tgt_bias = tgtb_ref[...]    # (B_t, T, T) additive mask bias
        src_bias = srcb_ref[...]    # (B_t, 1, S) additive mask bias
        bsz, t, d = x.shape

        # --- sublayer 0: x + SelfAttn(LN(x)) with tgt mask --------------------
        y = _layer_norm(x, ln_g_ref[0, 0:1, :], ln_b_ref[0, 0:1, :])
        x = x + _attention_sublayer(y, y, tgt_bias,
                                    sa_qkv_ref, sa_wo_ref, sa_b_ref, n_heads)

        # --- sublayer 1: x + SrcAttn(LN(x), memory) with src mask -------------
        y = _layer_norm(x, ln_g_ref[0, 1:2, :], ln_b_ref[0, 1:2, :])
        x = x + _attention_sublayer(y, mem, src_bias,
                                    ca_qkv_ref, ca_wo_ref, ca_b_ref, n_heads)

        # --- sublayer 2: x + FFN(LN(x)) ---------------------------------------
        y = _layer_norm(x, ln_g_ref[0, 2:3, :], ln_b_ref[0, 2:3, :])
        y2 = y.reshape(bsz * t, d).astype(jnp.bfloat16)
        h = jnp.dot(y2, ff_w1_ref[0],
                    preferred_element_type=jnp.float32) + ff_b1_ref[0]
        h = jnp.maximum(h, 0.0)
        f = jnp.dot(h.astype(jnp.bfloat16), ff_w2_ref[0],
                    preferred_element_type=jnp.float32) + ff_b2_ref[0]
        x = x + f.reshape(bsz, t, d)

        act_ref[...] = x

        # Final LayerNorm fused into the last layer iteration.
        @pl.when(layer == pl.num_programs(1) - 1)
        def _():
            out_ref[...] = _layer_norm(
                x, fn_g_ref[...], fn_b_ref[...]).astype(out_ref.dtype)

    return kernel


# ----------------------------------------------------------------------------
# Parameter packing (stack per-layer weights along a leading layer axis)
# ----------------------------------------------------------------------------
def _pack_params(params, n_heads, weight_dtype=jnp.bfloat16):
    row = lambda p: p.reshape(-1)          # (1, D) -> (D,)
    ln_g, ln_b = [], []
    sa_qkv, sa_wo, sa_b = [], [], []
    ca_qkv, ca_wo, ca_b = [], [], []
    ff_w1, ff_b1, ff_w2, ff_b2 = [], [], [], []
    for lp in params["layers"]:
        sg, sb, wq, bq, wk, bk, wv, bv, wo, bo = lp["self_attn"]
        cg, cb, wq2, bq2, wk2, bk2, wv2, bv2, wo2, bo2 = lp["src_attn"]
        fg, fb, w1, b1, w2, b2 = lp["ffn"]
        d = wq.shape[0]
        dk = d // n_heads
        scale = 1.0 / float(dk) ** 0.5     # fold 1/sqrt(dk) into Wq, bq

        ln_g.append(jnp.stack([row(sg), row(cg), row(fg)]))
        ln_b.append(jnp.stack([row(sb), row(cb), row(fb)]))

        sa_qkv.append(jnp.stack([wq * scale, wk, wv]))
        sa_wo.append(wo.reshape(n_heads, dk, d))
        sa_b.append(jnp.stack([row(bq) * scale, row(bk), row(bv), row(bo)]))

        ca_qkv.append(jnp.stack([wq2 * scale, wk2, wv2]))
        ca_wo.append(wo2.reshape(n_heads, dk, d))
        ca_b.append(jnp.stack([row(bq2) * scale, row(bk2), row(bv2), row(bo2)]))

        ff_w1.append(w1); ff_b1.append(b1); ff_w2.append(w2); ff_b2.append(b2)
    fn_g, fn_b = params["norm"]
    return dict(
        ln_g=jnp.stack(ln_g), ln_b=jnp.stack(ln_b),
        sa_qkv=jnp.stack(sa_qkv).astype(weight_dtype),
        sa_wo=jnp.stack(sa_wo).astype(weight_dtype),
        sa_b=jnp.stack(sa_b),
        ca_qkv=jnp.stack(ca_qkv).astype(weight_dtype),
        ca_wo=jnp.stack(ca_wo).astype(weight_dtype),
        ca_b=jnp.stack(ca_b),
        ff_w1=jnp.stack(ff_w1).astype(weight_dtype), ff_b1=jnp.stack(ff_b1),
        ff_w2=jnp.stack(ff_w2).astype(weight_dtype), ff_b2=jnp.stack(ff_b2),
        fn_g=fn_g, fn_b=fn_b,
    )


# ----------------------------------------------------------------------------
# Wrapper: one pallas_call for the full decoder
# ----------------------------------------------------------------------------
def decoder_forward(x, memory, src_mask, tgt_mask, params, n_heads, *,
                    batch_blocks=1):
    """Equivalent of Decoder.forward(x, memory, src_mask, tgt_mask).

    batch_blocks=1 streams every layer's weights exactly once (best on the
    single-TC v5e/v6e); set batch_blocks=2 on v7x to shard the batch across
    both TensorCores at 2x weight traffic.
    """
    B, T, D = x.shape
    S = memory.shape[1]
    L = len(params["layers"])
    assert D % n_heads == 0 and B % batch_blocks == 0
    dk = D // n_heads
    BT = B // batch_blocks

    packed = _pack_params(params, n_heads)
    F = packed["ff_w1"].shape[-1]

    # Additive mask biases: 0.0 where attend, -1e9 where masked.
    tgt_bias = (tgt_mask.astype(jnp.float32) - 1.0) * 1e9   # (B, T, T)
    src_bias = (src_mask.astype(jnp.float32) - 1.0) * 1e9   # (B, 1, S)

    data3 = lambda bb, l: (bb, 0, 0)       # per-batch-block data (constant in l)
    per3 = lambda bb, l: (l, 0, 0)         # per-layer stacked weights (rank 3)
    per4 = lambda bb, l: (l, 0, 0, 0)      # per-layer stacked weights (rank 4)
    shared2 = lambda bb, l: (0, 0)         # final-norm params

    in_blocks = [
        ((BT, T, D), jnp.float32, data3),            # x
        ((BT, S, D), jnp.float32, data3),            # memory
        ((BT, T, T), jnp.float32, data3),            # tgt additive bias
        ((BT, 1, S), jnp.float32, data3),            # src additive bias
        ((1, 3, D), jnp.float32, per3),              # LN gammas (self/src/ffn)
        ((1, 3, D), jnp.float32, per3),              # LN betas
        ((1, 3, D, D), jnp.bfloat16, per4),          # self-attn Wq*s, Wk, Wv
        ((1, n_heads, dk, D), jnp.bfloat16, per4),   # self-attn Wo (per head)
        ((1, 4, D), jnp.float32, per3),              # self-attn biases
        ((1, 3, D, D), jnp.bfloat16, per4),          # src-attn Wq*s, Wk, Wv
        ((1, n_heads, dk, D), jnp.bfloat16, per4),   # src-attn Wo (per head)
        ((1, 4, D), jnp.float32, per3),              # src-attn biases
        ((1, D, F), jnp.bfloat16, per3),             # FFN W1
        ((1, 1, F), jnp.float32, per3),              # FFN b1
        ((1, F, D), jnp.bfloat16, per3),             # FFN W2
        ((1, 1, D), jnp.float32, per3),              # FFN b2
        ((1, D), jnp.float32, shared2),              # final LN gamma
        ((1, D), jnp.float32, shared2),              # final LN beta
    ]
    in_specs = [pl.BlockSpec(shape, idx) for shape, _, idx in in_blocks]

    # Explicit VMEM budget: double-buffered input blocks + output + resident
    # activation scratch, with margin; capped at 64 MiB so it is v7x-safe.
    block_bytes = sum(2 * _prod(shape) * jnp.dtype(dt).itemsize
                      for shape, dt, _ in in_blocks)
    block_bytes += 2 * _prod((BT, T, D)) * 4      # output block
    block_bytes += _prod((BT, T, D)) * 4          # activation scratch
    vmem_limit = int(min(64 * 2**20, max(32 * 2**20, 2 * block_bytes)))

    return pl.pallas_call(
        make_decoder_kernel(n_heads),
        out_shape=jax.ShapeDtypeStruct((B, T, D), x.dtype),
        grid=(batch_blocks, L),
        in_specs=in_specs,
        out_specs=pl.BlockSpec((BT, T, D), data3),
        scratch_shapes=[pltpu.VMEM((BT, T, D), jnp.float32)],
        input_output_aliases={0: 0},              # x is only read at layer 0
        compiler_params=pltpu.CompilerParams(
            dimension_semantics=("parallel", "arbitrary"),
            vmem_limit_bytes=vmem_limit),
    )(x, memory, tgt_bias, src_bias,
      packed["ln_g"], packed["ln_b"],
      packed["sa_qkv"], packed["sa_wo"], packed["sa_b"],
      packed["ca_qkv"], packed["ca_wo"], packed["ca_b"],
      packed["ff_w1"], packed["ff_b1"], packed["ff_w2"], packed["ff_b2"],
      packed["fn_g"], packed["fn_b"])


# ----------------------------------------------------------------------------
# Pure-JAX f32 reference (same math as the PyTorch module) for a sanity check
# ----------------------------------------------------------------------------
def _ref_mha(x, kv, mask, params, n_heads, self_attn):
    g, b, wq, bq, wk, bk, wv, bv, wo, bo = params
    B, T, D = x.shape
    dk = D // n_heads
    y = _layer_norm(x, g, b)
    kv_src = y if self_attn else kv
    q = (y @ wq + bq).reshape(B, T, n_heads, dk)
    k = (kv_src @ wk + bk).reshape(B, -1, n_heads, dk)
    v = (kv_src @ wv + bv).reshape(B, -1, n_heads, dk)
    scores = jnp.einsum("bthd,bshd->bhts", q, k) / jnp.sqrt(jnp.float32(dk))
    scores = jnp.where(mask[:, None, :, :] > 0, scores, -1e9)
    p = jax.nn.softmax(scores, axis=-1)
    o = jnp.einsum("bhts,bshd->bthd", p, v).reshape(B, T, D)
    return x + (o @ wo + bo)


def _ref_ffn(x, params):
    g, b, w1, b1, w2, b2 = params
    y = _layer_norm(x, g, b)
    return x + (jnp.maximum(y @ w1 + b1, 0.0) @ w2 + b2)


def decoder_reference(x, memory, src_mask, tgt_mask, params, n_heads):
    for lp in params["layers"]:
        x = _ref_mha(x, x, tgt_mask, lp["self_attn"], n_heads, True)
        x = _ref_mha(x, memory, src_mask, lp["src_attn"], n_heads, False)
        x = _ref_ffn(x, lp["ffn"])
    g, b = params["norm"]
    return _layer_norm(x, g, b)


# ----------------------------------------------------------------------------
# Deterministic parameter init
# ----------------------------------------------------------------------------
def _init_linear(key, d_in, d_out):
    kw, kb = jax.random.split(key)
    w = jax.random.normal(kw, (d_in, d_out), jnp.float32) / jnp.sqrt(jnp.float32(d_in))
    b = 0.01 * jax.random.normal(kb, (1, d_out), jnp.float32)
    return w, b


def _ln_params(d):
    return (jnp.ones((1, d), jnp.float32), jnp.zeros((1, d), jnp.float32))


def init_decoder_params(key, n_layers, d_model, d_ff):
    layers = []
    for _ in range(n_layers):
        key, *ks = jax.random.split(key, 11)
        wq, bq = _init_linear(ks[0], d_model, d_model)
        wk, bk = _init_linear(ks[1], d_model, d_model)
        wv, bv = _init_linear(ks[2], d_model, d_model)
        wo, bo = _init_linear(ks[3], d_model, d_model)
        self_attn = _ln_params(d_model) + (wq, bq, wk, bk, wv, bv, wo, bo)
        wq2, bq2 = _init_linear(ks[4], d_model, d_model)
        wk2, bk2 = _init_linear(ks[5], d_model, d_model)
        wv2, bv2 = _init_linear(ks[6], d_model, d_model)
        wo2, bo2 = _init_linear(ks[7], d_model, d_model)
        src_attn = _ln_params(d_model) + (wq2, bq2, wk2, bk2, wv2, bv2, wo2, bo2)
        w1, b1 = _init_linear(ks[8], d_model, d_ff)
        w2, b2 = _init_linear(ks[9], d_ff, d_model)
        ffn = _ln_params(d_model) + (w1, b1, w2, b2)
        layers.append({"self_attn": self_attn, "src_attn": src_attn, "ffn": ffn})
    return {"layers": layers, "norm": _ln_params(d_model)}


# ----------------------------------------------------------------------------
if __name__ == "__main__":
    # Small but lane-dense demo sizes (D, D_FF multiples of 128).
    B, T, S, D, H, D_FF, N_LAYERS = 2, 8, 8, 128, 4, 256, 2

    key = jax.random.PRNGKey(0)
    kx, km, kp = jax.random.split(key, 3)
    x = jax.random.normal(kx, (B, T, D), jnp.float32)
    memory = jax.random.normal(km, (B, S, D), jnp.float32)

    # Causal target mask (B, T, T); source mask (B, 1, S) with varying lengths.
    tgt_mask = jnp.broadcast_to(jnp.tril(jnp.ones((T, T), jnp.float32)), (B, T, T))
    src_lens = jnp.array([S, S - 3], jnp.int32)
    src_mask = (jnp.arange(S)[None, None, :] < src_lens[:, None, None]).astype(jnp.float32)

    params = init_decoder_params(kp, N_LAYERS, D, D_FF)

    # Compute the f32 reference first (the kernel may alias x's buffer with its
    # output via input_output_aliases).
    ref = decoder_reference(x, memory, src_mask, tgt_mask, params, H)
    ref = jax.block_until_ready(ref)

    out = decoder_forward(x, memory, src_mask, tgt_mask, params, H)
    out = jax.block_until_ready(out)

    assert out.shape == (B, T, D)
    # Kernel uses bf16 MXU inputs (f32 accumulation); compare to the f32
    # reference with a tolerance covering bf16 rounding over 6 sublayers.
    max_err = float(jnp.max(jnp.abs(out - ref)))
    assert bool(jnp.allclose(out, ref, rtol=5e-2, atol=5e-2)), (
        f"mismatch vs reference (max abs err {max_err})")

    print("KERNEL_OK")
</pallas_src>

<mosaic_0001>
module attributes {stable_mosaic.version = 11 : i64} {
  func.func @kernel(%arg0: i32, %arg1: i32, %arg2: memref<2x8x128xf32, #tpu.memory_space<vmem>>, %arg3: memref<2x8x128xf32, #tpu.memory_space<vmem>>, %arg4: memref<2x8x8xf32, #tpu.memory_space<vmem>>, %arg5: memref<2x1x8xf32, #tpu.memory_space<vmem>>, %arg6: memref<1x3x128xf32, #tpu.memory_space<vmem>>, %arg7: memref<1x3x128xf32, #tpu.memory_space<vmem>>, %arg8: memref<1x3x128x128xbf16, #tpu.memory_space<vmem>>, %arg9: memref<1x4x32x128xbf16, #tpu.memory_space<vmem>>, %arg10: memref<1x4x128xf32, #tpu.memory_space<vmem>>, %arg11: memref<1x3x128x128xbf16, #tpu.memory_space<vmem>>, %arg12: memref<1x4x32x128xbf16, #tpu.memory_space<vmem>>, %arg13: memref<1x4x128xf32, #tpu.memory_space<vmem>>, %arg14: memref<1x128x256xbf16, #tpu.memory_space<vmem>>, %arg15: memref<1x1x256xf32, #tpu.memory_space<vmem>>, %arg16: memref<1x256x128xbf16, #tpu.memory_space<vmem>>, %arg17: memref<1x1x128xf32, #tpu.memory_space<vmem>>, %arg18: memref<1x128xf32, #tpu.memory_space<vmem>>, %arg19: memref<1x128xf32, #tpu.memory_space<vmem>>, %arg20: memref<2x8x128xf32, #tpu.memory_space<vmem>>, %arg21: memref<2x8x128xf32, #tpu.memory_space<vmem>>) attributes {dimension_semantics = [#tpu.dimension_semantics<parallel>, #tpu.dimension_semantics<arbitrary>], iteration_bounds = array<i64: 1, 2>, scalar_prefetch = 0 : i64, scratch_operands = 1 : i64, tpu.core_type = #tpu.core_type<tc>, window_params = [{transform_indices = @transform_0, window_bounds = array<i64: 2, 8, 128>}, {transform_indices = @transform_1, window_bounds = array<i64: 2, 8, 128>}, {transform_indices = @transform_2, window_bounds = array<i64: 2, 8, 8>}, {transform_indices = @transform_3, window_bounds = array<i64: 2, 1, 8>}, {transform_indices = @transform_4, window_bounds = array<i64: 1, 3, 128>}, {transform_indices = @transform_5, window_bounds = array<i64: 1, 3, 128>}, {transform_indices = @transform_6, window_bounds = array<i64: 1, 3, 128, 128>}, {transform_indices = @transform_7, window_bounds = array<i64: 1, 4, 32, 128>}, {transform_indices = @transform_8, window_bounds = array<i64: 1, 4, 128>}, {transform_indices = @transform_9, window_bounds = array<i64: 1, 3, 128, 128>}, {transform_indices = @transform_10, window_bounds = array<i64: 1, 4, 32, 128>}, {transform_indices = @transform_11, window_bounds = array<i64: 1, 4, 128>}, {transform_indices = @transform_12, window_bounds = array<i64: 1, 128, 256>}, {transform_indices = @transform_13, window_bounds = array<i64: 1, 1, 256>}, {transform_indices = @transform_14, window_bounds = array<i64: 1, 256, 128>}, {transform_indices = @transform_15, window_bounds = array<i64: 1, 1, 128>}, {pipeline_mode = #tpu.pipeline_mode<synchronous>, transform_indices = @transform_16, window_bounds = array<i64: 1, 128>}, {pipeline_mode = #tpu.pipeline_mode<synchronous>, transform_indices = @transform_17, window_bounds = array<i64: 1, 128>}, {transform_indices = @transform_18, window_bounds = array<i64: 2, 8, 128>}]} {
    %c0_i32 = arith.constant 0 : i32
    %0 = arith.cmpi eq, %arg1, %c0_i32 : i32
    %1 = arith.extui %0 : i1 to i32
    %c0_i32_0 = arith.constant 0 : i32
    %2 = arith.cmpi ne, %1, %c0_i32_0 : i32
    scf.if %2 {
      %c0_146 = arith.constant 0 : index
      %c0_147 = arith.constant 0 : index
      %c0_148 = arith.constant 0 : index
      %344 = vector.load %arg2[%c0_146, %c0_147, %c0_148] : memref<2x8x128xf32, #tpu.memory_space<vmem>>, vector<2x8x128xf32>
      %c0_149 = arith.constant 0 : index
      %c0_150 = arith.constant 0 : index
      %c0_151 = arith.constant 0 : index
      %345 = vector.load %arg21[%c0_149, %c0_150, %c0_151] : memref<2x8x128xf32, #tpu.memory_space<vmem>>, vector<2x8x128xf32>
      tpu.vector_store %arg21[%c0_149, %c0_150, %c0_151], %344 {strides = array<i32>} : memref<2x8x128xf32, #tpu.memory_space<vmem>>, vector<2x8x128xf32>,
    } else {
    }
    %c0 = arith.constant 0 : index
    %c0_1 = arith.constant 0 : index
    %c0_2 = arith.constant 0 : index
    %3 = vector.load %arg21[%c0, %c0_1, %c0_2] : memref<2x8x128xf32, #tpu.memory_space<vmem>>, vector<2x8x128xf32>
    %c0_3 = arith.constant 0 : index
    %c0_4 = arith.constant 0 : index
    %c0_5 = arith.constant 0 : index
    %4 = vector.load %arg3[%c0_3, %c0_4, %c0_5] : memref<2x8x128xf32, #tpu.memory_space<vmem>>, vector<2x8x128xf32>
    %c0_6 = arith.constant 0 : index
    %c0_7 = arith.constant 0 : index
    %c0_8 = arith.constant 0 : index
    %5 = vector.load %arg4[%c0_6, %c0_7, %c0_8] : memref<2x8x8xf32, #tpu.memory_space<vmem>>, vector<2x8x8xf32>
    %c0_9 = arith.constant 0 : index
    %c0_10 = arith.constant 0 : index
    %c0_11 = arith.constant 0 : index
    %6 = vector.load %arg5[%c0_9, %c0_10, %c0_11] : memref<2x1x8xf32, #tpu.memory_space<vmem>>, vector<2x1x8xf32>
    %c0_12 = arith.constant 0 : index
    %c0_13 = arith.constant 0 : index
    %c0_14 = arith.constant 0 : index
    %7 = vector.load %arg6[%c0_12, %c0_13, %c0_14] : memref<1x3x128xf32, #tpu.memory_space<vmem>>, vector<1x1x128xf32>
    %8 = vector.shape_cast %7 : vector<1x1x128xf32> to vector<1x128xf32>
    %c0_15 = arith.constant 0 : index
    %c0_16 = arith.constant 0 : index
    %c0_17 = arith.constant 0 : index
    %9 = vector.load %arg7[%c0_15, %c0_16, %c0_17] : memref<1x3x128xf32, #tpu.memory_space<vmem>>, vector<1x1x128xf32>
    %10 = vector.shape_cast %9 : vector<1x1x128xf32> to vector<1x128xf32>
    %cst = arith.constant dense<0.000000e+00> : vector<2x8xf32>
    %11 = vector.multi_reduction <add>, %3, %cst [2] : vector<2x8x128xf32> to vector<2x8xf32>
    %12 = vector.shape_cast %11 : vector<2x8xf32> to vector<2x8x1xf32>
    %cst_18 = arith.constant 1.280000e+02 : f32
    %13 = vector.broadcast %cst_18 : f32 to vector<2x8x1xf32>
    %14 = arith.divf %12, %13 : vector<2x8x1xf32>
    %15 = vector.broadcast %14 : vector<2x8x1xf32> to vector<2x8x128xf32>
    %16 = arith.subf %3, %15 : vector<2x8x128xf32>
    %17 = arith.mulf %16, %16 : vector<2x8x128xf32>
    %cst_19 = arith.constant dense<0.000000e+00> : vector<2x8xf32>
    %18 = vector.multi_reduction <add>, %17, %cst_19 [2] : vector<2x8x128xf32> to vector<2x8xf32>
    %19 = vector.shape_cast %18 : vector<2x8xf32> to vector<2x8x1xf32>
    %cst_20 = arith.constant 1.270000e+02 : f32
    %20 = vector.broadcast %cst_20 : f32 to vector<2x8x1xf32>
    %21 = arith.divf %19, %20 : vector<2x8x1xf32>
    %22 = math.sqrt %21 : vector<2x8x1xf32>
    %23 = vector.broadcast %14 : vector<2x8x1xf32> to vector<2x8x128xf32>
    %24 = arith.subf %3, %23 : vector<2x8x128xf32>
    %25 = vector.shape_cast %8 : vector<1x128xf32> to vector<1x1x128xf32>
    %26 = vector.broadcast %25 : vector<1x1x128xf32> to vector<2x8x128xf32>
    %27 = arith.mulf %26, %24 : vector<2x8x128xf32>
    %cst_21 = arith.constant 9.99999997E-7 : f32
    %28 = vector.broadcast %cst_21 : f32 to vector<2x8x1xf32>
    %29 = arith.addf %22, %28 : vector<2x8x1xf32>
    %30 = vector.broadcast %29 : vector<2x8x1xf32> to vector<2x8x128xf32>
    %31 = arith.divf %27, %30 : vector<2x8x128xf32>
    %32 = vector.shape_cast %10 : vector<1x128xf32> to vector<1x1x128xf32>
    %33 = vector.broadcast %32 : vector<1x1x128xf32> to vector<2x8x128xf32>
    %34 = arith.addf %31, %33 : vector<2x8x128xf32>
    %35 = vector.shape_cast %34 : vector<2x8x128xf32> to vector<16x128xf32>
    %36 = arith.truncf %35 : vector<16x128xf32> to vector<16x128xbf16>
    %37 = vector.shape_cast %34 : vector<2x8x128xf32> to vector<16x128xf32>
    %38 = arith.truncf %37 : vector<16x128xf32> to vector<16x128xbf16>
    %c0_22 = arith.constant 0 : index
    %c0_23 = arith.constant 0 : index
    %c0_24 = arith.constant 0 : index
    %c0_25 = arith.constant 0 : index
    %39 = vector.load %arg8[%c0_22, %c0_23, %c0_24, %c0_25] : memref<1x3x128x128xbf16, #tpu.memory_space<vmem>>, vector<1x1x128x128xbf16>
    %40 = vector.shape_cast %39 : vector<1x1x128x128xbf16> to vector<128x128xbf16>
    %cst_26 = arith.constant dense<0.000000e+00> : vector<16x128xf32>
    %41 = tpu.matmul %36, %40, %cst_26 {dimension_numbers = #tpu.dot_dimension_numbers<[1], [0], [0], [1], [0, 0, 1, 1], [], []>} : vector<16x128xbf16>, vector<128x128xbf16>, vector<16x128xf32> -> vector<16x128xf32>
    %c0_27 = arith.constant 0 : index
    %c0_28 = arith.constant 0 : index
    %c0_29 = arith.constant 0 : index
    %42 = vector.load %arg10[%c0_27, %c0_28, %c0_29] : memref<1x4x128xf32, #tpu.memory_space<vmem>>, vector<1x1x128xf32>
    %43 = vector.shape_cast %42 : vector<1x1x128xf32> to vector<1x128xf32>
    %44 = vector.broadcast %43 : vector<1x128xf32> to vector<16x128xf32>
    %45 = arith.addf %41, %44 : vector<16x128xf32>
    %c0_30 = arith.constant 0 : index
    %c1 = arith.constant 1 : index
    %c0_31 = arith.constant 0 : index
    %c0_32 = arith.constant 0 : index
    %46 = vector.load %arg8[%c0_30, %c1, %c0_31, %c0_32] : memref<1x3x128x128xbf16, #tpu.memory_space<vmem>>, vector<1x1x128x128xbf16>
    %47 = vector.shape_cast %46 : vector<1x1x128x128xbf16> to vector<128x128xbf16>
    %cst_33 = arith.constant dense<0.000000e+00> : vector<16x128xf32>
    %48 = tpu.matmul %38, %47, %cst_33 {dimension_numbers = #tpu.dot_dimension_numbers<[1], [0], [0], [1], [0, 0, 1, 1], [], []>} : vector<16x128xbf16>, vector<128x128xbf16>, vector<16x128xf32> -> vector<16x128xf32>
    %c0_34 = arith.constant 0 : index
    %c1_35 = arith.constant 1 : index
    %c0_36 = arith.constant 0 : index
    %49 = vector.load %arg10[%c0_34, %c1_35, %c0_36] : memref<1x4x128xf32, #tpu.memory_space<vmem>>, vector<1x1x128xf32>
    %50 = vector.shape_cast %49 : vector<1x1x128xf32> to vector<1x128xf32>
    %51 = vector.broadcast %50 : vector<1x128xf32> to vector<16x128xf32>
    %52 = arith.addf %48, %51 : vector<16x128xf32>
    %c0_37 = arith.constant 0 : index
    %c2 = arith.constant 2 : index
    %c0_38 = arith.constant 0 : index
    %c0_39 = arith.constant 0 : index
    %53 = vector.load %arg8[%c0_37, %c2, %c0_38, %c0_39] : memref<1x3x128x128xbf16, #tpu.memory_space<vmem>>, vector<1x1x128x128xbf16>
    %54 = vector.shape_cast %53 : vector<1x1x128x128xbf16> to vector<128x128xbf16>
    %cst_40 = arith.constant dense<0.000000e+00> : vector<16x128xf32>
    %55 = tpu.matmul %38, %54, %cst_40 {dimension_numbers = #tpu.dot_dimension_numbers<[1], [0], [0], [1], [0, 0, 1, 1], [], []>} : vector<16x128xbf16>, vector<128x128xbf16>, vector<16x128xf32> -> vector<16x128xf32>
    %c0_41 = arith.constant 0 : index
    %c2_42 = arith.constant 2 : index
    %c0_43 = arith.constant 0 : index
    %56 = vector.load %arg10[%c0_41, %c2_42, %c0_43] : memref<1x4x128xf32, #tpu.memory_space<vmem>>, vector<1x1x128xf32>
    %57 = vector.shape_cast %56 : vector<1x1x128xf32> to vector<1x128xf32>
    %58 = vector.broadcast %57 : vector<1x128xf32> to vector<16x128xf32>
    %59 = arith.addf %55, %58 : vector<16x128xf32>
    %60 = vector.extract_strided_slice %45 {offsets = [0, 0], sizes = [16, 32], strides = [1, 1]} : vector<16x128xf32> to vector<16x32xf32>
    %61 = vector.extract_strided_slice %45 {offsets = [0, 32], sizes = [16, 32], strides = [1, 1]} : vector<16x128xf32> to vector<16x32xf32>
    %62 = vector.extract_strided_slice %45 {offsets = [0, 64], sizes = [16, 32], strides = [1, 1]} : vector<16x128xf32> to vector<16x32xf32>
    %63 = vector.extract_strided_slice %45 {offsets = [0, 96], sizes = [16, 32], strides = [1, 1]} : vector<16x128xf32> to vector<16x32xf32>
    %64 = vector.shape_cast %60 : vector<16x32xf32> to vector<1x16x32xf32>
    %65 = vector.shape_cast %61 : vector<16x32xf32> to vector<1x16x32xf32>
    %66 = vector.shape_cast %62 : vector<16x32xf32> to vector<1x16x32xf32>
    %67 = vector.shape_cast %63 : vector<16x32xf32> to vector<1x16x32xf32>
    %68 = tpu.concatenate %64, %65, %66, %67 in 0 : vector<1x16x32xf32>, vector<1x16x32xf32>, vector<1x16x32xf32>, vector<1x16x32xf32> -> vector<4x16x32xf32>
    %69 = arith.truncf %68 : vector<4x16x32xf32> to vector<4x16x32xbf16>
    %70 = vector.extract_strided_slice %52 {offsets = [0, 0], sizes = [16, 32], strides = [1, 1]} : vector<16x128xf32> to vector<16x32xf32>
    %71 = vector.extract_strided_slice %52 {offsets = [0, 32], sizes = [16, 32], strides = [1, 1]} : vector<16x128xf32> to vector<16x32xf32>
    %72 = vector.extract_strided_slice %52 {offsets = [0, 64], sizes = [16, 32], strides = [1, 1]} : vector<16x128xf32> to vector<16x32xf32>
    %73 = vector.extract_strided_slice %52 {offsets = [0, 96], sizes = [16, 32], strides = [1, 1]} : vector<16x128xf32> to vector<16x32xf32>
    %74 = vector.shape_cast %70 : vector<16x32xf32> to vector<1x16x32xf32>
    %75 = vector.shape_cast %71 : vector<16x32xf32> to vector<1x16x32xf32>
    %76 = vector.shape_cast %72 : vector<16x32xf32> to vector<1x16x32xf32>
    %77 = vector.shape_cast %73 : vector<16x32xf32> to vector<1x16x32xf32>
    %78 = tpu.concatenate %74, %75, %76, %77 in 0 : vector<1x16x32xf32>, vector<1x16x32xf32>, vector<1x16x32xf32>, vector<1x16x32xf32> -> vector<4x16x32xf32>
    %79 = arith.truncf %78 : vector<4x16x32xf32> to vector<4x16x32xbf16>
    %80 = vector.extract_strided_slice %59 {offsets = [0, 0], sizes = [16, 32], strides = [1, 1]} : vector<16x128xf32> to vector<16x32xf32>
    %81 = vector.extract_strided_slice %59 {offsets = [0, 32], sizes = [16, 32], strides = [1, 1]} : vector<16x128xf32> to vector<16x32xf32>
    %82 = vector.extract_strided_slice %59 {offsets = [0, 64], sizes = [16, 32], strides = [1, 1]} : vector<16x128xf32> to vector<16x32xf32>
    %83 = vector.extract_strided_slice %59 {offsets = [0, 96], sizes = [16, 32], strides = [1, 1]} : vector<16x128xf32> to vector<16x32xf32>
    %84 = vector.shape_cast %80 : vector<16x32xf32> to vector<1x16x32xf32>
    %85 = vector.shape_cast %81 : vector<16x32xf32> to vector<1x16x32xf32>
    %86 = vector.shape_cast %82 : vector<16x32xf32> to vector<1x16x32xf32>
    %87 = vector.shape_cast %83 : vector<16x32xf32> to vector<1x16x32xf32>
    %88 = tpu.concatenate %84, %85, %86, %87 in 0 : vector<1x16x32xf32>, vector<1x16x32xf32>, vector<1x16x32xf32>, vector<1x16x32xf32> -> vector<4x16x32xf32>
    %89 = arith.truncf %88 : vector<4x16x32xf32> to vector<4x16x32xbf16>
    %c0_44 = arith.constant 0 : index
    %c0_45 = arith.constant 0 : index
    %c0_46 = arith.constant 0 : index
    %c0_47 = arith.constant 0 : index
    %90 = vector.load %arg9[%c0_44, %c0_45, %c0_46, %c0_47] : memref<1x4x32x128xbf16, #tpu.memory_space<vmem>>, vector<1x4x32x128xbf16>
    %91 = vector.shape_cast %90 : vector<1x4x32x128xbf16> to vector<4x32x128xbf16>
    %92 = vector.extract_strided_slice %69 {offsets = [0, 0, 0], sizes = [4, 8, 32], strides = [1, 1, 1]} : vector<4x16x32xbf16> to vector<4x8x32xbf16>
    %93 = vector.extract_strided_slice %79 {offsets = [0, 0, 0], sizes = [4, 8, 32], strides = [1, 1, 1]} : vector<4x16x32xbf16> to vector<4x8x32xbf16>
    %94 = vector.extract_strided_slice %89 {offsets = [0, 0, 0], sizes = [4, 8, 32], strides = [1, 1, 1]} : vector<4x16x32xbf16> to vector<4x8x32xbf16>
    "tpu.trace_start"() <{level = 10 : i32, message = "htd,hsd->hts"}> : () -> ()
    %cst_48 = arith.constant dense<0.000000e+00> : vector<4x8x8xf32>
    %95 = tpu.matmul %92, %93, %cst_48 {dimension_numbers = #tpu.dot_dimension_numbers<[2], [2], [1], [1], [0, 0, 0, 1, 1, 1], [0], [0]>} : vector<4x8x32xbf16>, vector<4x8x32xbf16>, vector<4x8x8xf32> -> vector<4x8x8xf32>
    "tpu.trace_stop"() : () -> ()
    %96 = vector.extract_strided_slice %5 {offsets = [0, 0, 0], sizes = [1, 8, 8], strides = [1, 1, 1]} : vector<2x8x8xf32> to vector<1x8x8xf32>
    %97 = vector.shape_cast %96 : vector<1x8x8xf32> to vector<8x8xf32>
    %98 = vector.shape_cast %97 : vector<8x8xf32> to vector<1x8x8xf32>
    %99 = vector.broadcast %98 : vector<1x8x8xf32> to vector<4x8x8xf32>
    %100 = arith.addf %95, %99 : vector<4x8x8xf32>
    %cst_49 = arith.constant dense<0xFF800000> : vector<4x8xf32>
    %101 = vector.multi_reduction <maximumf>, %100, %cst_49 [2] : vector<4x8x8xf32> to vector<4x8xf32>
    %102 = vector.shape_cast %101 : vector<4x8xf32> to vector<4x8x1xf32>
    %103 = vector.broadcast %102 : vector<4x8x1xf32> to vector<4x8x8xf32>
    %104 = arith.subf %100, %103 : vector<4x8x8xf32>
    %105 = math.exp %104 : vector<4x8x8xf32>
    %cst_50 = arith.constant dense<0.000000e+00> : vector<4x8xf32>
    %106 = vector.multi_reduction <add>, %105, %cst_50 [2] : vector<4x8x8xf32> to vector<4x8xf32>
    %107 = vector.shape_cast %106 : vector<4x8xf32> to vector<4x8x1xf32>
    %108 = tpu.reciprocal %107 {approx = true} : vector<4x8x1xf32> -> vector<4x8x1xf32>
    %109 = vector.broadcast %108 : vector<4x8x1xf32> to vector<4x8x8xf32>
    %110 = arith.mulf %105, %109 : vector<4x8x8xf32>
    %111 = arith.truncf %110 : vector<4x8x8xf32> to vector<4x8x8xbf16>
    "tpu.trace_start"() <{level = 10 : i32, message = "hts,hsd->htd"}> : () -> ()
    %cst_51 = arith.constant dense<0.000000e+00> : vector<4x8x32xf32>
    %112 = tpu.matmul %111, %94, %cst_51 {dimension_numbers = #tpu.dot_dimension_numbers<[2], [1], [1], [2], [0, 0, 0, 1, 1, 2], [0], [0]>} : vector<4x8x8xbf16>, vector<4x8x32xbf16>, vector<4x8x32xf32> -> vector<4x8x32xf32>
    "tpu.trace_stop"() : () -> ()
    %113 = arith.truncf %112 : vector<4x8x32xf32> to vector<4x8x32xbf16>
    "tpu.trace_start"() <{level = 10 : i32, message = "htd,hdn->htn"}> : () -> ()
    %cst_52 = arith.constant dense<0.000000e+00> : vector<4x8x128xf32>
    %114 = tpu.matmul %113, %91, %cst_52 {dimension_numbers = #tpu.dot_dimension_numbers<[2], [1], [1], [2], [0, 0, 0, 1, 1, 2], [0], [0]>} : vector<4x8x32xbf16>, vector<4x32x128xbf16>, vector<4x8x128xf32> -> vector<4x8x128xf32>
    "tpu.trace_stop"() : () -> ()
    %cst_53 = arith.constant dense<0.000000e+00> : vector<8x128xf32>
    %115 = vector.multi_reduction <add>, %114, %cst_53 [0] : vector<4x8x128xf32> to vector<8x128xf32>
    %116 = vector.extract_strided_slice %69 {offsets = [0, 8, 0], sizes = [4, 8, 32], strides = [1, 1, 1]} : vector<4x16x32xbf16> to vector<4x8x32xbf16>
    %117 = vector.extract_strided_slice %79 {offsets = [0, 8, 0], sizes = [4, 8, 32], strides = [1, 1, 1]} : vector<4x16x32xbf16> to vector<4x8x32xbf16>
    %118 = vector.extract_strided_slice %89 {offsets = [0, 8, 0], sizes = [4, 8, 32], strides = [1, 1, 1]} : vector<4x16x32xbf16> to vector<4x8x32xbf16>
    "tpu.trace_start"() <{level = 10 : i32, message = "htd,hsd->hts"}> : () -> ()
    %cst_54 = arith.constant dense<0.000000e+00> : vector<4x8x8xf32>
    %119 = tpu.matmul %116, %117, %cst_54 {dimension_numbers = #tpu.dot_dimension_numbers<[2], [2], [1], [1], [0, 0, 0, 1, 1, 1], [0], [0]>} : vector<4x8x32xbf16>, vector<4x8x32xbf16>, vector<4x8x8xf32> -> vector<4x8x8xf32>
    "tpu.trace_stop"() : () -> ()
    %120 = vector.extract_strided_slice %5 {offsets = [1, 0, 0], sizes = [1, 8, 8], strides = [1, 1, 1]} : vector<2x8x8xf32> to vector<1x8x8xf32>
    %121 = vector.shape_cast %120 : vector<1x8x8xf32> to vector<8x8xf32>
    %122 = vector.shape_cast %121 : vector<8x8xf32> to vector<1x8x8xf32>
    %123 = vector.broadcast %122 : vector<1x8x8xf32> to vector<4x8x8xf32>
    %124 = arith.addf %119, %123 : vector<4x8x8xf32>
    %cst_55 = arith.constant dense<0xFF800000> : vector<4x8xf32>
    %125 = vector.multi_reduction <maximumf>, %124, %cst_55 [2] : vector<4x8x8xf32> to vector<4x8xf32>
    %126 = vector.shape_cast %125 : vector<4x8xf32> to vector<4x8x1xf32>
    %127 = vector.broadcast %126 : vector<4x8x1xf32> to vector<4x8x8xf32>
    %128 = arith.subf %124, %127 : vector<4x8x8xf32>
    %129 = math.exp %128 : vector<4x8x8xf32>
    %cst_56 = arith.constant dense<0.000000e+00> : vector<4x8xf32>
    %130 = vector.multi_reduction <add>, %129, %cst_56 [2] : vector<4x8x8xf32> to vector<4x8xf32>
    %131 = vector.shape_cast %130 : vector<4x8xf32> to vector<4x8x1xf32>
    %132 = tpu.reciprocal %131 {approx = true} : vector<4x8x1xf32> -> vector<4x8x1xf32>
    %133 = vector.broadcast %132 : vector<4x8x1xf32> to vector<4x8x8xf32>
    %134 = arith.mulf %129, %133 : vector<4x8x8xf32>
    %135 = arith.truncf %134 : vector<4x8x8xf32> to vector<4x8x8xbf16>
    "tpu.trace_start"() <{level = 10 : i32, message = "hts,hsd->htd"}> : () -> ()
    %cst_57 = arith.constant dense<0.000000e+00> : vector<4x8x32xf32>
    %136 = tpu.matmul %135, %118, %cst_57 {dimension_numbers = #tpu.dot_dimension_numbers<[2], [1], [1], [2], [0, 0, 0, 1, 1, 2], [0], [0]>} : vector<4x8x8xbf16>, vector<4x8x32xbf16>, vector<4x8x32xf32> -> vector<4x8x32xf32>
    "tpu.trace_stop"() : () -> ()
    %137 = arith.truncf %136 : vector<4x8x32xf32> to vector<4x8x32xbf16>
    "tpu.trace_start"() <{level = 10 : i32, message = "htd,hdn->htn"}> : () -> ()
    %cst_58 = arith.constant dense<0.000000e+00> : vector<4x8x128xf32>
    %138 = tpu.matmul %137, %91, %cst_58 {dimension_numbers = #tpu.dot_dimension_numbers<[2], [1], [1], [2], [0, 0, 0, 1, 1, 2], [0], [0]>} : vector<4x8x32xbf16>, vector<4x32x128xbf16>, vector<4x8x128xf32> -> vector<4x8x128xf32>
    "tpu.trace_stop"() : () -> ()
    %cst_59 = arith.constant dense<0.000000e+00> : vector<8x128xf32>
    %139 = vector.multi_reduction <add>, %138, %cst_59 [0] : vector<4x8x128xf32> to vector<8x128xf32>
    %140 = vector.shape_cast %115 : vector<8x128xf32> to vector<1x8x128xf32>
    %141 = vector.shape_cast %139 : vector<8x128xf32> to vector<1x8x128xf32>
    %142 = tpu.concatenate %140, %141 in 0 : vector<1x8x128xf32>, vector<1x8x128xf32> -> vector<2x8x128xf32>
    %c0_60 = arith.constant 0 : index
    %c3 = arith.constant 3 : index
    %c0_61 = arith.constant 0 : index
    %143 = vector.load %arg10[%c0_60, %c3, %c0_61] : memref<1x4x128xf32, #tpu.memory_space<vmem>>, vector<1x1x128xf32>
    %144 = vector.shape_cast %143 : vector<1x1x128xf32> to vector<1x128xf32>
    %145 = vector.shape_cast %144 : vector<1x128xf32> to vector<1x1x128xf32>
    %146 = vector.broadcast %145 : vector<1x1x128xf32> to vector<2x8x128xf32>
    %147 = arith.addf %142, %146 : vector<2x8x128xf32>
    %148 = arith.addf %3, %147 : vector<2x8x128xf32>
    %c0_62 = arith.constant 0 : index
    %c1_63 = arith.constant 1 : index
    %c0_64 = arith.constant 0 : index
    %149 = vector.load %arg6[%c0_62, %c1_63, %c0_64] : memref<1x3x128xf32, #tpu.memory_space<vmem>>, vector<1x1x128xf32>
    %150 = vector.shape_cast %149 : vector<1x1x128xf32> to vector<1x128xf32>
    %c0_65 = arith.constant 0 : index
    %c1_66 = arith.constant 1 : index
    %c0_67 = arith.constant 0 : index
    %151 = vector.load %arg7[%c0_65, %c1_66, %c0_67] : memref<1x3x128xf32, #tpu.memory_space<vmem>>, vector<1x1x128xf32>
    %152 = vector.shape_cast %151 : vector<1x1x128xf32> to vector<1x128xf32>
    %cst_68 = arith.constant dense<0.000000e+00> : vector<2x8xf32>
    %153 = vector.multi_reduction <add>, %148, %cst_68 [2] : vector<2x8x128xf32> to vector<2x8xf32>
    %154 = vector.shape_cast %153 : vector<2x8xf32> to vector<2x8x1xf32>
    %cst_69 = arith.constant 1.280000e+02 : f32
    %155 = vector.broadcast %cst_69 : f32 to vector<2x8x1xf32>
    %156 = arith.divf %154, %155 : vector<2x8x1xf32>
    %157 = vector.broadcast %156 : vector<2x8x1xf32> to vector<2x8x128xf32>
    %158 = arith.subf %148, %157 : vector<2x8x128xf32>
    %159 = arith.mulf %158, %158 : vector<2x8x128xf32>
    %cst_70 = arith.constant dense<0.000000e+00> : vector<2x8xf32>
    %160 = vector.multi_reduction <add>, %159, %cst_70 [2] : vector<2x8x128xf32> to vector<2x8xf32>
    %161 = vector.shape_cast %160 : vector<2x8xf32> to vector<2x8x1xf32>
    %cst_71 = arith.constant 1.270000e+02 : f32
    %162 = vector.broadcast %cst_71 : f32 to vector<2x8x1xf32>
    %163 = arith.divf %161, %162 : vector<2x8x1xf32>
    %164 = math.sqrt %163 : vector<2x8x1xf32>
    %165 = vector.broadcast %156 : vector<2x8x1xf32> to vector<2x8x128xf32>
    %166 = arith.subf %148, %165 : vector<2x8x128xf32>
    %167 = vector.shape_cast %150 : vector<1x128xf32> to vector<1x1x128xf32>
    %168 = vector.broadcast %167 : vector<1x1x128xf32> to vector<2x8x128xf32>
    %169 = arith.mulf %168, %166 : vector<2x8x128xf32>
    %cst_72 = arith.constant 9.99999997E-7 : f32
    %170 = vector.broadcast %cst_72 : f32 to vector<2x8x1xf32>
    %171 = arith.addf %164, %170 : vector<2x8x1xf32>
    %172 = vector.broadcast %171 : vector<2x8x1xf32> to vector<2x8x128xf32>
    %173 = arith.divf %169, %172 : vector<2x8x128xf32>
    %174 = vector.shape_cast %152 : vector<1x128xf32> to vector<1x1x128xf32>
    %175 = vector.broadcast %174 : vector<1x1x128xf32> to vector<2x8x128xf32>
    %176 = arith.addf %173, %175 : vector<2x8x128xf32>
    %177 = vector.shape_cast %176 : vector<2x8x128xf32> to vector<16x128xf32>
    %178 = arith.truncf %177 : vector<16x128xf32> to vector<16x128xbf16>
    %179 = vector.shape_cast %4 : vector<2x8x128xf32> to vector<16x128xf32>
    %180 = arith.truncf %179 : vector<16x128xf32> to vector<16x128xbf16>
    %c0_73 = arith.constant 0 : index
    %c0_74 = arith.constant 0 : index
    %c0_75 = arith.constant 0 : index
    %c0_76 = arith.constant 0 : index
    %181 = vector.load %arg11[%c0_73, %c0_74, %c0_75, %c0_76] : memref<1x3x128x128xbf16, #tpu.memory_space<vmem>>, vector<1x1x128x128xbf16>
    %182 = vector.shape_cast %181 : vector<1x1x128x128xbf16> to vector<128x128xbf16>
    %cst_77 = arith.constant dense<0.000000e+00> : vector<16x128xf32>
    %183 = tpu.matmul %178, %182, %cst_77 {dimension_numbers = #tpu.dot_dimension_numbers<[1], [0], [0], [1], [0, 0, 1, 1], [], []>} : vector<16x128xbf16>, vector<128x128xbf16>, vector<16x128xf32> -> vector<16x128xf32>
    %c0_78 = arith.constant 0 : index
    %c0_79 = arith.constant 0 : index
    %c0_80 = arith.constant 0 : index
    %184 = vector.load %arg13[%c0_78, %c0_79, %c0_80] : memref<1x4x128xf32, #tpu.memory_space<vmem>>, vector<1x1x128xf32>
    %185 = vector.shape_cast %184 : vector<1x1x128xf32> to vector<1x128xf32>
    %186 = vector.broadcast %185 : vector<1x128xf32> to vector<16x128xf32>
    %187 = arith.addf %183, %186 : vector<16x128xf32>
    %c0_81 = arith.constant 0 : index
    %c1_82 = arith.constant 1 : index
    %c0_83 = arith.constant 0 : index
    %c0_84 = arith.constant 0 : index
    %188 = vector.load %arg11[%c0_81, %c1_82, %c0_83, %c0_84] : memref<1x3x128x128xbf16, #tpu.memory_space<vmem>>, vector<1x1x128x128xbf16>
    %189 = vector.shape_cast %188 : vector<1x1x128x128xbf16> to vector<128x128xbf16>
    %cst_85 = arith.constant dense<0.000000e+00> : vector<16x128xf32>
    %190 = tpu.matmul %180, %189, %cst_85 {dimension_numbers = #tpu.dot_dimension_numbers<[1], [0], [0], [1], [0, 0, 1, 1], [], []>} : vector<16x128xbf16>, vector<128x128xbf16>, vector<16x128xf32> -> vector<16x128xf32>
    %c0_86 = arith.constant 0 : index
    %c1_87 = arith.constant 1 : index
    %c0_88 = arith.constant 0 : index
    %191 = vector.load %arg13[%c0_86, %c1_87, %c0_88] : memref<1x4x128xf32, #tpu.memory_space<vmem>>, vector<1x1x128xf32>
    %192 = vector.shape_cast %191 : vector<1x1x128xf32> to vector<1x128xf32>
    %193 = vector.broadcast %192 : vector<1x128xf32> to vector<16x128xf32>
    %194 = arith.addf %190, %193 : vector<16x128xf32>
    %c0_89 = arith.constant 0 : index
    %c2_90 = arith.constant 2 : index
    %c0_91 = arith.constant 0 : index
    %c0_92 = arith.constant 0 : index
    %195 = vector.load %arg11[%c0_89, %c2_90, %c0_91, %c0_92] : memref<1x3x128x128xbf16, #tpu.memory_space<vmem>>, vector<1x1x128x128xbf16>
    %196 = vector.shape_cast %195 : vector<1x1x128x128xbf16> to vector<128x128xbf16>
    %cst_93 = arith.constant dense<0.000000e+00> : vector<16x128xf32>
    %197 = tpu.matmul %180, %196, %cst_93 {dimension_numbers = #tpu.dot_dimension_numbers<[1], [0], [0], [1], [0, 0, 1, 1], [], []>} : vector<16x128xbf16>, vector<128x128xbf16>, vector<16x128xf32> -> vector<16x128xf32>
    %c0_94 = arith.constant 0 : index
    %c2_95 = arith.constant 2 : index
    %c0_96 = arith.constant 0 : index
    %198 = vector.load %arg13[%c0_94, %c2_95, %c0_96] : memref<1x4x128xf32, #tpu.memory_space<vmem>>, vector<1x1x128xf32>
    %199 = vector.shape_cast %198 : vector<1x1x128xf32> to vector<1x128xf32>
    %200 = vector.broadcast %199 : vector<1x128xf32> to vector<16x128xf32>
    %201 = arith.addf %197, %200 : vector<16x128xf32>
    %202 = vector.extract_strided_slice %187 {offsets = [0, 0], sizes = [16, 32], strides = [1, 1]} : vector<16x128xf32> to vector<16x32xf32>
    %203 = vector.extract_strided_slice %187 {offsets = [0, 32], sizes = [16, 32], strides = [1, 1]} : vector<16x128xf32> to vector<16x32xf32>
    %204 = vector.extract_strided_slice %187 {offsets = [0, 64], sizes = [16, 32], strides = [1, 1]} : vector<16x128xf32> to vector<16x32xf32>
    %205 = vector.extract_strided_slice %187 {offsets = [0, 96], sizes = [16, 32], strides = [1, 1]} : vector<16x128xf32> to vector<16x32xf32>
    %206 = vector.shape_cast %202 : vector<16x32xf32> to vector<1x16x32xf32>
    %207 = vector.shape_cast %203 : vector<16x32xf32> to vector<1x16x32xf32>
    %208 = vector.shape_cast %204 : vector<16x32xf32> to vector<1x16x32xf32>
    %209 = vector.shape_cast %205 : vector<16x32xf32> to vector<1x16x32xf32>
    %210 = tpu.concatenate %206, %207, %208, %209 in 0 : vector<1x16x32xf32>, vector<1x16x32xf32>, vector<1x16x32xf32>, vector<1x16x32xf32> -> vector<4x16x32xf32>
    %211 = arith.truncf %210 : vector<4x16x32xf32> to vector<4x16x32xbf16>
    %212 = vector.extract_strided_slice %194 {offsets = [0, 0], sizes = [16, 32], strides = [1, 1]} : vector<16x128xf32> to vector<16x32xf32>
    %213 = vector.extract_strided_slice %194 {offsets = [0, 32], sizes = [16, 32], strides = [1, 1]} : vector<16x128xf32> to vector<16x32xf32>
    %214 = vector.extract_strided_slice %194 {offsets = [0, 64], sizes = [16, 32], strides = [1, 1]} : vector<16x128xf32> to vector<16x32xf32>
    %215 = vector.extract_strided_slice %194 {offsets = [0, 96], sizes = [16, 32], strides = [1, 1]} : vector<16x128xf32> to vector<16x32xf32>
    %216 = vector.shape_cast %212 : vector<16x32xf32> to vector<1x16x32xf32>
    %217 = vector.shape_cast %213 : vector<16x32xf32> to vector<1x16x32xf32>
    %218 = vector.shape_cast %214 : vector<16x32xf32> to vector<1x16x32xf32>
    %219 = vector.shape_cast %215 : vector<16x32xf32> to vector<1x16x32xf32>
    %220 = tpu.concatenate %216, %217, %218, %219 in 0 : vector<1x16x32xf32>, vector<1x16x32xf32>, vector<1x16x32xf32>, vector<1x16x32xf32> -> vector<4x16x32xf32>
    %221 = arith.truncf %220 : vector<4x16x32xf32> to vector<4x16x32xbf16>
    %222 = vector.extract_strided_slice %201 {offsets = [0, 0], sizes = [16, 32], strides = [1, 1]} : vector<16x128xf32> to vector<16x32xf32>
    %223 = vector.extract_strided_slice %201 {offsets = [0, 32], sizes = [16, 32], strides = [1, 1]} : vector<16x128xf32> to vector<16x32xf32>
    %224 = vector.extract_strided_slice %201 {offsets = [0, 64], sizes = [16, 32], strides = [1, 1]} : vector<16x128xf32> to vector<16x32xf32>
    %225 = vector.extract_strided_slice %201 {offsets = [0, 96], sizes = [16, 32], strides = [1, 1]} : vector<16x128xf32> to vector<16x32xf32>
    %226 = vector.shape_cast %222 : vector<16x32xf32> to vector<1x16x32xf32>
    %227 = vector.shape_cast %223 : vector<16x32xf32> to vector<1x16x32xf32>
    %228 = vector.shape_cast %224 : vector<16x32xf32> to vector<1x16x32xf32>
    %229 = vector.shape_cast %225 : vector<16x32xf32> to vector<1x16x32xf32>
    %230 = tpu.concatenate %226, %227, %228, %229 in 0 : vector<1x16x32xf32>, vector<1x16x32xf32>, vector<1x16x32xf32>, vector<1x16x32xf32> -> vector<4x16x32xf32>
    %231 = arith.truncf %230 : vector<4x16x32xf32> to vector<4x16x32xbf16>
    %c0_97 = arith.constant 0 : index
    %c0_98 = arith.constant 0 : index
    %c0_99 = arith.constant 0 : index
    %c0_100 = arith.constant 0 : index
    %232 = vector.load %arg12[%c0_97, %c0_98, %c0_99, %c0_100] : memref<1x4x32x128xbf16, #tpu.memory_space<vmem>>, vector<1x4x32x128xbf16>
    %233 = vector.shape_cast %232 : vector<1x4x32x128xbf16> to vector<4x32x128xbf16>
    %234 = vector.extract_strided_slice %211 {offsets = [0, 0, 0], sizes = [4, 8, 32], strides = [1, 1, 1]} : vector<4x16x32xbf16> to vector<4x8x32xbf16>
    %235 = vector.extract_strided_slice %221 {offsets = [0, 0, 0], sizes = [4, 8, 32], strides = [1, 1, 1]} : vector<4x16x32xbf16> to vector<4x8x32xbf16>
    %236 = vector.extract_strided_slice %231 {offsets = [0, 0, 0], sizes = [4, 8, 32], strides = [1, 1, 1]} : vector<4x16x32xbf16> to vector<4x8x32xbf16>
    "tpu.trace_start"() <{level = 10 : i32, message = "htd,hsd->hts"}> : () -> ()
    %cst_101 = arith.constant dense<0.000000e+00> : vector<4x8x8xf32>
    %237 = tpu.matmul %234, %235, %cst_101 {dimension_numbers = #tpu.dot_dimension_numbers<[2], [2], [1], [1], [0, 0, 0, 1, 1, 1], [0], [0]>} : vector<4x8x32xbf16>, vector<4x8x32xbf16>, vector<4x8x8xf32> -> vector<4x8x8xf32>
    "tpu.trace_stop"() : () -> ()
    %238 = vector.extract_strided_slice %6 {offsets = [0, 0, 0], sizes = [1, 1, 8], strides = [1, 1, 1]} : vector<2x1x8xf32> to vector<1x1x8xf32>
    %239 = vector.shape_cast %238 : vector<1x1x8xf32> to vector<1x8xf32>
    %240 = vector.shape_cast %239 : vector<1x8xf32> to vector<1x1x8xf32>
    %241 = vector.broadcast %240 : vector<1x1x8xf32> to vector<4x8x8xf32>
    %242 = arith.addf %237, %241 : vector<4x8x8xf32>
    %cst_102 = arith.constant dense<0xFF800000> : vector<4x8xf32>
    %243 = vector.multi_reduction <maximumf>, %242, %cst_102 [2] : vector<4x8x8xf32> to vector<4x8xf32>
    %244 = vector.shape_cast %243 : vector<4x8xf32> to vector<4x8x1xf32>
    %245 = vector.broadcast %244 : vector<4x8x1xf32> to vector<4x8x8xf32>
    %246 = arith.subf %242, %245 : vector<4x8x8xf32>
    %247 = math.exp %246 : vector<4x8x8xf32>
    %cst_103 = arith.constant dense<0.000000e+00> : vector<4x8xf32>
    %248 = vector.multi_reduction <add>, %247, %cst_103 [2] : vector<4x8x8xf32> to vector<4x8xf32>
    %249 = vector.shape_cast %248 : vector<4x8xf32> to vector<4x8x1xf32>
    %250 = tpu.reciprocal %249 {approx = true} : vector<4x8x1xf32> -> vector<4x8x1xf32>
    %251 = vector.broadcast %250 : vector<4x8x1xf32> to vector<4x8x8xf32>
    %252 = arith.mulf %247, %251 : vector<4x8x8xf32>
    %253 = arith.truncf %252 : vector<4x8x8xf32> to vector<4x8x8xbf16>
    "tpu.trace_start"() <{level = 10 : i32, message = "hts,hsd->htd"}> : () -> ()
    %cst_104 = arith.constant dense<0.000000e+00> : vector<4x8x32xf32>
    %254 = tpu.matmul %253, %236, %cst_104 {dimension_numbers = #tpu.dot_dimension_numbers<[2], [1], [1], [2], [0, 0, 0, 1, 1, 2], [0], [0]>} : vector<4x8x8xbf16>, vector<4x8x32xbf16>, vector<4x8x32xf32> -> vector<4x8x32xf32>
    "tpu.trace_stop"() : () -> ()
    %255 = arith.truncf %254 : vector<4x8x32xf32> to vector<4x8x32xbf16>
    "tpu.trace_start"() <{level = 10 : i32, message = "htd,hdn->htn"}> : () -> ()
    %cst_105 = arith.constant dense<0.000000e+00> : vector<4x8x128xf32>
    %256 = tpu.matmul %255, %233, %cst_105 {dimension_numbers = #tpu.dot_dimension_numbers<[2], [1], [1], [2], [0, 0, 0, 1, 1, 2], [0], [0]>} : vector<4x8x32xbf16>, vector<4x32x128xbf16>, vector<4x8x128xf32> -> vector<4x8x128xf32>
    "tpu.trace_stop"() : () -> ()
    %cst_106 = arith.constant dense<0.000000e+00> : vector<8x128xf32>
    %257 = vector.multi_reduction <add>, %256, %cst_106 [0] : vector<4x8x128xf32> to vector<8x128xf32>
    %258 = vector.extract_strided_slice %211 {offsets = [0, 8, 0], sizes = [4, 8, 32], strides = [1, 1, 1]} : vector<4x16x32xbf16> to vector<4x8x32xbf16>
    %259 = vector.extract_strided_slice %221 {offsets = [0, 8, 0], sizes = [4, 8, 32], strides = [1, 1, 1]} : vector<4x16x32xbf16> to vector<4x8x32xbf16>
    %260 = vector.extract_strided_slice %231 {offsets = [0, 8, 0], sizes = [4, 8, 32], strides = [1, 1, 1]} : vector<4x16x32xbf16> to vector<4x8x32xbf16>
    "tpu.trace_start"() <{level = 10 : i32, message = "htd,hsd->hts"}> : () -> ()
    %cst_107 = arith.constant dense<0.000000e+00> : vector<4x8x8xf32>
    %261 = tpu.matmul %258, %259, %cst_107 {dimension_numbers = #tpu.dot_dimension_numbers<[2], [2], [1], [1], [0, 0, 0, 1, 1, 1], [0], [0]>} : vector<4x8x32xbf16>, vector<4x8x32xbf16>, vector<4x8x8xf32> -> vector<4x8x8xf32>
    "tpu.trace_stop"() : () -> ()
    %262 = vector.extract_strided_slice %6 {offsets = [1, 0, 0], sizes = [1, 1, 8], strides = [1, 1, 1]} : vector<2x1x8xf32> to vector<1x1x8xf32>
    %263 = vector.shape_cast %262 : vector<1x1x8xf32> to vector<1x8xf32>
    %264 = vector.shape_cast %263 : vector<1x8xf32> to vector<1x1x8xf32>
    %265 = vector.broadcast %264 : vector<1x1x8xf32> to vector<4x8x8xf32>
    %266 = arith.addf %261, %265 : vector<4x8x8xf32>
    %cst_108 = arith.constant dense<0xFF800000> : vector<4x8xf32>
    %267 = vector.multi_reduction <maximumf>, %266, %cst_108 [2] : vector<4x8x8xf32> to vector<4x8xf32>
    %268 = vector.shape_cast %267 : vector<4x8xf32> to vector<4x8x1xf32>
    %269 = vector.broadcast %268 : vector<4x8x1xf32> to vector<4x8x8xf32>
    %270 = arith.subf %266, %269 : vector<4x8x8xf32>
    %271 = math.exp %270 : vector<4x8x8xf32>
    %cst_109 = arith.constant dense<0.000000e+00> : vector<4x8xf32>
    %272 = vector.multi_reduction <add>, %271, %cst_109 [2] : vector<4x8x8xf32> to vector<4x8xf32>
    %273 = vector.shape_cast %272 : vector<4x8xf32> to vector<4x8x1xf32>
    %274 = tpu.reciprocal %273 {approx = true} : vector<4x8x1xf32> -> vector<4x8x1xf32>
    %275 = vector.broadcast %274 : vector<4x8x1xf32> to vector<4x8x8xf32>
    %276 = arith.mulf %271, %275 : vector<4x8x8xf32>
    %277 = arith.truncf %276 : vector<4x8x8xf32> to vector<4x8x8xbf16>
    "tpu.trace_start"() <{level = 10 : i32, message = "hts,hsd->htd"}> : () -> ()
    %cst_110 = arith.constant dense<0.000000e+00> : vector<4x8x32xf32>
    %278 = tpu.matmul %277, %260, %cst_110 {dimension_numbers = #tpu.dot_dimension_numbers<[2], [1], [1], [2], [0, 0, 0, 1, 1, 2], [0], [0]>} : vector<4x8x8xbf16>, vector<4x8x32xbf16>, vector<4x8x32xf32> -> vector<4x8x32xf32>
    "tpu.trace_stop"() : () -> ()
    %279 = arith.truncf %278 : vector<4x8x32xf32> to vector<4x8x32xbf16>
    "tpu.trace_start"() <{level = 10 : i32, message = "htd,hdn->htn"}> : () -> ()
    %cst_111 = arith.constant dense<0.000000e+00> : vector<4x8x128xf32>
    %280 = tpu.matmul %279, %233, %cst_111 {dimension_numbers = #tpu.dot_dimension_numbers<[2], [1], [1], [2], [0, 0, 0, 1, 1, 2], [0], [0]>} : vector<4x8x32xbf16>, vector<4x32x128xbf16>, vector<4x8x128xf32> -> vector<4x8x128xf32>
    "tpu.trace_stop"() : () -> ()
    %cst_112 = arith.constant dense<0.000000e+00> : vector<8x128xf32>
    %281 = vector.multi_reduction <add>, %280, %cst_112 [0] : vector<4x8x128xf32> to vector<8x128xf32>
    %282 = vector.shape_cast %257 : vector<8x128xf32> to vector<1x8x128xf32>
    %283 = vector.shape_cast %281 : vector<8x128xf32> to vector<1x8x128xf32>
    %284 = tpu.concatenate %282, %283 in 0 : vector<1x8x128xf32>, vector<1x8x128xf32> -> vector<2x8x128xf32>
    %c0_113 = arith.constant 0 : index
    %c3_114 = arith.constant 3 : index
    %c0_115 = arith.constant 0 : index
    %285 = vector.load %arg13[%c0_113, %c3_114, %c0_115] : memref<1x4x128xf32, #tpu.memory_space<vmem>>, vector<1x1x128xf32>
    %286 = vector.shape_cast %285 : vector<1x1x128xf32> to vector<1x128xf32>
    %287 = vector.shape_cast %286 : vector<1x128xf32> to vector<1x1x128xf32>
    %288 = vector.broadcast %287 : vector<1x1x128xf32> to vector<2x8x128xf32>
    %289 = arith.addf %284, %288 : vector<2x8x128xf32>
    %290 = arith.addf %148, %289 : vector<2x8x128xf32>
    %c0_116 = arith.constant 0 : index
    %c2_117 = arith.constant 2 : index
    %c0_118 = arith.constant 0 : index
    %291 = vector.load %arg6[%c0_116, %c2_117, %c0_118] : memref<1x3x128xf32, #tpu.memory_space<vmem>>, vector<1x1x128xf32>
    %292 = vector.shape_cast %291 : vector<1x1x128xf32> to vector<1x128xf32>
    %c0_119 = arith.constant 0 : index
    %c2_120 = arith.constant 2 : index
    %c0_121 = arith.constant 0 : index
    %293 = vector.load %arg7[%c0_119, %c2_120, %c0_121] : memref<1x3x128xf32, #tpu.memory_space<vmem>>, vector<1x1x128xf32>
    %294 = vector.shape_cast %293 : vector<1x1x128xf32> to vector<1x128xf32>
    %cst_122 = arith.constant dense<0.000000e+00> : vector<2x8xf32>
    %295 = vector.multi_reduction <add>, %290, %cst_122 [2] : vector<2x8x128xf32> to vector<2x8xf32>
    %296 = vector.shape_cast %295 : vector<2x8xf32> to vector<2x8x1xf32>
    %cst_123 = arith.constant 1.280000e+02 : f32
    %297 = vector.broadcast %cst_123 : f32 to vector<2x8x1xf32>
    %298 = arith.divf %296, %297 : vector<2x8x1xf32>
    %299 = vector.broadcast %298 : vector<2x8x1xf32> to vector<2x8x128xf32>
    %300 = arith.subf %290, %299 : vector<2x8x128xf32>
    %301 = arith.mulf %300, %300 : vector<2x8x128xf32>
    %cst_124 = arith.constant dense<0.000000e+00> : vector<2x8xf32>
    %302 = vector.multi_reduction <add>, %301, %cst_124 [2] : vector<2x8x128xf32> to vector<2x8xf32>
    %303 = vector.shape_cast %302 : vector<2x8xf32> to vector<2x8x1xf32>
    %cst_125 = arith.constant 1.270000e+02 : f32
    %304 = vector.broadcast %cst_125 : f32 to vector<2x8x1xf32>
    %305 = arith.divf %303, %304 : vector<2x8x1xf32>
    %306 = math.sqrt %305 : vector<2x8x1xf32>
    %307 = vector.broadcast %298 : vector<2x8x1xf32> to vector<2x8x128xf32>
    %308 = arith.subf %290, %307 : vector<2x8x128xf32>
    %309 = vector.shape_cast %292 : vector<1x128xf32> to vector<1x1x128xf32>
    %310 = vector.broadcast %309 : vector<1x1x128xf32> to vector<2x8x128xf32>
    %311 = arith.mulf %310, %308 : vector<2x8x128xf32>
    %cst_126 = arith.constant 9.99999997E-7 : f32
    %312 = vector.broadcast %cst_126 : f32 to vector<2x8x1xf32>
    %313 = arith.addf %306, %312 : vector<2x8x1xf32>
    %314 = vector.broadcast %313 : vector<2x8x1xf32> to vector<2x8x128xf32>
    %315 = arith.divf %311, %314 : vector<2x8x128xf32>
    %316 = vector.shape_cast %294 : vector<1x128xf32> to vector<1x1x128xf32>
    %317 = vector.broadcast %316 : vector<1x1x128xf32> to vector<2x8x128xf32>
    %318 = arith.addf %315, %317 : vector<2x8x128xf32>
    %319 = vector.shape_cast %318 : vector<2x8x128xf32> to vector<16x128xf32>
    %320 = arith.truncf %319 : vector<16x128xf32> to vector<16x128xbf16>
    %c0_127 = arith.constant 0 : index
    %c0_128 = arith.constant 0 : index
    %c0_129 = arith.constant 0 : index
    %321 = vector.load %arg14[%c0_127, %c0_128, %c0_129] : memref<1x128x256xbf16, #tpu.memory_space<vmem>>, vector<1x128x256xbf16>
    %322 = vector.shape_cast %321 : vector<1x128x256xbf16> to vector<128x256xbf16>
    %cst_130 = arith.constant dense<0.000000e+00> : vector<16x256xf32>
    %323 = tpu.matmul %320, %322, %cst_130 {dimension_numbers = #tpu.dot_dimension_numbers<[1], [0], [0], [1], [0, 0, 1, 1], [], []>} : vector<16x128xbf16>, vector<128x256xbf16>, vector<16x256xf32> -> vector<16x256xf32>
    %c0_131 = arith.constant 0 : index
    %c0_132 = arith.constant 0 : index
    %c0_133 = arith.constant 0 : index
    %324 = vector.load %arg15[%c0_131, %c0_132, %c0_133] : memref<1x1x256xf32, #tpu.memory_space<vmem>>, vector<1x1x256xf32>
    %325 = vector.shape_cast %324 : vector<1x1x256xf32> to vector<1x256xf32>
    %326 = vector.broadcast %325 : vector<1x256xf32> to vector<16x256xf32>
    %327 = arith.addf %323, %326 : vector<16x256xf32>
    %cst_134 = arith.constant 0.000000e+00 : f32
    %328 = vector.broadcast %cst_134 : f32 to vector<16x256xf32>
    %329 = arith.maximumf %327, %328 : vector<16x256xf32>
    %330 = arith.truncf %329 : vector<16x256xf32> to vector<16x256xbf16>
    %c0_135 = arith.constant 0 : index
    %c0_136 = arith.constant 0 : index
    %c0_137 = arith.constant 0 : index
    %331 = vector.load %arg16[%c0_135, %c0_136, %c0_137] : memref<1x256x128xbf16, #tpu.memory_space<vmem>>, vector<1x256x128xbf16>
    %332 = vector.shape_cast %331 : vector<1x256x128xbf16> to vector<256x128xbf16>
    %cst_138 = arith.constant dense<0.000000e+00> : vector<16x128xf32>
    %333 = tpu.matmul %330, %332, %cst_138 {dimension_numbers = #tpu.dot_dimension_numbers<[1], [0], [0], [1], [0, 0, 1, 1], [], []>} : vector<16x256xbf16>, vector<256x128xbf16>, vector<16x128xf32> -> vector<16x128xf32>
    %c0_139 = arith.constant 0 : index
    %c0_140 = arith.constant 0 : index
    %c0_141 = arith.constant 0 : index
    %334 = vector.load %arg17[%c0_139, %c0_140, %c0_141] : memref<1x1x128xf32, #tpu.memory_space<vmem>>, vector<1x1x128xf32>
    %335 = vector.shape_cast %334 : vector<1x1x128xf32> to vector<1x128xf32>
    %336 = vector.broadcast %335 : vector<1x128xf32> to vector<16x128xf32>
    %337 = arith.addf %333, %336 : vector<16x128xf32>
    %338 = vector.shape_cast %337 : vector<16x128xf32> to vector<2x8x128xf32>
    %339 = arith.addf %290, %338 : vector<2x8x128xf32>
    %c0_142 = arith.constant 0 : index
    %c0_143 = arith.constant 0 : index
    %c0_144 = arith.constant 0 : index
    %340 = vector.load %arg21[%c0_142, %c0_143, %c0_144] : memref<2x8x128xf32, #tpu.memory_space<vmem>>, vector<2x8x128xf32>
    tpu.vector_store %arg21[%c0_142, %c0_143, %c0_144], %339 {strides = array<i32>} : memref<2x8x128xf32, #tpu.memory_space<vmem>>, vector<2x8x128xf32>,
    %c1_i32 = arith.constant 1 : i32
    %341 = arith.cmpi eq, %arg1, %c1_i32 : i32
    %342 = arith.extui %341 : i1 to i32
    %c0_i32_145 = arith.constant 0 : i32
    %343 = arith.cmpi ne, %342, %c0_i32_145 : i32
    scf.if %343 {
      %c0_146 = arith.constant 0 : index
      %c0_147 = arith.constant 0 : index
      %344 = vector.load %arg18[%c0_146, %c0_147] : memref<1x128xf32, #tpu.memory_space<vmem>>, vector<1x128xf32>
      %c0_148 = arith.constant 0 : index
      %c0_149 = arith.constant 0 : index
      %345 = vector.load %arg19[%c0_148, %c0_149] : memref<1x128xf32, #tpu.memory_space<vmem>>, vector<1x128xf32>
      %cst_150 = arith.constant dense<0.000000e+00> : vector<2x8xf32>
      %346 = vector.multi_reduction <add>, %339, %cst_150 [2] : vector<2x8x128xf32> to vector<2x8xf32>
      %347 = vector.shape_cast %346 : vector<2x8xf32> to vector<2x8x1xf32>
      %cst_151 = arith.constant 1.280000e+02 : f32
      %348 = vector.broadcast %cst_151 : f32 to vector<2x8x1xf32>
      %349 = arith.divf %347, %348 : vector<2x8x1xf32>
      %350 = vector.broadcast %349 : vector<2x8x1xf32> to vector<2x8x128xf32>
      %351 = arith.subf %339, %350 : vector<2x8x128xf32>
      %352 = arith.mulf %351, %351 : vector<2x8x128xf32>
      %cst_152 = arith.constant dense<0.000000e+00> : vector<2x8xf32>
      %353 = vector.multi_reduction <add>, %352, %cst_152 [2] : vector<2x8x128xf32> to vector<2x8xf32>
      %354 = vector.shape_cast %353 : vector<2x8xf32> to vector<2x8x1xf32>
      %cst_153 = arith.constant 1.270000e+02 : f32
      %355 = vector.broadcast %cst_153 : f32 to vector<2x8x1xf32>
      %356 = arith.divf %354, %355 : vector<2x8x1xf32>
      %357 = math.sqrt %356 : vector<2x8x1xf32>
      %358 = vector.broadcast %349 : vector<2x8x1xf32> to vector<2x8x128xf32>
      %359 = arith.subf %339, %358 : vector<2x8x128xf32>
      %360 = vector.shape_cast %344 : vector<1x128xf32> to vector<1x1x128xf32>
      %361 = vector.broadcast %360 : vector<1x1x128xf32> to vector<2x8x128xf32>
      %362 = arith.mulf %361, %359 : vector<2x8x128xf32>
      %cst_154 = arith.constant 9.99999997E-7 : f32
      %363 = vector.broadcast %cst_154 : f32 to vector<2x8x1xf32>
      %364 = arith.addf %357, %363 : vector<2x8x1xf32>
      %365 = vector.broadcast %364 : vector<2x8x1xf32> to vector<2x8x128xf32>
      %366 = arith.divf %362, %365 : vector<2x8x128xf32>
      %367 = vector.shape_cast %345 : vector<1x128xf32> to vector<1x1x128xf32>
      %368 = vector.broadcast %367 : vector<1x1x128xf32> to vector<2x8x128xf32>
      %369 = arith.addf %366, %368 : vector<2x8x128xf32>
      %c0_155 = arith.constant 0 : index
      %c0_156 = arith.constant 0 : index
      %c0_157 = arith.constant 0 : index
      %370 = vector.load %arg20[%c0_155, %c0_156, %c0_157] : memref<2x8x128xf32, #tpu.memory_space<vmem>>, vector<2x8x128xf32>
      tpu.vector_store %arg20[%c0_155, %c0_156, %c0_157], %369 {strides = array<i32>} : memref<2x8x128xf32, #tpu.memory_space<vmem>>, vector<2x8x128xf32>,
    } else {
    }
    return
  }
  func.func @transform_0(%arg0: i32, %arg1: i32) -> (i32, i32, i32) {
    %c0_i32 = arith.constant 0 : i32
    %c0_i32_0 = arith.constant 0 : i32
    %c0_i32_1 = arith.constant 0 : i32
    return %arg0, %c0_i32, %c0_i32_0 : i32, i32, i32
  }
  func.func @transform_1(%arg0: i32, %arg1: i32) -> (i32, i32, i32) {
    %c0_i32 = arith.constant 0 : i32
    %c0_i32_0 = arith.constant 0 : i32
    %c0_i32_1 = arith.constant 0 : i32
    return %arg0, %c0_i32, %c0_i32_0 : i32, i32, i32
  }
  func.func @transform_2(%arg0: i32, %arg1: i32) -> (i32, i32, i32) {
    %c0_i32 = arith.constant 0 : i32
    %c0_i32_0 = arith.constant 0 : i32
    %c0_i32_1 = arith.constant 0 : i32
    return %arg0, %c0_i32, %c0_i32_0 : i32, i32, i32
  }
  func.func @transform_3(%arg0: i32, %arg1: i32) -> (i32, i32, i32) {
    %c0_i32 = arith.constant 0 : i32
    %c0_i32_0 = arith.constant 0 : i32
    %c0_i32_1 = arith.constant 0 : i32
    return %arg0, %c0_i32, %c0_i32_0 : i32, i32, i32
  }
  func.func @transform_4(%arg0: i32, %arg1: i32) -> (i32, i32, i32) {
    %c0_i32 = arith.constant 0 : i32
    %c0_i32_0 = arith.constant 0 : i32
    %c0_i32_1 = arith.constant 0 : i32
    return %arg1, %c0_i32, %c0_i32_0 : i32, i32, i32
  }
  func.func @transform_5(%arg0: i32, %arg1: i32) -> (i32, i32, i32) {
    %c0_i32 = arith.constant 0 : i32
    %c0_i32_0 = arith.constant 0 : i32
    %c0_i32_1 = arith.constant 0 : i32
    return %arg1, %c0_i32, %c0_i32_0 : i32, i32, i32
  }
  func.func @transform_6(%arg0: i32, %arg1: i32) -> (i32, i32, i32, i32) {
    %c0_i32 = arith.constant 0 : i32
    %c0_i32_0 = arith.constant 0 : i32
    %c0_i32_1 = arith.constant 0 : i32
    %c0_i32_2 = arith.constant 0 : i32
    return %arg1, %c0_i32, %c0_i32_0, %c0_i32_1 : i32, i32, i32, i32
  }
  func.func @transform_7(%arg0: i32, %arg1: i32) -> (i32, i32, i32, i32) {
    %c0_i32 = arith.constant 0 : i32
    %c0_i32_0 = arith.constant 0 : i32
    %c0_i32_1 = arith.constant 0 : i32
    %c0_i32_2 = arith.constant 0 : i32
    return %arg1, %c0_i32, %c0_i32_0, %c0_i32_1 : i32, i32, i32, i32
  }
  func.func @transform_8(%arg0: i32, %arg1: i32) -> (i32, i32, i32) {
    %c0_i32 = arith.constant 0 : i32
    %c0_i32_0 = arith.constant 0 : i32
    %c0_i32_1 = arith.constant 0 : i32
    return %arg1, %c0_i32, %c0_i32_0 : i32, i32, i32
  }
  func.func @transform_9(%arg0: i32, %arg1: i32) -> (i32, i32, i32, i32) {
    %c0_i32 = arith.constant 0 : i32
    %c0_i32_0 = arith.constant 0 : i32
    %c0_i32_1 = arith.constant 0 : i32
    %c0_i32_2 = arith.constant 0 : i32
    return %arg1, %c0_i32, %c0_i32_0, %c0_i32_1 : i32, i32, i32, i32
  }
  func.func @transform_10(%arg0: i32, %arg1: i32) -> (i32, i32, i32, i32) {
    %c0_i32 = arith.constant 0 : i32
    %c0_i32_0 = arith.constant 0 : i32
    %c0_i32_1 = arith.constant 0 : i32
    %c0_i32_2 = arith.constant 0 : i32
    return %arg1, %c0_i32, %c0_i32_0, %c0_i32_1 : i32, i32, i32, i32
  }
  func.func @transform_11(%arg0: i32, %arg1: i32) -> (i32, i32, i32) {
    %c0_i32 = arith.constant 0 : i32
    %c0_i32_0 = arith.constant 0 : i32
    %c0_i32_1 = arith.constant 0 : i32
    return %arg1, %c0_i32, %c0_i32_0 : i32, i32, i32
  }
  func.func @transform_12(%arg0: i32, %arg1: i32) -> (i32, i32, i32) {
    %c0_i32 = arith.constant 0 : i32
    %c0_i32_0 = arith.constant 0 : i32
    %c0_i32_1 = arith.constant 0 : i32
    return %arg1, %c0_i32, %c0_i32_0 : i32, i32, i32
  }
  func.func @transform_13(%arg0: i32, %arg1: i32) -> (i32, i32, i32) {
    %c0_i32 = arith.constant 0 : i32
    %c0_i32_0 = arith.constant 0 : i32
    %c0_i32_1 = arith.constant 0 : i32
    return %arg1, %c0_i32, %c0_i32_0 : i32, i32, i32
  }
  func.func @transform_14(%arg0: i32, %arg1: i32) -> (i32, i32, i32) {
    %c0_i32 = arith.constant 0 : i32
    %c0_i32_0 = arith.constant 0 : i32
    %c0_i32_1 = arith.constant 0 : i32
    return %arg1, %c0_i32, %c0_i32_0 : i32, i32, i32
  }
  func.func @transform_15(%arg0: i32, %arg1: i32) -> (i32, i32, i32) {
    %c0_i32 = arith.constant 0 : i32
    %c0_i32_0 = arith.constant 0 : i32
    %c0_i32_1 = arith.constant 0 : i32
    return %arg1, %c0_i32, %c0_i32_0 : i32, i32, i32
  }
  func.func @transform_16(%arg0: i32, %arg1: i32) -> (i32, i32) {
    %c0_i32 = arith.constant 0 : i32
    %c0_i32_0 = arith.constant 0 : i32
    %c0_i32_1 = arith.constant 0 : i32
    return %c0_i32, %c0_i32_0 : i32, i32
  }
  func.func @transform_17(%arg0: i32, %arg1: i32) -> (i32, i32) {
    %c0_i32 = arith.constant 0 : i32
    %c0_i32_0 = arith.constant 0 : i32
    %c0_i32_1 = arith.constant 0 : i32
    return %c0_i32, %c0_i32_0 : i32, i32
  }
  func.func @transform_18(%arg0: i32, %arg1: i32) -> (i32, i32, i32) {
    %c0_i32 = arith.constant 0 : i32
    %c0_i32_0 = arith.constant 0 : i32
    %c0_i32_1 = arith.constant 0 : i32
    return %arg0, %c0_i32, %c0_i32_0 : i32, i32, i32
  }
}

</mosaic_0001>

<bundles_post_ra>
// kernel: tpu_custom_call.1
= control target key start
LH: loop header
LB: loop body
LE: loop exit
PB: predicated region body
PF: predicated region fallthrough
CT: control target
= control target key end

     0   :  { %s8136_s0 = inlined_call_operand.hbm [shape: f32[2,8,128], index: 0, kind: input, shape index: {}, may-alias: {0,18}]   ;;  %s8137_s1 = inlined_call_operand.vmem [shape: f32[2,8,128], index: 1, kind: input, shape index: {}]   ;;  %s8138_s2 = inlined_call_operand.vmem [shape: f32[2,8,8], index: 2, kind: input, shape index: {}]   ;;  %s8139_s3 = inlined_call_operand.vmem [shape: f32[2,1,8], index: 3, kind: input, shape index: {}]   ;;  %s8140_s4 = inlined_call_operand.vmem [shape: f32[2,3,128], index: 4, kind: input, shape index: {}]   ;;  %s8141_s5 = inlined_call_operand.vmem [shape: f32[2,3,128], index: 5, kind: input, shape index: {}]   ;;  %s8142_s6 = inlined_call_operand.hbm [shape: bf16[2,3,128,128], index: 6, kind: input, shape index: {}]   ;;  %s8143_s7 = inlined_call_operand.hbm [shape: bf16[2,4,32,128], index: 7, kind: input, shape index: {}]   ;;  %s8144_s8 = inlined_call_operand.vmem [shape: f32[2,4,128], index: 8, kind: input, shape index: {}]   ;;  %s8145_s9 = inlined_call_operand.hbm [shape: bf16[2,3,128,128], index: 9, kind: input, shape index: {}]   ;;  %s8146_s10 = inlined_call_operand.hbm [shape: bf16[2,4,32,128], index: 10, kind: input, shape index: {}]   ;;  %s8147_s11 = inlined_call_operand.vmem [shape: f32[2,4,128], index: 11, kind: input, shape index: {}]   ;;  %s8148_s12 = inlined_call_operand.hbm [shape: bf16[2,128,256], index: 12, kind: input, shape index: {}]   ;;  %s8149_s13 = inlined_call_operand.vmem [shape: f32[2,1,256], index: 13, kind: input, shape index: {}]   ;;  %s8150_s14 = inlined_call_operand.hbm [shape: bf16[2,256,128], index: 14, kind: input, shape index: {}]   ;;  %s8151_s15 = inlined_call_operand.vmem [shape: f32[2,1,128], index: 15, kind: input, shape index: {}]   ;;  %s8152_s16 = inlined_call_operand.vmem [shape: f32[1,128], index: 16, kind: input, shape index: {}]   ;;  %s8153_s17 = inlined_call_operand.vmem [shape: f32[1,128], index: 17, kind: input, shape index: {}]   ;;  %s8154_s18 = inlined_call_operand.hbm [shape: f32[2,8,128], index: 18, kind: output, shape index: {}, may-alias: {0,18}]  }
   0x1   :  { %8183 = sst [smem:[#allocation26_spill]] %s8136_s0 }
   0x2   :  { %8184 = sst [smem:[#allocation27_spill]] %s8137_s1 }
   0x3   :  { %8185 = sst [smem:[#allocation28_spill]] %s8138_s2 }
   0x4   :  { %8186 = sst [smem:[#allocation29_spill]] %s8139_s3 }
   0x5   :  { %8187 = sst [smem:[#allocation30_spill]] %s8140_s4 }
   0x6   :  { %8188 = sst [smem:[#allocation31_spill]] %s8141_s5 }
   0x7   :  { %8189 = sst [smem:[#allocation32_spill]] %s8142_s6 }
   0x8   :  { %8190 = sst [smem:[#allocation33_spill]] %s8143_s7 }
   0x9   :  { %8191 = sst [smem:[#allocation34_spill]] %s8144_s8 }
   0xa   :  { %8192 = sst [smem:[#allocation35_spill]] %s8145_s9 }
   0xb   :  { %8193 = sst [smem:[#allocation36_spill]] %s8146_s10 }
   0xc   :  { %8194 = sst [smem:[#allocation37_spill]] %s8147_s11 }
   0xd   :  { %8195 = sst [smem:[#allocation38_spill]] %s8148_s12 }
   0xe   :  { %8196 = sst [smem:[#allocation39_spill]] %s8149_s13 }
   0xf   :  { %8197 = sst [smem:[#allocation40_spill]] %s8150_s14 }
  0x10   :  { %8198 = sst [smem:[#allocation41_spill]] %s8151_s15 }
  0x11   :  { %8199 = sst [smem:[#allocation42_spill]] %s8152_s16 }
  0x12   :  { %8200 = sst [smem:[#allocation43_spill]] %s8153_s17 }
  0x13   :  { %8201 = sst [smem:[#allocation44_spill]] %s8154_s18 }
  0x14   :  { %23 = vsyncpa [#allocation4], 0 }
  0x15   :  { %24 = vsyncpa [#allocation7], 0 }
  0x16   :  { %26 = vsyncpa [#allocation7 + $0x1], 0 }
  0x17   :  { %27 = vsyncpa [#allocation10], 0 }
  0x18   :  { %29 = vsyncpa [#allocation10 + $0x1], 0 }
  0x19   :  { %30 = vsyncpa [#allocation13], 0 }
  0x1a   :  { %32 = vsyncpa [#allocation13 + $0x1], 0 }
  0x1b   :  { %33 = vsyncpa [#allocation5], 0  ;;  %s6969_s27 = smov 0   ;;  %s6971_s28 = smov 0  }
  0x1c   :  { %s6973_s29 = smov 0   ;;  %s6975_s30 = smov 0  }
  0x1d   :  { %s6977_s0 = smov 0   ;;  %s6979_s19 = smov 0  }
  0x1e LB: > { %8202 = sst [smem:[#allocation21_spill]] %s6840_s29  ;;  %s48_s1 = sadd.s32 1, %s6848_s0  ;;  %s6852_s19 = sphi %s6979_s19, %s39_s19   ;;  %s6848_s0 = sphi %s6977_s0, %s8253_s0   ;;  %s6844_s30 = sphi %s6975_s30, %s8252_s30   ;;  %s6840_s29 = sphi %s6973_s29, %s8256_s29   ;;  %s6836_s28 = sphi %s6971_s28, %s8255_s28   ;;  %s6832_s27 = sphi %s6969_s27, %s8254_s27  }
  0x1f   : > { %8203 = sst [smem:[#allocation22_spill]] %s6848_s0  ;;  %s214_s20 = sadd.s32 1, %s6840_s29 }
  0x20   : > { %8204 = sst [smem:[#allocation23_spill]] %s6852_s19  ;;  %p49_p0 = scmp.ge.s32.totalorder %s48_s1, 2 }
  0x21   : > { %p221_p1 = scmp.ne.s32.totalorder %s6840_s29, %s6836_s28  ;;  %p222_p2 = scmp.eq.s32.totalorder %s6852_s19, 0 }
  0x22   : > { %s8258_s1 = smov (%p49_p0, %s48_s1), 0  ;;  %p6194_p4 = scmp.lt.s32.totalorder %s6852_s19, 2 }
  0x23   : > { %8205 = sst [smem:[#allocation24_spill]] %s8258_s1  ;;  %p223_p3 = por %p222_p2, %p221_p1 }
  0x24   : > { %s211_s21 = ssub.s32 %s6848_s0, %s8258_s1  ;;  %s7010_s22 = sand.u32 1, %s6852_s19  }
  0x25   : > { %p212_p5 = scmp.eq.s32.totalorder %s211_s21, 0  ;;  %s7013_s2 = sand.u32 1, %s6840_s29  }
  0x26   : > { %s8161_s23 = smul.u32 3072, %s6848_s0  ;;  %s8207_s6 = sld [smem:[#allocation32_spill]] }
  0x27   : > { %s7017_s24 = scalar_select %p212_p5, %s6840_s29, %s214_s20  }
  0x28   : > { %s8162_s25 = smul.u32 192, %s7013_s2  ;;  %p7027_p6 = pnand %p6194_p4, %p223_p3 }
  0x29   : > { %8206 = sst [smem:[#allocation25_spill]] %s7017_s24 }
  0x2a   : > { %s8208_s21 = scalar_select %p7027_p6, 1, 0 }
  0x2b   : > { %s619_s1 = scalar_lea.vmem [#allocation6], %s8162_s25  ;;  %p7040_p8 = pneg %p7027_p6 }
  0x2c   : > { %s7025_s17 = scalar_lea.hbm %s8207_s6, %s8161_s23  ;;  %s626_s20 = sshll.u32 %s619_s1, 4  ;;  %s7033_s20 = int_to_ptr.vmem [resolvable:$true] %s626_s20 }
  0x2d   : > { %s6552_s29 = scalar_lea.hbm %s7025_s17, 3072  ;;  %s6557_s16 = scalar_lea.hbm %s8207_s6, 6144 }
  0x2e   : > { %p6553_p7 = scmp.ne.s32.totalorder %s7025_s17, %s6552_s29  ;;  %p6558_p11 = scmp.lt.u32.totalorder %s7025_s17, %s8207_s6 }
  0x2f   : > { %s8209_s18 = scalar_select %p7040_p8, 1, 0 }
  0x30   : > { %p6555_p9 = pnand %p7040_p8, %p6553_p7  ;;  %p6559_p12 = scmp.lt.u32.totalorder %s6557_s16, %s6552_s29 }
  0x31   : > { %p6561_p0 = scmp.lt.u32.totalorder %s6552_s29, %s7025_s17 }
  0x32   : > { %p6556_p10 = pneg %p6555_p9  ;;  %p6560_p13 = por %p6559_p12, %p6558_p11 }
  0x34   : > { %p6562_p1 = por %p6561_p0, %p6560_p13 }
  0x36   : > { %p6563_p2 = pnand %p6562_p1, %p6556_p10 }
  0x38   : > { %6566 = shalt.err (!%p6563_p2)
}
  0x39   : > { %s6567_s24 = scalar_lea.vmem %s7033_s20, 3072  ;;  %s6854_s23 = smov [#allocation6]  }
  0x3a   : > { %p6568_p3 = scmp.ne.s32.totalorder %s7033_s20, %s6567_s24  ;;  %s6572_s26 = sshll.u32 %s6854_s23, 4  ;;  %s6573_s26 = int_to_ptr.vmem [resolvable:$false] %s6572_s26 }
  0x3b   : > { %s6574_s25 = scalar_lea.vmem %s6573_s26, 6144  ;;  %p6575_p7 = scmp.lt.s32.totalorder %s7033_s20, %s6573_s26 }
  0x3c   : > { %p6570_p4 = pnand %p6568_p3, %p7040_p8  ;;  %p6576_p9 = scmp.lt.s32.totalorder %s6574_s25, %s6567_s24 }
  0x3e   : > { %p6571_p5 = pneg %p6570_p4  ;;  %p6577_p11 = por %p6576_p9, %p6575_p7 }
  0x40   : > { %p6578_p12 = pnand %p6577_p11, %p6571_p5 }
  0x42   : > { %6581 = shalt.err (!%p6578_p12)
}
  0x43   : > { %s8165_s16 = smov 64   ;;  %s8168_s29 = smov 4  }
  0x44   : > { %s8210_s1 = scalar_lea.sflag [#allocation7], %s7010_s22  ;;  %s8211_s24 = smul.u32 3072, %s6848_s0 }
  0x45   : > { %6177 = dma.hbm_to_vmem [thread:$0]  (!%p7027_p6), %s7025_s17, 3072, %s7033_s20, %s8210_s1, %s8165_s16, %s8165_s16, %s8168_s29  }
  0x46   : > { %s8212_s9 = sld [smem:[#allocation35_spill]]  ;;  %s8213_s6 = smul.u32 192, %s7013_s2 }
  0x47   : > { %s8164_s13 = scalar_lea.sflag [#allocation10], %s7010_s22 }
  0x48   : > { %s668_s3 = scalar_lea.vmem [#allocation9], %s8213_s6 }
  0x49   : > { %s675_s15 = sshll.u32 %s668_s3, 4  ;;  %s7077_s15 = int_to_ptr.vmem [resolvable:$true] %s675_s15 }
  0x4c   : > { %s7073_s25 = scalar_lea.hbm %s8212_s9, %s8211_s24  ;;  %s6587_s1 = scalar_lea.hbm %s8212_s9, 6144 }
  0x4d   : > { %s6582_s11 = scalar_lea.hbm %s7073_s25, 3072  ;;  %p6588_p1 = scmp.lt.u32.totalorder %s7073_s25, %s8212_s9 }
  0x4e   : > { %p6583_p10 = scmp.ne.s32.totalorder %s7073_s25, %s6582_s11  ;;  %p6589_p2 = scmp.lt.u32.totalorder %s6587_s1, %s6582_s11 }
  0x4f   : > { %p6591_p4 = scmp.lt.u32.totalorder %s6582_s11, %s7073_s25 }
  0x50   : > { %p6585_p13 = pnand %p6583_p10, %p7040_p8  ;;  %p6590_p3 = por %p6589_p2, %p6588_p1 }
  0x52   : > { %p6586_p0 = pneg %p6585_p13  ;;  %p6592_p5 = por %p6591_p4, %p6590_p3 }
  0x54   : > { %p6593_p7 = pnand %p6592_p5, %p6586_p0 }
  0x56   : > { %6596 = shalt.err (!%p6593_p7)
}
  0x57   : > { %s6597_s3 = scalar_lea.vmem %s7077_s15, 3072  ;;  %s6857_s6 = smov [#allocation9]  }
  0x58   : > { %p6598_p9 = scmp.ne.s32.totalorder %s7077_s15, %s6597_s3  ;;  %s6602_s26 = sshll.u32 %s6857_s6, 4  ;;  %s6603_s26 = int_to_ptr.vmem [resolvable:$false] %s6602_s26 }
  0x59   : > { %s6604_s17 = scalar_lea.vmem %s6603_s26, 6144  ;;  %p6605_p10 = scmp.lt.s32.totalorder %s7077_s15, %s6603_s26 }
  0x5a   : > { %p6600_p11 = pnand %p6598_p9, %p7040_p8  ;;  %p6606_p13 = scmp.lt.s32.totalorder %s6604_s17, %s6597_s3 }
  0x5c   : > { %p6601_p12 = pneg %p6600_p11  ;;  %p6607_p1 = por %p6606_p13, %p6605_p10 }
  0x5e   : > { %p6608_p2 = pnand %p6607_p1, %p6601_p12 }
  0x60   : > { %6611 = shalt.err (!%p6608_p2)
}
  0x61   : > { %6183 = dma.hbm_to_vmem [thread:$0]  (!%p7027_p6), %s7073_s25, 3072, %s7077_s15, %s8164_s13, %s8165_s16, %s8165_s16, %s8168_s29  }
  0x62   : > { %s5263_s11 = sshll.u32 %s7013_s2, 7  ;;  %s5515_s20 = sshll.u32 %s6848_s0, 11 }
  0x63   : > { %s8214_s12 = sld [smem:[#allocation38_spill]]  ;;  %s717_s3 = scalar_lea.vmem [#allocation12], %s5263_s11 }
  0x64   : > { %s724_s6 = sshll.u32 %s717_s3, 4  ;;  %s8167_s26 = scalar_lea.sflag [#allocation13], %s7010_s22  ;;  %s7117_s6 = int_to_ptr.vmem [resolvable:$true] %s724_s6 }
  0x69   : > { %s7113_s23 = scalar_lea.hbm %s8214_s12, %s5515_s20  ;;  %s6617_s1 = scalar_lea.hbm %s8214_s12, 4096 }
  0x6a   : > { %s6612_s17 = scalar_lea.hbm %s7113_s23, 2048  ;;  %p6618_p5 = scmp.lt.u32.totalorder %s7113_s23, %s8214_s12 }
  0x6b   : > { %p6613_p0 = scmp.ne.s32.totalorder %s7113_s23, %s6612_s17  ;;  %p6619_p7 = scmp.lt.u32.totalorder %s6617_s1, %s6612_s17 }
  0x6c   : > { %p6621_p11 = scmp.lt.u32.totalorder %s6612_s17, %s7113_s23 }
  0x6d   : > { %p6615_p3 = pnand %p6613_p0, %p7040_p8  ;;  %p6620_p9 = por %p6619_p7, %p6618_p5 }
  0x6f   : > { %p6616_p4 = pneg %p6615_p3  ;;  %p6622_p12 = por %p6621_p11, %p6620_p9 }
  0x71   : > { %p6623_p10 = pnand %p6622_p12, %p6616_p4 }
  0x73   : > { %6626 = shalt.err (!%p6623_p10)
}
  0x74   : > { %s6627_s3 = scalar_lea.vmem %s7117_s6, 2048  ;;  %s6858_s15 = smov [#allocation12]  }
  0x75   : > { %p6628_p13 = scmp.ne.s32.totalorder %s7117_s6, %s6627_s3  ;;  %s6632_s25 = sshll.u32 %s6858_s15, 4  ;;  %s6633_s25 = int_to_ptr.vmem [resolvable:$false] %s6632_s25 }
  0x76   : > { %s6634_s13 = scalar_lea.vmem %s6633_s25, 4096  ;;  %p6635_p0 = scmp.lt.s32.totalorder %s7117_s6, %s6633_s25 }
  0x77   : > { %p6630_p1 = pnand %p6628_p13, %p7040_p8  ;;  %p6636_p3 = scmp.lt.s32.totalorder %s6634_s13, %s6627_s3 }
  0x79   : > { %p6631_p2 = pneg %p6630_p1  ;;  %p6637_p5 = por %p6636_p3, %p6635_p0 }
  0x7b   : > { %p6638_p7 = pnand %p6637_p5, %p6631_p2 }
  0x7d   : > { %6641 = shalt.err (!%p6638_p7)
}
  0x7e   : > { %s8170_s17 = smov 128   ;;  %s8171_s1 = smov 8  }
  0x7f   : > { %6189 = dma.hbm_to_vmem [thread:$0]  (!%p7027_p6), %s7113_s23, 2048, %s7117_s6, %s8167_s26, %s8170_s17, %s8170_s17, %s8171_s1  }
  0x80   : > { %s8215_s14 = sld [smem:[#allocation40_spill]]  ;;  %s745_s25 = scalar_lea.vmem [#allocation14], %s5263_s11 }
  0x81   : > { %s752_s13 = sshll.u32 %s745_s25, 4  ;;  %s7158_s16 = sadd.s32 4294967295, %s6852_s19   ;;  %s7155_s13 = int_to_ptr.vmem [resolvable:$true] %s752_s13 }
  0x82   : > { %p227_p4 = scmp.ne.s32.totalorder %s6836_s28, %s6832_s27  ;;  %p8173_p9 = scmp.eq.s32.totalorder %s7158_s16, 0 }
  0x83   : > { %p5249_p11 = scmp.ge.s32.totalorder %s6852_s19, 1  ;;  %p540_p12 = scmp.lt.s32.totalorder %s6852_s19, 3 }
  0x84   : > { %p7167_p10 = por %p8173_p9, %p227_p4  ;;  %s6861_s23 = smov [#allocation3]  }
  0x85   : > { %p7171_p13 = pnand %p5249_p11, %p540_p12  ;;  %s555_s6 = sshll.u32 %s6861_s23, 4  ;;  %s556_s6 = int_to_ptr.vmem [resolvable:$true] %s555_s6 }
  0x86   : > { %s7151_s15 = scalar_lea.hbm %s8215_s14, %s5515_s20  ;;  %s8180_s24 = sshll.u32 %s7013_s2, 6 }
  0x87   : > { %s8216_s20 = scalar_select %p7167_p10, 1, 0 }
  0x88   : > { %s8217_s11 = scalar_select %p7171_p13, 1, 0 }
  0x89   : > { %p6170_p1 = pneg %p7171_p13  ;;  %s5513_s27 = sshll.u32 %s6848_s0, 10 }
  0x8a   : > { %s8219_s7 = sld [smem:[#allocation33_spill]]  ;;  %s640_s17 = scalar_lea.vmem [#allocation8], %s8180_s24 }
  0x8b   : > { %p7181_p2 = pnand %p6170_p1, %p8173_p9  ;;  %s647_s23 = sshll.u32 %s640_s17, 4  ;;  %s7194_s23 = int_to_ptr.vmem [resolvable:$true] %s647_s23 }
  0x8c   : > { %s8220_s12 = sld [smem:[#allocation26_spill]] }
  0x8d   : > { %p6644_p3 = pneg %p7181_p2 }
  0x90   : > { %s7190_s29 = scalar_lea.hbm %s8219_s7, %s5513_s27 }
  0x92   : > { %s6642_s19 = scalar_lea.hbm %s8220_s12, 256 }
  0x93   : > { %p6643_p0 = scmp.ne.s32.totalorder %s8220_s12, %s6642_s19  ;;  %p6649_p4 = scmp.lt.u32.totalorder %s6642_s19, %s8220_s12 }
  0x95   : > { %p6645_p5 = pnand %p6644_p3, %p6643_p0 }
  0x97   : > { %p6646_p7 = pneg %p6645_p5 }
  0x99   : > { %p6651_p11 = pnand %p6649_p4, %p6646_p7 }
  0x9b   : > { %6654 = shalt.err (!%p6651_p11)
}
  0x9c   : > { %s6655_s17 = scalar_lea.vmem %s556_s6, 256  ;;  %p6663_p10 = scmp.lt.s32.totalorder %s556_s6, %s556_s6 }
  0x9d   : > { %p6656_p12 = scmp.ne.s32.totalorder %s556_s6, %s6655_s17  ;;  %p6664_p13 = scmp.lt.s32.totalorder %s6655_s17, %s6655_s17 }
  0x9f   : > { %p6658_p1 = pnand %p6656_p12, %p6644_p3  ;;  %p6665_p6 = por %p6664_p13, %p6663_p10 }
  0xa1   : > { %p6659_p9 = pneg %p6658_p1 }
  0xa3   : > { %p6666_p8 = pnand %p6665_p6, %p6659_p9 }
  0xa5   : > { %6669 = shalt.err (!%p6666_p8)
}
  0xa6   : > { %s8221_s5 = smov 8   ;;  %s8222_s8 = smov 128  }
  0xa7   : > { %6173 = dma.hbm_to_vmem [thread:$0]  (!%p7181_p2), %s8220_s12, 256, %s556_s6, [#allocation4], %s8222_s8, %s8222_s8, %s8221_s5  }
  0xa8   : > { %s6670_s19 = scalar_lea.hbm %s7190_s29, 1024  ;;  %p8223_p3 = scmp.ne.s32.totalorder %s8209_s18, 0 }
  0xa9   : > { %p6671_p0 = scmp.ne.s32.totalorder %s7190_s29, %s6670_s19  ;;  %s6675_s3 = scalar_lea.hbm %s8219_s7, 2048 }
  0xaa   : > { %p6676_p8 = scmp.lt.u32.totalorder %s7190_s29, %s8219_s7  ;;  %p6677_p9 = scmp.lt.u32.totalorder %s6675_s3, %s6670_s19 }
  0xab   : > { %p6673_p10 = pnand %p6671_p0, %p8223_p3  ;;  %p6679_p5 = scmp.lt.u32.totalorder %s6670_s19, %s7190_s29 }
  0xac   : > { %p6678_p13 = por %p6677_p9, %p6676_p8 }
  0xad   : > { %p6674_p6 = pneg %p6673_p10 }
  0xae   : > { %p6680_p7 = por %p6679_p5, %p6678_p13 }
  0xb0   : > { %p6681_p4 = pnand %p6680_p7, %p6674_p6 }
  0xb2   : > { %6684 = shalt.err (!%p6681_p4)
}
  0xb3   : > { %s6685_s6 = scalar_lea.vmem %s7194_s23, 1024  ;;  %s6862_s5 = smov [#allocation8]  }
  0xb4   : > { %p6686_p2 = scmp.ne.s32.totalorder %s7194_s23, %s6685_s6  ;;  %s6690_s8 = sshll.u32 %s6862_s5, 4  ;;  %s6691_s8 = int_to_ptr.vmem [resolvable:$false] %s6690_s8 }
  0xb5   : > { %s6692_s24 = scalar_lea.vmem %s6691_s8, 2048  ;;  %p6693_p1 = scmp.lt.s32.totalorder %s7194_s23, %s6691_s8 }
  0xb6   : > { %p6688_p11 = pnand %p6686_p2, %p8223_p3  ;;  %p6694_p0 = scmp.lt.s32.totalorder %s6692_s24, %s6685_s6 }
  0xb8   : > { %p6689_p12 = pneg %p6688_p11  ;;  %p6695_p10 = por %p6694_p0, %p6693_p1 }
  0xba   : > { %p6696_p8 = pnand %p6695_p10, %p6689_p12 }
  0xbc   : > { %6699 = shalt.err (!%p6696_p8)
}
  0xbd   : > { %p8224_p6 = scmp.ne.s32.totalorder %s8208_s21, 0  ;;  %s8225_s9 = smov 4  }
  0xbe   : > { %s8226_s1 = smov 64   ;;  %s8227_s19 = scalar_lea.sflag [#allocation7], %s7010_s22 }
  0xbf   : > { %6180 = dma.hbm_to_vmem [thread:$0]  (!%p8224_p6), %s7190_s29, 1024, %s7194_s23, %s8227_s19, %s8226_s1, %s8226_s1, %s8225_s9  }
  0xc0   : > { %s8228_s10 = sld [smem:[#allocation36_spill]]  ;;  %s8229_s17 = sshll.u32 %s7013_s2, 6 }
  0xc1   : > { %s689_s6 = scalar_lea.vmem [#allocation11], %s8229_s17 }
  0xc2   : > { %s696_s5 = sshll.u32 %s689_s6, 4  ;;  %s7250_s5 = int_to_ptr.vmem [resolvable:$true] %s696_s5 }
  0xc6   : > { %s7246_s3 = scalar_lea.hbm %s8228_s10, %s5513_s27  ;;  %s6705_s24 = scalar_lea.hbm %s8228_s10, 2048 }
  0xc7   : > { %s6700_s8 = scalar_lea.hbm %s7246_s3, 1024  ;;  %p6706_p7 = scmp.lt.u32.totalorder %s7246_s3, %s8228_s10 }
  0xc8   : > { %p6701_p9 = scmp.ne.s32.totalorder %s7246_s3, %s6700_s8  ;;  %p6707_p4 = scmp.lt.u32.totalorder %s6705_s24, %s6700_s8 }
  0xc9   : > { %p6709_p11 = scmp.lt.u32.totalorder %s6700_s8, %s7246_s3 }
  0xca   : > { %p6703_p13 = pnand %p6701_p9, %p8223_p3  ;;  %p6708_p2 = por %p6707_p4, %p6706_p7 }
  0xcc   : > { %p6704_p5 = pneg %p6703_p13  ;;  %p6710_p12 = por %p6709_p11, %p6708_p2 }
  0xce   : > { %p6711_p1 = pnand %p6710_p12, %p6704_p5 }
  0xd0   : > { %6714 = shalt.err (!%p6711_p1)
}
  0xd1   : > { %s6715_s2 = scalar_lea.vmem %s7250_s5, 1024  ;;  %s6863_s26 = smov [#allocation11]  }
  0xd2   : > { %p6716_p0 = scmp.ne.s32.totalorder %s7250_s5, %s6715_s2  ;;  %s6720_s25 = sshll.u32 %s6863_s26, 4  ;;  %s6721_s25 = int_to_ptr.vmem [resolvable:$false] %s6720_s25 }
  0xd3   : > { %s6722_s17 = scalar_lea.vmem %s6721_s25, 2048  ;;  %p6723_p9 = scmp.lt.s32.totalorder %s7250_s5, %s6721_s25 }
  0xd4   : > { %p6718_p10 = pnand %p6716_p0, %p8223_p3  ;;  %p6724_p13 = scmp.lt.s32.totalorder %s6722_s17, %s6715_s2 }
  0xd6   : > { %p6719_p8 = pneg %p6718_p10  ;;  %p6725_p7 = por %p6724_p13, %p6723_p9 }
  0xd8   : > { %p6726_p4 = pnand %p6725_p7, %p6719_p8 }
  0xda   : > { %6729 = shalt.err (!%p6726_p4)
}
  0xdb   : > { %s8230_s6 = scalar_lea.sflag [#allocation10], %s7010_s22  ;;  %s6730_s8 = scalar_lea.hbm %s7151_s15, 2048 }
  0xdc   : > { %6186 = dma.hbm_to_vmem [thread:$0]  (!%p8224_p6), %s7246_s3, 1024, %s7250_s5, %s8230_s6, %s8226_s1, %s8226_s1, %s8225_s9  }
  0xdd   : > { %p6731_p5 = scmp.ne.s32.totalorder %s7151_s15, %s6730_s8  ;;  %s6735_s24 = scalar_lea.hbm %s8215_s14, 4096 }
  0xde   : > { %p6736_p12 = scmp.lt.u32.totalorder %s7151_s15, %s8215_s14  ;;  %p6737_p1 = scmp.lt.u32.totalorder %s6735_s24, %s6730_s8 }
  0xdf   : > { %p6733_p2 = pnand %p6731_p5, %p8223_p3  ;;  %p6739_p10 = scmp.lt.u32.totalorder %s6730_s8, %s7151_s15 }
  0xe0   : > { %p6738_p0 = por %p6737_p1, %p6736_p12 }
  0xe1   : > { %p6734_p11 = pneg %p6733_p2 }
  0xe2   : > { %p6740_p8 = por %p6739_p10, %p6738_p0 }
  0xe4   : > { %p6741_p9 = pnand %p6740_p8, %p6734_p11 }
  0xe6   : > { %6744 = shalt.err (!%p6741_p9)
}
  0xe7   : > { %s6745_s3 = scalar_lea.vmem %s7155_s13, 2048  ;;  %s6864_s5 = smov [#allocation14]  }
  0xe8   : > { %p6746_p13 = scmp.ne.s32.totalorder %s7155_s13, %s6745_s3  ;;  %s6750_s2 = sshll.u32 %s6864_s5, 4  ;;  %s6751_s2 = int_to_ptr.vmem [resolvable:$false] %s6750_s2 }
  0xe9   : > { %s6752_s26 = scalar_lea.vmem %s6751_s2, 4096  ;;  %p6753_p5 = scmp.lt.s32.totalorder %s7155_s13, %s6751_s2 }
  0xea   : > { %p6748_p7 = pnand %p6746_p13, %p8223_p3  ;;  %p6754_p2 = scmp.lt.s32.totalorder %s6752_s26, %s6745_s3 }
  0xec   : > { %p6749_p4 = pneg %p6748_p7  ;;  %p6755_p12 = por %p6754_p2, %p6753_p5 }
  0xee   : > { %p6756_p1 = pnand %p6755_p12, %p6749_p4 }
  0xf0   : > { %6759 = shalt.err (!%p6756_p1)
}
  0xf1   : > { %s8231_s25 = scalar_lea.sflag [#allocation13], %s7010_s22  ;;  %p8232_p3 = scmp.ne.s32.totalorder %s8217_s11, 0 }
  0xf2   : > { %6192 = dma.hbm_to_vmem [thread:$0]  (!%p8224_p6), %s7151_s15, 2048, %s7155_s13, %s8231_s25, %s8226_s1, %s8226_s1, %s8225_s9  }
  0xf3   : > { %770 = sbr.rel (%p8232_p3) target bundleno = 6257 (0x1871), region = 92  ;;  %p8233_p11 = scmp.eq.s32.totalorder (!%p8232_p3), %s7158_s16, 0 }
  0xfa   : > { %6811 = dma.done.wait (%p8233_p11), [#allocation4], 256   ;;  %p8234_p0 = pmov %p8233_p11 }
  0xfb   : > { %s776_s21 = sand.u32 1, %s7158_s16   ;;  %s778_s18 = sand.u32 1, %s6836_s28  }
  0xfc   : > { %6813 = vsyncadd (%p8234_p0), [#allocation4], 4294967040  ;;  %s6149_s17 = smul.u32 192, %s778_s18  ;;  %s777_s6 = scalar_lea.sflag [#allocation7], %s776_s21 }
  0xfd   : > { %p8235_p10 = scmp.ne.s32.totalorder %s8216_s20, 0 }
  0xfe   : > { %s7312_s22 = scalar_lea.vmem [#allocation6], %s6149_s17 }
  0xff   : > { %6815 = dma.done.wait (%p8235_p10), %s777_s6, 4096  }
 0x100   : > { %6817 = vsyncadd (%p8235_p10), %s777_s6, 4294963200  ;;  %s5271_s15 = sshll.u32 %s778_s18, 6  ;;  %s795_s11 = scalar_lea.sflag [#allocation10], %s776_s21 }
 0x101   : > { %s7318_s13 = scalar_lea.vmem [#allocation8], %s5271_s15  ;;  %s7320_s9 = scalar_lea.vmem [#allocation9], %s6149_s17 }
 0x102   : > { %6819 = dma.done.wait (%p8235_p10), %s795_s11, 4096  }
 0x103   : > { %6821 = vsyncadd (%p8235_p10), %s795_s11, 4294963200  ;;  %s5273_s1 = sshll.u32 %s778_s18, 7  ;;  %s7326_s8 = scalar_lea.vmem [#allocation11], %s5271_s15 }
 0x104   : > { %s813_s29 = scalar_lea.sflag [#allocation13], %s776_s21  ;;  %s7328_s23 = scalar_lea.vmem [#allocation12], %s5273_s1 }
 0x105   : > { %6823 = dma.done.wait (%p8235_p10), %s813_s29, 4096  }
 0x106   : > { %6825 = vsyncadd (%p8235_p10), %s813_s29, 4294963200  ;;  %p953_p6 = scmp.lt.s32.totalorder %s6844_s30, 1  ;;  %s8236_s4 = sld [smem:[#allocation30_spill]] }
 0x107   : > { %s8237_s21 = sld [smem:[#allocation31_spill]]  ;;  %s8238_s6 = sld [smem:[#allocation34_spill]] }
 0x108   : > { %s7336_s24 = scalar_select %p953_p6, %s6844_s30, 1 }
 0x109   : > { %s8239_s7 = sld [smem:[#allocation37_spill]]  ;;  %s8240_s3 = sld [smem:[#allocation39_spill]] }
 0x10a   : > { %s5275_s27 = sshll.u32 %s7336_s24, 2  ;;  %s5279_s19 = sshll.u32 %s7336_s24, 1 }
 0x10b   : > { %s8241_s26 = sld [smem:[#allocation41_spill]]  ;;  %p5280_p8 = scmp.ne.s32.totalorder %s6844_s30, 0 }
 0x10c   : > { %s7343_s2 = scalar_lea.vmem %s8236_s4, %s5275_s27  ;;  %v982_v0 = vld [vmem:[#allocation3] sm:$0xff] (!%p5280_p8)  ;;  %v983_v1 = vld [vmem:[#allocation3 + $0x8] sm:$0xff] (!%p5280_p8) }
 0x10d   : > { %s7348_s20 = scalar_lea.vmem %s8237_s21, %s5275_s27  ;;  %s7353_s15 = scalar_lea.vmem %s8238_s6, %s5275_s27  ;;  %984 = vst [vmem:[#allocation2] sm:$0xff] (!%p5280_p8), %v982_v0  ;;  %985 = vst [vmem:[#allocation2 + $0x8] sm:$0xff] (!%p5280_p8), %v983_v1 }
 0x10e   : > { %s7369_s21 = scalar_lea.vmem [#allocation14], %s5273_s1  ;;  %981 = sbr.rel (%p5280_p8) target bundleno = 277 (0x115), region = 124 }
 0x10f   : > { %s7358_s10 = scalar_lea.vmem %s8239_s7, %s5275_s27  ;;  %s7363_s5 = scalar_lea.vmem %s8240_s3, %s5279_s19 }
 0x111   : > { %s975_s25 = scalar_lea.vmem %s8241_s26, %s7336_s24 }
 0x115 PF: > { %v986_v2 = vld [vmem:[#allocation2] sm:$0xff]  ;;  %v987_v3 = vld [vmem:[#allocation2 + $0x8] sm:$0xff]  ;;  %v6865_v13 = vmov 0.0   ;;  %v6354_v17 = vld [vmem:[%s7312_s22 + $0x10] sm:$0xff]   ;;  %vm6866_vm0 = vmmov 0   ;;  %vm1467_vm5 = vcmask 261120  }
 0x116   : > { %996 = vadd.xlane.f32.xlu0 %v986_v2  ;;  %v6350_v12 = vld [vmem:[%s7312_s22] sm:$0xff]   ;;  %5705 = vmatprep.subr.bf16.mxu0 %v6865_v13  ;;  %v6352_v15 = vld [vmem:[%s7312_s22 + $0x8] sm:$0xff]   ;;  %v6355_v18 = vld [vmem:[%s7312_s22 + $0x50] sm:$0xff]   ;;  %s6867_s4 = smov 96   ;;  %s6868_s7 = smov 32   ;;  %vm1704_vm6 = vcmask 1043456  }
 0x117   : > { %5725 = vmatprep.subr.bf16.mxu1 %v6865_v13  ;;  %v6351_v14 = vld [vmem:[%s7312_s22 + $0x40] sm:$0xff]   ;;  %5706 = vmatpush3.bf16.msra.mxu0 %v6350_v12  ;;  %v6353_v16 = vld [vmem:[%s7312_s22 + $0x48] sm:$0xff]   ;;  %v6356_v19 = vld [vmem:[%s7312_s22 + $0x18] sm:$0xff]   ;;  %s6869_s12 = smov 64   ;;  %vm1652_vm7 = vcmask 64512   ;;  %s8243_s18 = sld [smem:[#allocation27_spill]] }
 0x118   : > { %5726 = vmatpush3.bf16.msra.mxu1 %v6351_v14  ;;  %5707 = vmatprep.subr.bf16.mxu0 %v6865_v13  ;;  %v6357_v20 = vld [vmem:[%s7312_s22 + $0x58] sm:$0xff]   ;;  %v6358_v21 = vld [vmem:[%s7312_s22 + $0x20] sm:$0xff]   ;;  %v6360_v23 = vld [vmem:[%s7312_s22 + $0x28] sm:$0xff]   ;;  %s8244_s11 = sld [smem:[#allocation29_spill]]  ;;  %p5506_p9 = scmp.ne.s32.totalorder %s6844_s30, 1 }
 0x119   : > { %5727 = vmatprep.subr.bf16.mxu1 %v6865_v13  ;;  %5721 = vmatprep.mubr.msk.bf16.mxu0 %vm6866_vm0, %v6865_v13  ;;  %v6359_v22 = vld [vmem:[%s7312_s22 + $0x60] sm:$0xff]   ;;  %v6361_v24 = vld [vmem:[%s7312_s22 + $0x68] sm:$0xff]   ;;  %v6362_v25 = vld [vmem:[%s7312_s22 + $0x30] sm:$0xff]   ;;  %s8247_s26 = sld [smem:[#allocation43_spill]] (!%p5506_p9) }
 0x11a   : > { %998 = vadd.xlane.f32.xlu0 %v987_v3  ;;  %5741 = vmatprep.mubr.msk.bf16.mxu1 %vm6866_vm0, %v6865_v13  ;;  %v6363_v26 = vld [vmem:[%s7312_s22 + $0x70] sm:$0xff]   ;;  %v6364_v27 = vld [vmem:[%s7312_s22 + $0x38] sm:$0xff]   ;;  %v6366_v55 = vld [vmem:[%s7312_s22 + $0x80] sm:$0xff]  }
 0x11b   : > { %5708 = vmatpush3.bf16.msra.mxu0 %v6352_v15  ;;  %v6365_v28 = vld [vmem:[%s7312_s22 + $0x78] sm:$0xff]   ;;  %v6367_v57 = vld [vmem:[%s7312_s22 + $0x88] sm:$0xff]   ;;  %v6368_v58 = vld [vmem:[%s7312_s22 + $0x90] sm:$0xff]  }
 0x11c   : > { %5728 = vmatpush3.bf16.msra.mxu1 %v6353_v16  ;;  %5709 = vmatprep.subr.bf16.mxu0 %v6865_v13  ;;  %v5281_v45 = vld [vmem:[%s7343_s2] ss:$0 sm:$0xff]  ;;  %v6370_v60 = vld [vmem:[%s7312_s22 + $0xa0] sm:$0xff]   ;;  %v6371_v61 = vld [vmem:[%s7312_s22 + $0xa8] sm:$0xff]  }
 0x11d   : > { %5729 = vmatprep.subr.bf16.mxu1 %v6865_v13  ;;  %v5282_v51 = vld [vmem:[%s7348_s20] ss:$0 sm:$0xff]  ;;  %v6372_v62 = vld [vmem:[%s7312_s22 + $0xb0] sm:$0xff]  }
 0x11e   : > { %v6369_v59 = vld [vmem:[%s7312_s22 + $0x98] sm:$0xff]  }
 0x11f   : > { %5710 = vmatpush3.bf16.msra.mxu0 %v6354_v17  ;;  %v6373_v63 = vld [vmem:[%s7312_s22 + $0xb8] sm:$0xff]   ;;  %s8242_s22 = sld [smem:[#allocation28_spill]] }
 0x120   : > { %5730 = vmatpush3.bf16.msra.mxu1 %v6355_v18  ;;  %5711 = vmatprep.subr.bf16.mxu0 %v6865_v13  ;;  %v5283_v0 = vld [vmem:[%s7353_s15] ss:$0 sm:$0xff] }
 0x121   : > { %5731 = vmatprep.subr.bf16.mxu1 %v6865_v13 }
 0x123   : > { %5712 = vmatpush3.bf16.msra.mxu0 %v6356_v19 }
 0x124   : > { %5732 = vmatpush3.bf16.msra.mxu1 %v6357_v20  ;;  %5713 = vmatprep.subr.bf16.mxu0 %v6865_v13  ;;  %v5333_v20 = vld [vmem:[%s7353_s15 + $0x2] ss:$0 sm:$0xff] }
 0x125   : > { %5733 = vmatprep.subr.bf16.mxu1 %v6865_v13 }
 0x127   : > { %5714 = vmatpush3.bf16.msra.mxu0 %v6358_v21 }
 0x128   : > { %5734 = vmatpush3.bf16.msra.mxu1 %v6359_v22  ;;  %5715 = vmatprep.subr.bf16.mxu0 %v6865_v13 }
 0x129   : > { %5735 = vmatprep.subr.bf16.mxu1 %v6865_v13 }
 0x12b   : > { %5716 = vmatpush3.bf16.msra.mxu0 %v6360_v23 }
 0x12c   : > { %5736 = vmatpush3.bf16.msra.mxu1 %v6361_v24  ;;  %5717 = vmatprep.subr.bf16.mxu0 %v6865_v13 }
 0x12d   : > { %5737 = vmatprep.subr.bf16.mxu1 %v6865_v13 }
 0x12f   : > { %5718 = vmatpush3.bf16.msra.mxu0 %v6362_v25 }
 0x130   : > { %5738 = vmatpush3.bf16.msra.mxu1 %v6363_v26  ;;  %5719 = vmatprep.subr.bf16.mxu0 %v6865_v13 }
 0x131   : > { %5739 = vmatprep.subr.bf16.mxu1 %v6865_v13 }
 0x133   : > { %5720 = vmatpush3.bf16.msra.mxu0 %v6364_v27 }
 0x134   : > { %5740 = vmatpush3.bf16.msra.mxu1 %v6365_v28  ;;  %5745 = vmatprep.subr.bf16.mxu0 %v6865_v13 }
 0x135   : > { %5765 = vmatprep.subr.bf16.mxu1 %v6865_v13 }
 0x1a3   : > { %v997_v4 = vpop.xlane.xlu0 %996 }
 0x1a4   : > { %v1001_v5 = vmul.f32 0.0078125, %v997_v4 }
 0x1a6   : > { %v7372_v6 = vsub.f32 %v986_v2, %v1001_v5  ;;  %v5308_v2 = vld [vmem:[%s7353_s15 + $0x1] ss:$0 sm:$0xff] }
 0x1a7   : > { %v999_v7 = vpop.xlane.xlu0 %998 }
 0x1a8   : > { %v1002_v8 = vmul.f32 0.0078125, %v999_v7  ;;  %v1005_v9 = vmul.f32 %v7372_v6, %v7372_v6  ;;  %v1032_v47 = vmul.f32 %v5281_v45, %v7372_v6 }
 0x1aa   : > { %v7376_v10 = vsub.f32 %v987_v3, %v1002_v8  ;;  %1007 = vadd.xlane.f32.xlu1 %v1005_v9 }
 0x1ac   : > { %v1006_v11 = vmul.f32 %v7376_v10, %v7376_v10  ;;  %v1033_v48 = vmul.f32 %v5281_v45, %v7376_v10 }
 0x1ae   : > { %1009 = vadd.xlane.f32.xlu1 %v1006_v11 }
 0x237   : > { %v1008_v29 = vpop.xlane.xlu1 %1007 }
 0x238   : > { %v1012_v30 = vmul.f32 0.007874016, %v1008_v29 }
 0x23a   : > { %6454 = vrsqrt.f32 %v1012_v30  ;;  %vm1016_vm1 = vcmp.eq.f32.partialorder %v1012_v30, inf  ;;  %v1019_v35 = vand.u32 2147483648, %v1012_v30  ;;  %vm1018_vm2 = vcmp.eq.f32.partialorder %v1012_v30, 0.0 }
 0x23b   : > { %v1010_v31 = vpop.xlane.xlu1 %1009 }
 0x23c   : > { %v1013_v32 = vmul.f32 0.007874016, %v1010_v31 }
 0x23e   : > { %6456 = vrsqrt.f32 %v1013_v32  ;;  %vm1023_vm3 = vcmp.eq.f32.partialorder %v1013_v32, inf  ;;  %v1026_v41 = vand.u32 2147483648, %v1013_v32  ;;  %vm1025_vm4 = vcmp.eq.f32.partialorder %v1013_v32, 0.0 }
 0x244   : > { %v6455_v33 = vpop.eup %6454 }
 0x245   : > { %v1015_v34 = vmul.f32 %v6455_v33, %v1012_v30 }
 0x247   : > { %v1017_v36 = vsel %vm1016_vm1, %v1012_v30, %v1015_v34 }
 0x248   : > { %v6457_v37 = vpop.eup %6456  ;;  %v1020_v38 = vsel %vm1018_vm2, %v1019_v35, %v1017_v36 }
 0x249   : > { %v1022_v39 = vmul.f32 %v6457_v37, %v1013_v32  ;;  %v1034_v40 = vadd.f32 1e-06, %v1020_v38 }
 0x24b   : > { %v1024_v42 = vsel %vm1023_vm3, %v1013_v32, %v1022_v39  ;;  %6458 = vrcp.f32 %v1034_v40 }
 0x24c   : > { %v1027_v43 = vsel %vm1025_vm4, %v1026_v41, %v1024_v42 }
 0x24d   : > { %v1035_v44 = vadd.f32 1e-06, %v1027_v43 }
 0x24f   : > { %6460 = vrcp.f32 %v1035_v44 }
 0x255   : > { %v6459_v46 = vpop.eup %6458 }
 0x256   : > { %v1037_v49 = vmul.f32 %v6459_v46, %v1032_v47 }
 0x258   : > { %v1044_v53 = vadd.f32 %v5282_v51, %v1037_v49 }
 0x259   : > { %v6461_v50 = vpop.eup %6460 }
 0x25a   : > { %v1039_v52 = vmul.f32 %v6461_v50, %v1033_v48 }
 0x25c   : > { %v1045_v54 = vadd.f32 %v5282_v51, %v1039_v52 }
 0x25e   : > { %v1046_v56 = vpack.c.bf16 %v1045_v54, %v1044_v53 }
 0x260   : > { %5722 = vmatmul.mubr.bf16.vlgmr.msra.gmra.mrb[0].mxu0 %v1046_v56  ;;  %5742 = vmatmul.mubr.bf16.vlgmr.msra.gmra.mrb[0].mxu1 %v1046_v56 }
 0x261   : > { %5746 = vmatpush3.bf16.msra.mxu0 %v6366_v55  ;;  %5761 = vmatprep.mubr.msk.bf16.mxu0 %vm6866_vm0, %v6865_v13 }
 0x262   : > { %5747 = vmatprep.subr.bf16.mxu0 %v6865_v13  ;;  %5767 = vmatprep.mubr.msk.bf16.mxu1 %vm6866_vm0, %v6865_v13 }
 0x265   : > { %5748 = vmatpush3.bf16.msra.mxu0 %v6367_v57  ;;  %v990_v57 = vld [vmem:[%s8242_s22] sm:$0xff] }
 0x266   : > { %5749 = vmatprep.subr.bf16.mxu0 %v6865_v13 }
 0x269   : > { %5750 = vmatpush3.bf16.msra.mxu0 %v6368_v58 }
 0x26a   : > { %5751 = vmatprep.subr.bf16.mxu0 %v6865_v13 }
 0x26d   : > { %5752 = vmatpush3.bf16.msra.mxu0 %v6369_v59 }
 0x26e   : > { %5753 = vmatprep.subr.bf16.mxu0 %v6865_v13 }
 0x271   : > { %5754 = vmatpush3.bf16.msra.mxu0 %v6370_v60 }
 0x272   : > { %5755 = vmatprep.subr.bf16.mxu0 %v6865_v13 }
 0x275   : > { %5756 = vmatpush3.bf16.msra.mxu0 %v6371_v61 }
 0x276   : > { %5757 = vmatprep.subr.bf16.mxu0 %v6865_v13 }
 0x279   : > { %5758 = vmatpush3.bf16.msra.mxu0 %v6372_v62 }
 0x27a   : > { %5759 = vmatprep.subr.bf16.mxu0 %v6865_v13 }
 0x27d   : > { %5760 = vmatpush3.bf16.msra.mxu0 %v6373_v63 }
 0x27e   : > { %5789 = vmatprep.subr.bf16.mxu0 %v6865_v13 }
 0x280   : > { %5762 = vmatmul.mubr.bf16.vlgmr.msra.gmra.mrb[4].mxu0 %v1046_v56 }
 0x281   : > { %5791 = vmatprep.mubr.msk.bf16.mxu0 %vm6866_vm0, %v6865_v13 }
 0x333   : > { %v1150_v1 = vpop.f32.mrb[0].mxu0  ;;  %v1261_v3 = vpop.f32.mrb[0].mxu1 }
 0x334   : > { %v5723_v4 = vpop.f32.mrb[1].mxu0  ;;  %v5743_v5 = vpop.f32.mrb[1].mxu1  ;;  %v1151_v8 = vadd.f32 %v5283_v0, %v1150_v1  ;;  %v1262_v9 = vadd.f32 %v5308_v2, %v1261_v3 }
 0x335   : > { %v1153_v6 = vpop.f32.mrb[2].mxu0  ;;  %v1264_v7 = vpop.f32.mrb[2].mxu1 }
 0x336   : > { %v1154_v10 = vadd.f32 %v5283_v0, %v1153_v6  ;;  %v1265_v11 = vadd.f32 %v5308_v2, %v1264_v7  ;;  %v5724_v12 = vpop.f32.mrb[3].mxu0  ;;  %v5744_v14 = vpop.f32.mrb[3].mxu1 }
 0x338   : > { %v7446_v15 = vpack.c.bf16 %v1154_v10, %v1151_v8  ;;  %v6260_v16 = vpack.i.bf16 %v1265_v11, %v1262_v9  ;;  %v6265_v17 = vpack.i.bf16 %v1154_v10, %v1151_v8  ;;  %v7448_v18 = vpack.c.bf16 %v1265_v11, %v1262_v9 }
 0x33a   : > { %6261 = vrot.lane.b32.xlu0 %v6260_v16, %s6867_s4  ;;  %6266 = vrot.lane.b32.xlu1 %v6265_v17, %s6867_s4  ;;  %v1472_v19 = vsel %vm1467_vm5, %v7448_v18, 0 }
 0x33b   : > { %5766 = vmatpush3.bf16.xpose.msra.mxu1 %v1472_v19 }
 0x33c   : > { %5771 = vmatprep.subr.bf16.mxu1 %v6865_v13 }
 0x33e   : > { %6281 = vrot.lane.b32.xlu0 %v6260_v16, %s6868_s7  ;;  %6271 = vrot.lane.b32.xlu1 %v6260_v16, %s6869_s12 }
 0x342   : > { %6276 = vrot.lane.b32.xlu1 %v6265_v17, %s6869_s12  ;;  %5768 = vmatmul.mubr.msk.bf16.vlgmr.msra.gmra.mrb[4].mxu1 %vm1467_vm5, %v7446_v15 }
 0x343   : > { %5773 = vmatprep.mubr.msk.bf16.mxu1 %vm6866_vm0, %v6865_v13 }
 0x346   : > { %6286 = vrot.lane.b32.xlu1 %v6265_v17, %s6868_s7 }
 0x353   : > { %v1372_v21 = vpop.f32.mrb[4].mxu0 }
 0x354   : > { %v5763_v22 = vpop.f32.mrb[5].mxu0  ;;  %v1373_v24 = vadd.f32 %v5333_v20, %v1372_v21 }
 0x355   : > { %v1375_v23 = vpop.f32.mrb[6].mxu0 }
 0x356   : > { %v1376_v25 = vadd.f32 %v5333_v20, %v1375_v23  ;;  %v5764_v26 = vpop.f32.mrb[7].mxu0 }
 0x358   : > { %v7464_v27 = vpack.c.bf16 %v1376_v25, %v1373_v24  ;;  %v7466_v28 = vpack.i.bf16 %v1376_v25, %v1373_v24 }
 0x35a   : > { %v1706_v29 = vsel %vm1704_vm6, %v7464_v27, 0 }
 0x35b   : > { %5790 = vmatpush3.bf16.msra.mxu0 %v1706_v29 }
 0x35c   : > { %5801 = vmatprep.subr.bf16.mxu0 %v6865_v13 }
 0x3ac   : > { %v6262_v30 = vpop.permute.xlu0 %6261  ;;  %v6267_v31 = vpop.permute.xlu1 %6266 }
 0x3ad   : > { %v6264_v32 = vunpack.i.h.bf16 %v6262_v30  ;;  %v6263_v33 = vunpack.i.l.bf16 %v6262_v30  ;;  %v6269_v39 = vunpack.i.h.bf16 %v6267_v31  ;;  %v6268_v40 = vunpack.i.l.bf16 %v6267_v31 }
 0x3af   : > { %v7471_v34 = vpack.c.bf16 %v6264_v32, %v6263_v33  ;;  %v7478_v43 = vpack.c.bf16 %v6269_v39, %v6268_v40 }
 0x3b0   : > { %v6272_v35 = vpop.permute.xlu1 %6271  ;;  %v6282_v42 = vpop.permute.xlu0 %6281 }
 0x3b1   : > { %v6274_v36 = vunpack.i.h.bf16 %v6272_v35  ;;  %v6273_v37 = vunpack.i.l.bf16 %v6272_v35  ;;  %v1518_v38 = vsel %vm1467_vm5, %v7471_v34, 0  ;;  %v6284_v45 = vunpack.i.h.bf16 %v6282_v42 }
 0x3b2   : > { %5772 = vmatpush3.bf16.xpose.msra.mxu1 %v1518_v38  ;;  %v6283_v46 = vunpack.i.l.bf16 %v6282_v42 }
 0x3b3   : > { %5777 = vmatprep.subr.bf16.mxu1 %v6865_v13  ;;  %v7476_v41 = vpack.c.bf16 %v6274_v36, %v6273_v37 }
 0x3b4   : > { %v6277_v44 = vpop.permute.xlu1 %6276  ;;  %v7487_v50 = vpack.c.bf16 %v6284_v45, %v6283_v46 }
 0x3b5   : > { %v1564_v47 = vsel %vm1467_vm5, %v7476_v41, 0  ;;  %v6279_v48 = vunpack.i.h.bf16 %v6277_v44  ;;  %v6278_v49 = vunpack.i.l.bf16 %v6277_v44 }
 0x3b6   : > { %v1610_v53 = vsel %vm1467_vm5, %v7487_v50, 0 }
 0x3b7   : > { %v7489_v51 = vpack.c.bf16 %v6279_v48, %v6278_v49 }
 0x3b8   : > { %v6287_v52 = vpop.permute.xlu1 %6286 }
 0x3b9   : > { %5774 = vmatmul.mubr.msk.bf16.vlgmr.msra.gmra.mrb[8].mxu1 %vm1467_vm5, %v7478_v43  ;;  %v6289_v54 = vunpack.i.h.bf16 %v6287_v52  ;;  %v6288_v55 = vunpack.i.l.bf16 %v6287_v52 }
 0x3ba   : > { %5778 = vmatpush3.bf16.xpose.msra.mxu1 %v1564_v47  ;;  %5779 = vmatprep.mubr.msk.bf16.mxu1 %vm6866_vm0, %v6865_v13 }
 0x3bb   : > { %5783 = vmatprep.subr.bf16.mxu1 %v6865_v13  ;;  %v7498_v56 = vpack.c.bf16 %v6289_v54, %v6288_v55 }
 0x3c1   : > { %5780 = vmatmul.mubr.msk.bf16.vlgmr.msra.gmra.mrb[12].mxu1 %vm1467_vm5, %v7489_v51 }
 0x3c2   : > { %5784 = vmatpush3.bf16.xpose.msra.mxu1 %v1610_v53  ;;  %5785 = vmatprep.mubr.msk.bf16.mxu1 %vm6866_vm0, %v6865_v13 }
 0x3c3   : > { %5795 = vmatprep.subr.bf16.mxu1 %v6865_v13 }
 0x3c9   : > { %5786 = vmatmul.mubr.msk.bf16.vlgmr.msra.gmra.mrb[16].mxu1 %vm1467_vm5, %v7498_v56 }
 0x3ca   : > { %5797 = vmatprep.mubr.msk.bf16.mxu1 %vm6866_vm0, %v6865_v13 }
 0x415   : > { %v1508_v58 = vpop.f32.mrb[4].mxu1 }
 0x416   : > { %v1509_v59 = vadd.f32 %v1508_v58, %v990_v57  ;;  %v5769_v60 = vpop.f32.mrb[5].mxu1 }
 0x417   : > { %v1511_v61 = vpop.f32.mrb[6].mxu1 }
 0x418   : > { %v5770_v62 = vpop.f32.mrb[7].mxu1  ;;  %v1653_v63 = vsel %vm1652_vm7, %v1509_v59, -inf }
 0x419   : > { %1654 = vmax.xlane.f32.xlu0 %v1653_v63 }
 0x48c   : > { %v1554_v0 = vpop.f32.mrb[8].mxu1 }
 0x48d   : > { %v1555_v1 = vadd.f32 %v1554_v0, %v990_v57  ;;  %v5775_v2 = vpop.f32.mrb[9].mxu1 }
 0x48e   : > { %v1557_v3 = vpop.f32.mrb[10].mxu1 }
 0x48f   : > { %v5776_v4 = vpop.f32.mrb[11].mxu1  ;;  %v1656_v5 = vsel %vm1652_vm7, %v1555_v1, -inf }
 0x490   : > { %1657 = vmax.xlane.f32.xlu1 %v1656_v5  ;;  %v7536_v5 = vld [vmem:[%s7318_s13] sm:$0xff]  }
 0x494   : > { %v1600_v6 = vpop.f32.mrb[12].mxu1 }
 0x495   : > { %v1601_v7 = vadd.f32 %v1600_v6, %v990_v57  ;;  %v5781_v8 = vpop.f32.mrb[13].mxu1 }
 0x496   : > { %v1603_v9 = vpop.f32.mrb[14].mxu1 }
 0x497   : > { %v5782_v10 = vpop.f32.mrb[15].mxu1  ;;  %v1659_v11 = vsel %vm1652_vm7, %v1601_v7, -inf }
 0x498   : > { %1660 = vmax.xlane.f32.xlu0 %v1659_v11 }
 0x49c   : > { %v1646_v12 = vpop.f32.mrb[16].mxu1 }
 0x49d   : > { %v1647_v14 = vadd.f32 %v1646_v12, %v990_v57  ;;  %v5787_v16 = vpop.f32.mrb[17].mxu1 }
 0x49e   : > { %v1649_v17 = vpop.f32.mrb[18].mxu1 }
 0x49f   : > { %v5788_v19 = vpop.f32.mrb[19].mxu1  ;;  %v1662_v20 = vsel %vm1652_vm7, %v1647_v14, -inf }
 0x4a0   : > { %1663 = vmax.xlane.f32.xlu0 %v1662_v20  ;;  %v7556_v19 = vld [vmem:[%s7318_s13 + $0x10] sm:$0xff]  }
 0x4a6   : > { %v1655_v21 = vpop.xlane.xlu0 %1654 }
 0x4a7   : > { %v1665_v22 = vsub.f32 %v1509_v59, %v1655_v21  ;;  %v7564_v21 = vld [vmem:[%s7318_s13 + $0x18] sm:$0xff]  }
 0x4a9   : > { %v1669_v23 = vmul.f32 1.442695, %v1665_v22 }
 0x4ab   : > { %6462 = vpow2.f32 %v1669_v23  ;;  %v7569_v23 = vld [vmem:[%s7318_s13 + $0x20] sm:$0xff]  }
 0x4b5   : > { %v6463_v24 = vpop.eup %6462 }
 0x4b6   : > { %v1677_v25 = vsel %vm1652_vm7, %v6463_v24, 0.0 }
 0x4b7   : > { %1678 = vadd.xlane.f32.xlu0 %v1677_v25 }
 0x51d   : > { %v1658_v26 = vpop.xlane.xlu1 %1657 }
 0x51e   : > { %v1666_v29 = vsub.f32 %v1555_v1, %v1658_v26 }
 0x520   : > { %v1671_v30 = vmul.f32 1.442695, %v1666_v29 }
 0x522   : > { %6464 = vpow2.f32 %v1671_v30  ;;  %v7574_v30 = vld [vmem:[%s7318_s13 + $0x28] sm:$0xff]  }
 0x525   : > { %v1661_v31 = vpop.xlane.xlu0 %1660 }
 0x526   : > { %v1667_v32 = vsub.f32 %v1601_v7, %v1661_v31  ;;  %v7543_v7 = vld [vmem:[%s7318_s13 + $0x8] sm:$0xff]  }
 0x528   : > { %v1673_v33 = vmul.f32 1.442695, %v1667_v32  ;;  %v7582_v32 = vld [vmem:[%s7318_s13 + $0x30] sm:$0xff]  }
 0x52a   : > { %6466 = vpow2.f32 %v1673_v33 }
 0x52c   : > { %v6465_v35 = vpop.eup %6464 }
 0x52d   : > { %v1680_v36 = vsel %vm1652_vm7, %v6465_v35, 0.0  ;;  %v1664_v39 = vpop.xlane.xlu0 %1663 }
 0x52e   : > { %1681 = vadd.xlane.f32.xlu1 %v1680_v36  ;;  %v1668_v42 = vsub.f32 %v1647_v14, %v1664_v39 }
 0x530   : > { %v1675_v46 = vmul.f32 1.442695, %v1668_v42 }
 0x534   : > { %v6467_v37 = vpop.eup %6466 }
 0x535   : > { %v1683_v38 = vsel %vm1652_vm7, %v6467_v37, 0.0 }
 0x536   : > { %1684 = vadd.xlane.f32.xlu0 %v1683_v38 }
 0x53f   : > { %6296 = vrot.lane.b32.xlu1 %v7466_v28, %s6869_s12 }
 0x544   : > { %v1679_v40 = vpop.xlane.xlu0 %1678 }
 0x545   : > { %6468 = vrcp.f32 %v1679_v40 }
 0x546   : > { %6470 = vpow2.f32 %v1675_v46 }
 0x54c   : > { %6291 = vrot.lane.b32.xlu0 %v7466_v28, %s6867_s4 }
 0x54f   : > { %v6469_v44 = vpop.eup %6468 }
 0x550   : > { %v1693_v45 = vmul.f32 %v6469_v44, %v6463_v24  ;;  %v6471_v48 = vpop.eup %6470  ;;  %v7588_v44 = vld [vmem:[%s7318_s13 + $0x38] sm:$0xff]  }
 0x551   : > { %v1686_v49 = vsel %vm1652_vm7, %v6471_v48, 0.0 }
 0x552   : > { %v1697_v47 = vpack.c.bf16 %v1693_v45, %v1693_v45 }
 0x554   : > { %5792 = vmatmul.mubr.msk.bf16.vlgmr.msra.gmra.mrb[8].mxu0 %vm1652_vm7, %v1697_v47  ;;  %v2216_v47 = vrot.slane %v7476_v41, 4 }
 0x555   : > { %5803 = vmatprep.mubr.msk.bf16.mxu0 %vm6866_vm0, %v6865_v13 }
 0x563   : > { %1687 = vadd.xlane.f32.xlu1 %v1686_v49  ;;  %v2221_v49 = vsel %vm1467_vm5, %v2216_v47, 0 }
 0x574   : > { %6301 = vrot.lane.b32.xlu1 %v7466_v28, %s6868_s7 }
 0x5bb   : > { %v1682_v52 = vpop.xlane.xlu1 %1681 }
 0x5bc   : > { %6472 = vrcp.f32 %v1682_v52  ;;  %v2362_v52 = vrot.slane %v7464_v27, 4 }
 0x5be   : > { %v2367_v41 = vsel %vm1704_vm6, %v2362_v52, 0 }
 0x5bf   : > { %v6297_v53 = vpop.permute.xlu1 %6296 }
 0x5c0   : > { %v6299_v54 = vunpack.i.h.bf16 %v6297_v53  ;;  %v6298_v55 = vunpack.i.l.bf16 %v6297_v53  ;;  %v2214_v53 = vrot.slane %v7489_v51, 4  ;;  %v2266_v51 = vrot.slane %v7487_v50, 4 }
 0x5c2   : > { %v7524_v57 = vpack.c.bf16 %v6299_v54, %v6298_v55 }
 0x5c3   : > { %v1685_v58 = vpop.xlane.xlu0 %1684 }
 0x5c4   : > { %6474 = vrcp.f32 %v1685_v58  ;;  %v1798_v59 = vsel %vm1704_vm6, %v7524_v57, 0 }
 0x5c5   : > { %5802 = vmatpush3.bf16.msra.mxu0 %v1798_v59 }
 0x5c6   : > { %5813 = vmatprep.subr.bf16.mxu0 %v6865_v13  ;;  %v6473_v60 = vpop.eup %6472 }
 0x5c7   : > { %v6292_v61 = vpop.permute.xlu0 %6291  ;;  %v1694_v63 = vmul.f32 %v6473_v60, %v6465_v35 }
 0x5c8   : > { %v6294_v62 = vunpack.i.h.bf16 %v6292_v61  ;;  %v6293_v28 = vunpack.i.l.bf16 %v6292_v61  ;;  %v2164_v61 = vrot.slane %v7478_v43, 4 }
 0x5c9   : > { %v1698_v3 = vpack.c.bf16 %v1694_v63, %v1694_v63 }
 0x5ca   : > { %v7529_v0 = vpack.c.bf16 %v6294_v62, %v6293_v28  ;;  %v2264_v28 = vrot.slane %v7498_v56, 4 }
 0x5cc   : > { %v1752_v1 = vsel %vm1704_vm6, %v7529_v0, 0  ;;  %v2410_v62 = vrot.slane %v7529_v0, 4 }
 0x5cd   : > { %5796 = vmatpush3.bf16.msra.mxu1 %v1752_v1 }
 0x5ce   : > { %v6475_v2 = vpop.eup %6474  ;;  %5807 = vmatprep.subr.bf16.mxu1 %v6865_v13  ;;  %v2415_v50 = vsel %vm1704_vm6, %v2410_v62, 0 }
 0x5cf   : > { %v1695_v4 = vmul.f32 %v6475_v2, %v6467_v37  ;;  %v2116_v37 = vrot.slane %v7448_v18, 4 }
 0x5d0   : > { %5798 = vmatmul.mubr.msk.bf16.vlgmr.msra.gmra.mrb[20].mxu1 %vm1652_vm7, %v1698_v3 }
 0x5d1   : > { %v1699_v6 = vpack.c.bf16 %v1695_v4, %v1695_v4  ;;  %5809 = vmatprep.mubr.msk.bf16.mxu1 %vm6866_vm0, %v6865_v13  ;;  %v2121_v18 = vsel %vm1467_vm5, %v2116_v37, 0 }
 0x5d3   : > { %5804 = vmatmul.mubr.msk.bf16.vlgmr.msra.gmra.mrb[12].mxu0 %vm1652_vm7, %v1699_v6 }
 0x5d4   : > { %5814 = vmatpush3.bf16.msra.mxu0 %v7536_v5  ;;  %5817 = vmatprep.mubr.msk.bf16.mxu0 %vm6866_vm0, %v6865_v13 }
 0x5d5   : > { %5815 = vmatprep.subr.bf16.mxu0 %v6865_v13 }
 0x5d8   : > { %5816 = vmatpush3.bf16.msra.mxu0 %v7543_v7 }
 0x5d9   : > { %5829 = vmatprep.subr.bf16.mxu0 %v6865_v13 }
 0x5f0   : > { %v1688_v8 = vpop.xlane.xlu1 %1687 }
 0x5f1   : > { %6476 = vrcp.f32 %v1688_v8 }
 0x5f4   : > { %v6302_v9 = vpop.permute.xlu1 %6301 }
 0x5f5   : > { %v6304_v10 = vunpack.i.h.bf16 %v6302_v9  ;;  %v6303_v11 = vunpack.i.l.bf16 %v6302_v9 }
 0x5f7   : > { %v7550_v12 = vpack.c.bf16 %v6304_v10, %v6303_v11 }
 0x5f9   : > { %v1844_v14 = vsel %vm1704_vm6, %v7550_v12, 0 }
 0x5fa   : > { %5808 = vmatpush3.bf16.msra.mxu1 %v1844_v14 }
 0x5fb   : > { %v6477_v16 = vpop.eup %6476  ;;  %5821 = vmatprep.subr.bf16.mxu1 %v6865_v13 }
 0x5fc   : > { %v1696_v17 = vmul.f32 %v6477_v16, %v6471_v48  ;;  %v2114_v48 = vrot.slane %v7446_v15, 4  ;;  %v2166_v15 = vrot.slane %v7471_v34, 4  ;;  %v2271_v34 = vsel %vm1467_vm5, %v2266_v51, 0  ;;  %v991_v16 = vld [vmem:[%s8242_s22 + $0x8] sm:$0xff] }
 0x5fe   : > { %v1700_v20 = vpack.c.bf16 %v1696_v17, %v1696_v17  ;;  %v2171_v27 = vsel %vm1467_vm5, %v2166_v15, 0 }
 0x600   : > { %5810 = vmatmul.mubr.msk.bf16.vlgmr.msra.gmra.mrb[24].mxu1 %vm1652_vm7, %v1700_v20 }
 0x601   : > { %5822 = vmatpush3.bf16.msra.mxu1 %v7556_v19  ;;  %5825 = vmatprep.mubr.msk.bf16.mxu1 %vm6866_vm0, %v6865_v13 }
 0x602   : > { %5823 = vmatprep.subr.bf16.mxu1 %v6865_v13 }
 0x605   : > { %5824 = vmatpush3.bf16.msra.mxu1 %v7564_v21 }
 0x606   : > { %5837 = vmatprep.subr.bf16.mxu1 %v6865_v13 }
 0x627   : > { %v1742_v22 = vpop.f32.mrb[8].mxu0 }
 0x628   : > { %v1886_v24 = vpack.c.bf16 %v1742_v22, %v1742_v22  ;;  %v5793_v25 = vpop.f32.mrb[9].mxu0 }
 0x629   : > { %v1745_v26 = vpop.f32.mrb[10].mxu0 }
 0x62a   : > { %v5794_v29 = vpop.f32.mrb[11].mxu0  ;;  %5818 = vmatmul.mubr.msk.bf16.vlgmr.msra.gmra.mrb[16].mxu0 %vm1467_vm5, %v1886_v24 }
 0x62b   : > { %5830 = vmatpush3.bf16.msra.mxu0 %v7569_v23  ;;  %5833 = vmatprep.mubr.msk.bf16.mxu0 %vm6866_vm0, %v6865_v13 }
 0x62c   : > { %5831 = vmatprep.subr.bf16.mxu0 %v6865_v13 }
 0x62f   : > { %5832 = vmatpush3.bf16.msra.mxu0 %v7574_v30 }
 0x630   : > { %5845 = vmatprep.subr.bf16.mxu0 %v6865_v13 }
 0x6a3   : > { %v1788_v31 = vpop.f32.mrb[20].mxu1 }
 0x6a4   : > { %v1887_v33 = vpack.c.bf16 %v1788_v31, %v1788_v31  ;;  %v5799_v35 = vpop.f32.mrb[21].mxu1 }
 0x6a5   : > { %v1791_v36 = vpop.f32.mrb[22].mxu1 }
 0x6a6   : > { %v5800_v38 = vpop.f32.mrb[23].mxu1  ;;  %v1834_v39 = vpop.f32.mrb[12].mxu0  ;;  %5826 = vmatmul.mubr.msk.bf16.vlgmr.msra.gmra.mrb[28].mxu1 %vm1467_vm5, %v1887_v33 }
 0x6a7   : > { %v1888_v40 = vpack.c.bf16 %v1834_v39, %v1834_v39  ;;  %v5805_v42 = vpop.f32.mrb[13].mxu0  ;;  %5838 = vmatpush3.bf16.msra.mxu1 %v7582_v32  ;;  %5841 = vmatprep.mubr.msk.bf16.mxu1 %vm6866_vm0, %v6865_v13 }
 0x6a8   : > { %v1837_v45 = vpop.f32.mrb[14].mxu0  ;;  %5839 = vmatprep.subr.bf16.mxu1 %v6865_v13 }
 0x6a9   : > { %v5806_v46 = vpop.f32.mrb[15].mxu0  ;;  %5834 = vmatmul.mubr.msk.bf16.vlgmr.msra.gmra.mrb[20].mxu0 %vm1467_vm5, %v1888_v40 }
 0x6aa   : > { %5846 = vmatpush3.bf16.xpose.msra.mxu0 %v2121_v18  ;;  %5847 = vmatprep.mubr.msk.bf16.mxu0 %vm6866_vm0, %v6865_v13 }
 0x6ab   : > { %5857 = vmatprep.subr.bf16.mxu0 %v6865_v13  ;;  %5840 = vmatpush3.bf16.msra.mxu1 %v7588_v44 }
 0x6ac   : > { %5851 = vmatprep.subr.bf16.mxu1 %v6865_v13 }
 0x6b1   : > { %5848 = vmatmul.mubr.msk.bf16.vlgmr.msra.gmra.mrb[24].mxu0 %vm1467_vm5, %v2114_v48 }
 0x6b2   : > { %5858 = vmatpush3.bf16.xpose.msra.mxu0 %v2221_v49  ;;  %5859 = vmatprep.mubr.msk.bf16.mxu0 %vm6866_vm0, %v6865_v13 }
 0x6b3   : > { %5869 = vmatprep.subr.bf16.mxu0 %v6865_v13 }
 0x6b9   : > { %5860 = vmatmul.mubr.msk.bf16.vlgmr.msra.gmra.mrb[28].mxu0 %vm1467_vm5, %v2214_v53 }
 0x6ba   : > { %5870 = vmatpush3.bf16.msra.mxu0 %v2367_v41  ;;  %5871 = vmatprep.mubr.msk.bf16.mxu0 %vm6866_vm0, %v6865_v13 }
 0x6bb   : > { %5881 = vmatprep.subr.bf16.mxu0 %v6865_v13 }
 0x6d3   : > { %v1880_v54 = vpop.f32.mrb[24].mxu1 }
 0x6d4   : > { %v1889_v55 = vpack.c.bf16 %v1880_v54, %v1880_v54  ;;  %v5811_v58 = vpop.f32.mrb[25].mxu1 }
 0x6d5   : > { %v1883_v59 = vpop.f32.mrb[26].mxu1 }
 0x6d6   : > { %v5812_v60 = vpop.f32.mrb[27].mxu1  ;;  %5842 = vmatmul.mubr.msk.bf16.vlgmr.msra.gmra.mrb[32].mxu1 %vm1467_vm5, %v1889_v55 }
 0x6d7   : > { %5852 = vmatpush3.bf16.xpose.msra.mxu1 %v2171_v27  ;;  %5853 = vmatprep.mubr.msk.bf16.mxu1 %vm6866_vm0, %v6865_v13 }
 0x6d8   : > { %5863 = vmatprep.subr.bf16.mxu1 %v6865_v13 }
 0x6de   : > { %5854 = vmatmul.mubr.msk.bf16.vlgmr.msra.gmra.mrb[36].mxu1 %vm1467_vm5, %v2164_v61 }
 0x6df   : > { %5864 = vmatpush3.bf16.xpose.msra.mxu1 %v2271_v34  ;;  %5865 = vmatprep.mubr.msk.bf16.mxu1 %vm6866_vm0, %v6865_v13 }
 0x6e0   : > { %5875 = vmatprep.subr.bf16.mxu1 %v6865_v13 }
 0x6e6   : > { %5866 = vmatmul.mubr.msk.bf16.vlgmr.msra.gmra.mrb[40].mxu1 %vm1467_vm5, %v2264_v28 }
 0x6e7   : > { %5876 = vmatpush3.bf16.msra.mxu1 %v2415_v50  ;;  %5877 = vmatprep.mubr.msk.bf16.mxu1 %vm6866_vm0, %v6865_v13 }
 0x6e8   : > { %5887 = vmatprep.subr.bf16.mxu1 %v6865_v13 }
 0x6fd   : > { %v1939_v43 = vpop.f32.mrb[16].mxu0 }
 0x6fe   : > { %v5819_v63 = vpop.f32.mrb[17].mxu0 }
 0x6ff   : > { %v1942_v1 = vpop.f32.mrb[18].mxu0 }
 0x700   : > { %v5820_v2 = vpop.f32.mrb[19].mxu0 }
 0x779   : > { %v1994_v3 = vpop.f32.mrb[28].mxu1 }
 0x77a   : > { %v2110_v4 = vadd.f32 %v1994_v3, %v1939_v43  ;;  %v5827_v6 = vpop.f32.mrb[29].mxu1 }
 0x77b   : > { %v1997_v0 = vpop.f32.mrb[30].mxu1  ;;  %v7643_v6 = vld [vmem:[%s7353_s15 + $0x3] ss:$0 sm:$0xff] }
 0x77c   : > { %v5828_v8 = vpop.f32.mrb[31].mxu1  ;;  %v2049_v56 = vpop.f32.mrb[20].mxu0 }
 0x77d   : > { %v2111_v9 = vadd.f32 %v2110_v4, %v2049_v56  ;;  %v5835_v10 = vpop.f32.mrb[21].mxu0 }
 0x77e   : > { %v2052_v11 = vpop.f32.mrb[22].mxu0 }
 0x77f   : > { %v5836_v14 = vpop.f32.mrb[23].mxu0  ;;  %v6542_v11 = vld [vmem:[#allocation2] sm:$0xff] }
 0x784   : > { %v2157_v17 = vpop.f32.mrb[24].mxu0 }
 0x785   : > { %v2158_v20 = vadd.f32 %v2157_v17, %v991_v16  ;;  %v5849_v22 = vpop.f32.mrb[25].mxu0 }
 0x786   : > { %v2160_v24 = vpop.f32.mrb[26].mxu0 }
 0x787   : > { %v5850_v25 = vpop.f32.mrb[27].mxu0  ;;  %v2313_v26 = vsel %vm1652_vm7, %v2158_v20, -inf  ;;  %v2458_v24 = vrot.slane %v7524_v57, 4 }
 0x788   : > { %2314 = vmax.xlane.f32.xlu1 %v2313_v26 }
 0x789   : > { %v2463_v26 = vsel %vm1704_vm6, %v2458_v24, 0  ;;  %v6543_v24 = vld [vmem:[#allocation2 + $0x8] sm:$0xff] }
 0x78c   : > { %v2257_v29 = vpop.f32.mrb[28].mxu0 }
 0x78d   : > { %v5861_v31 = vpop.f32.mrb[29].mxu0  ;;  %v2258_v47 = vadd.f32 %v2257_v29, %v991_v16 }
 0x78e   : > { %v2260_v33 = vpop.f32.mrb[30].mxu0 }
 0x78f   : > { %v5862_v35 = vpop.f32.mrb[31].mxu0  ;;  %v2319_v52 = vsel %vm1652_vm7, %v2258_v47, -inf }
 0x7a9   : > { %v2104_v36 = vpop.f32.mrb[32].mxu1 }
 0x7aa   : > { %v2112_v37 = vadd.f32 %v2111_v9, %v2104_v36  ;;  %v5843_v38 = vpop.f32.mrb[33].mxu1 }
 0x7ab   : > { %v2107_v39 = vpop.f32.mrb[34].mxu1 }
 0x7ac   : > { %v5844_v40 = vpop.f32.mrb[35].mxu1  ;;  %v2737_v56 = vadd.f32 %v7643_v6, %v2112_v37  ;;  %v2506_v39 = vrot.slane %v7550_v12, 4 }
 0x7ae   : > { %v7648_v14 = vadd.f32 %v6542_v11, %v2737_v56 }
 0x7b1   : > { %v2207_v42 = vpop.f32.mrb[36].mxu1 }
 0x7b2   : > { %v2208_v45 = vadd.f32 %v2207_v42, %v991_v16  ;;  %v5855_v46 = vpop.f32.mrb[37].mxu1 }
 0x7b3   : > { %v2210_v18 = vpop.f32.mrb[38].mxu1 }
 0x7b4   : > { %v5856_v48 = vpop.f32.mrb[39].mxu1  ;;  %v2316_v49 = vsel %vm1652_vm7, %v2208_v45, -inf  ;;  %v2511_v18 = vsel %vm1704_vm6, %v2506_v39, 0  ;;  %v6387_v39 = vld [vmem:[%s7320_s9 + $0x60] sm:$0xff]  }
 0x7b5   : > { %2317 = vmax.xlane.f32.xlu0 %v2316_v49 }
 0x7b9   : > { %v2307_v53 = vpop.f32.mrb[40].mxu1  ;;  %2320 = vmax.xlane.f32.xlu0 %v2319_v52 }
 0x7ba   : > { %v2308_v41 = vadd.f32 %v2307_v53, %v991_v16  ;;  %v5867_v15 = vpop.f32.mrb[41].mxu1 }
 0x7bb   : > { %v2310_v54 = vpop.f32.mrb[42].mxu1 }
 0x7bc   : > { %v5868_v55 = vpop.f32.mrb[43].mxu1  ;;  %v2322_v58 = vsel %vm1652_vm7, %v2308_v41, -inf }
 0x7bd   : > { %2323 = vmax.xlane.f32.xlu0 %v2322_v58 }
 0x815   : > { %v2315_v59 = vpop.xlane.xlu1 %2314 }
 0x816   : > { %v2325_v60 = vsub.f32 %v2158_v20, %v2315_v59 }
 0x818   : > { %v2329_v27 = vmul.f32 1.442695, %v2325_v60 }
 0x81a   : > { %6478 = vpow2.f32 %v2329_v27 }
 0x824   : > { %v6479_v51 = vpop.eup %6478 }
 0x825   : > { %v2337_v61 = vsel %vm1652_vm7, %v6479_v51, 0.0 }
 0x826   : > { %2338 = vadd.xlane.f32.xlu1 %v2337_v61 }
 0x842   : > { %v2318_v34 = vpop.xlane.xlu0 %2317 }
 0x843   : > { %v2326_v62 = vsub.f32 %v2208_v45, %v2318_v34 }
 0x845   : > { %v2331_v28 = vmul.f32 1.442695, %v2326_v62 }
 0x846   : > { %v2321_v50 = vpop.xlane.xlu0 %2320 }
 0x847   : > { %6480 = vpow2.f32 %v2331_v28  ;;  %v2327_v43 = vsub.f32 %v2258_v47, %v2321_v50 }
 0x849   : > { %v2333_v63 = vmul.f32 1.442695, %v2327_v43 }
 0x84a   : > { %v2324_v1 = vpop.xlane.xlu0 %2323 }
 0x84b   : > { %6482 = vpow2.f32 %v2333_v63  ;;  %v2328_v2 = vsub.f32 %v2308_v41, %v2324_v1 }
 0x84d   : > { %v2335_v3 = vmul.f32 1.442695, %v2328_v2 }
 0x84f   : > { %6484 = vpow2.f32 %v2335_v3 }
 0x851   : > { %v6481_v4 = vpop.eup %6480 }
 0x852   : > { %v2340_v0 = vsel %vm1652_vm7, %v6481_v4, 0.0 }
 0x853   : > { %2341 = vadd.xlane.f32.xlu0 %v2340_v0 }
 0x855   : > { %v6483_v8 = vpop.eup %6482 }
 0x856   : > { %v2343_v9 = vsel %vm1652_vm7, %v6483_v8, 0.0 }
 0x857   : > { %2344 = vadd.xlane.f32.xlu1 %v2343_v9 }
 0x859   : > { %v6485_v10 = vpop.eup %6484 }
 0x85a   : > { %v2346_v16 = vsel %vm1652_vm7, %v6485_v10, 0.0 }
 0x85b   : > { %2743 = vadd.xlane.f32.xlu1 %v7648_v14  ;;  %2347 = vadd.xlane.f32.xlu0 %v2346_v16 }
 0x8b3   : > { %v2339_v17 = vpop.xlane.xlu1 %2338 }
 0x8b4   : > { %6486 = vrcp.f32 %v2339_v17 }
 0x8be   : > { %v6487_v20 = vpop.eup %6486 }
 0x8bf   : > { %v2353_v22 = vmul.f32 %v6487_v20, %v6479_v51 }
 0x8c1   : > { %v2357_v25 = vpack.c.bf16 %v2353_v22, %v2353_v22 }
 0x8c3   : > { %5872 = vmatmul.mubr.msk.bf16.vlgmr.msra.gmra.mrb[32].mxu0 %vm1652_vm7, %v2357_v25 }
 0x8c4   : > { %5882 = vmatpush3.bf16.msra.mxu0 %v2463_v26  ;;  %5883 = vmatprep.mubr.msk.bf16.mxu0 %vm6866_vm0, %v6865_v13  ;;  %v6382_v26 = vld [vmem:[%s7320_s9 + $0x40] sm:$0xff]  }
 0x8c5   : > { %5893 = vmatprep.subr.bf16.mxu0 %v6865_v13 }
 0x8e0   : > { %v2342_v29 = vpop.xlane.xlu0 %2341 }
 0x8e1   : > { %6488 = vrcp.f32 %v2342_v29  ;;  %v6383_v29 = vld [vmem:[%s7320_s9 + $0x48] sm:$0xff]  }
 0x8e4   : > { %v2345_v31 = vpop.xlane.xlu1 %2344 }
 0x8e5   : > { %6490 = vrcp.f32 %v2345_v31  ;;  %v6384_v31 = vld [vmem:[%s7320_s9 + $0x50] sm:$0xff]  }
 0x8e8   : > { %v2744_v33 = vpop.xlane.xlu1 %2743  ;;  %v2348_v35 = vpop.xlane.xlu0 %2347 }
 0x8e9   : > { %v2747_v36 = vmul.f32 0.0078125, %v2744_v33  ;;  %6492 = vrcp.f32 %v2348_v35 }
 0x8eb   : > { %v6489_v57 = vpop.eup %6488  ;;  %v7659_v37 = vsub.f32 %v7648_v14, %v2747_v36 }
 0x8ec   : > { %v2354_v38 = vmul.f32 %v6489_v57, %v6481_v4  ;;  %v6385_v57 = vld [vmem:[%s7320_s9 + $0x58] sm:$0xff]  }
 0x8ed   : > { %v2751_v40 = vmul.f32 %v7659_v37, %v7659_v37 }
 0x8ee   : > { %v2358_v42 = vpack.c.bf16 %v2354_v38, %v2354_v38  ;;  %v6386_v38 = vld [vmem:[%s7320_s9] sm:$0xff]  }
 0x8ef   : > { %v6491_v45 = vpop.eup %6490  ;;  %2753 = vadd.xlane.f32.xlu1 %v2751_v40  ;;  %v6388_v40 = vld [vmem:[%s7320_s9 + $0x8] sm:$0xff]  }
 0x8f0   : > { %v2355_v46 = vmul.f32 %v6491_v45, %v6483_v8  ;;  %5878 = vmatmul.mubr.msk.bf16.vlgmr.msra.gmra.mrb[44].mxu1 %vm1652_vm7, %v2358_v42  ;;  %v6389_v42 = vld [vmem:[%s7320_s9 + $0x68] sm:$0xff]   ;;  %v6390_v45 = vld [vmem:[%s7320_s9 + $0x10] sm:$0xff]  }
 0x8f1   : > { %5888 = vmatpush3.bf16.msra.mxu1 %v2511_v18  ;;  %5889 = vmatprep.mubr.msk.bf16.mxu1 %vm6866_vm0, %v6865_v13  ;;  %v6392_v18 = vld [vmem:[%s7320_s9 + $0x18] sm:$0xff]  }
 0x8f2   : > { %v2359_v47 = vpack.c.bf16 %v2355_v46, %v2355_v46  ;;  %5901 = vmatprep.subr.bf16.mxu1 %v6865_v13  ;;  %v6391_v46 = vld [vmem:[%s7320_s9 + $0x70] sm:$0xff]  }
 0x8f3   : > { %v6493_v48 = vpop.eup %6492 }
 0x8f4   : > { %v2356_v12 = vmul.f32 %v6493_v48, %v6485_v10  ;;  %5884 = vmatmul.mubr.msk.bf16.vlgmr.msra.gmra.mrb[36].mxu0 %vm1652_vm7, %v2359_v47  ;;  %v6393_v47 = vld [vmem:[%s7320_s9 + $0x78] sm:$0xff]   ;;  %v6394_v48 = vld [vmem:[%s7320_s9 + $0x20] sm:$0xff]  }
 0x8f5   : > { %5894 = vmatpush3.bf16.msra.mxu0 %v7536_v5  ;;  %5897 = vmatprep.mubr.msk.bf16.mxu0 %vm6866_vm0, %v6865_v13 }
 0x8f6   : > { %v2360_v49 = vpack.c.bf16 %v2356_v12, %v2356_v12  ;;  %5895 = vmatprep.subr.bf16.mxu0 %v6865_v13  ;;  %v988_v12 = vld [vmem:[%s8243_s18] sm:$0xff] }
 0x8f8   : > { %5890 = vmatmul.mubr.msk.bf16.vlgmr.msra.gmra.mrb[48].mxu1 %vm1652_vm7, %v2360_v49  ;;  %v989_v49 = vld [vmem:[%s8243_s18 + $0x8] sm:$0xff] }
 0x8f9   : > { %5896 = vmatpush3.bf16.msra.mxu0 %v7543_v7  ;;  %5902 = vmatpush3.bf16.msra.mxu1 %v7556_v19 }
 0x8fa   : > { %5903 = vmatprep.subr.bf16.mxu1 %v6865_v13  ;;  %5909 = vmatprep.subr.bf16.mxu0 %v6865_v13 }
 0x8fb   : > { %5905 = vmatprep.mubr.msk.bf16.mxu1 %vm6866_vm0, %v6865_v13 }
 0x8fd   : > { %5904 = vmatpush3.bf16.msra.mxu1 %v7564_v21 }
 0x8fe   : > { %5917 = vmatprep.subr.bf16.mxu1 %v6865_v13 }
 0x996   : > { %v2403_v5 = vpop.f32.mrb[32].mxu0 }
 0x997   : > { %v2553_v52 = vpack.c.bf16 %v2403_v5, %v2403_v5  ;;  %v5873_v53 = vpop.f32.mrb[33].mxu0  ;;  %v7742_v5 = vpack.c.bf16 %v989_v49, %v988_v12 }
 0x998   : > { %v2406_v41 = vpop.f32.mrb[34].mxu0  ;;  %v6396_v53 = vld [vmem:[%s7320_s9 + $0x30] sm:$0xff]  }
 0x999   : > { %v5874_v15 = vpop.f32.mrb[35].mxu0  ;;  %5898 = vmatmul.mubr.msk.bf16.vlgmr.msra.gmra.mrb[40].mxu0 %vm1467_vm5, %v2553_v52  ;;  %v6395_v52 = vld [vmem:[%s7320_s9 + $0x28] sm:$0xff]   ;;  %v6397_v41 = vld [vmem:[%s7320_s9 + $0x38] sm:$0xff]  }
 0x99a   : > { %5910 = vmatpush3.bf16.msra.mxu0 %v7569_v23  ;;  %5913 = vmatprep.mubr.msk.bf16.mxu0 %vm6866_vm0, %v6865_v13  ;;  %v2754_v15 = vpop.xlane.xlu1 %2753 }
 0x99b   : > { %5911 = vmatprep.subr.bf16.mxu0 %v6865_v13 }
 0x99e   : > { %5912 = vmatpush3.bf16.msra.mxu0 %v7574_v30 }
 0x99f   : > { %5925 = vmatprep.subr.bf16.mxu0 %v6865_v13 }
 0x9c3   : > { %v2451_v7 = vpop.f32.mrb[44].mxu1 }
 0x9c4   : > { %v2554_v19 = vpack.c.bf16 %v2451_v7, %v2451_v7  ;;  %v5879_v21 = vpop.f32.mrb[45].mxu1  ;;  %v2757_v7 = vmul.f32 0.007874016, %v2754_v15 }
 0x9c5   : > { %v2454_v54 = vpop.f32.mrb[46].mxu1 }
 0x9c6   : > { %v5880_v55 = vpop.f32.mrb[47].mxu1  ;;  %5906 = vmatmul.mubr.msk.bf16.vlgmr.msra.gmra.mrb[52].mxu1 %vm1467_vm5, %v2554_v19  ;;  %6494 = vrsqrt.f32 %v2757_v7  ;;  %vm2761_vm8 = vcmp.eq.f32.partialorder %v2757_v7, inf  ;;  %vm2763_vm9 = vcmp.eq.f32.partialorder %v2757_v7, 0.0 }
 0x9c7   : > { %v2499_v58 = vpop.f32.mrb[36].mxu0  ;;  %5918 = vmatpush3.bf16.msra.mxu1 %v7582_v32  ;;  %5921 = vmatprep.mubr.msk.bf16.mxu1 %vm6866_vm0, %v6865_v13 }
 0x9c8   : > { %v2555_v23 = vpack.c.bf16 %v2499_v58, %v2499_v58  ;;  %v5885_v59 = vpop.f32.mrb[37].mxu0  ;;  %5919 = vmatprep.subr.bf16.mxu1 %v6865_v13 }
 0x9c9   : > { %v2502_v30 = vpop.f32.mrb[38].mxu0 }
 0x9ca   : > { %v5886_v60 = vpop.f32.mrb[39].mxu0  ;;  %5914 = vmatmul.mubr.msk.bf16.vlgmr.msra.gmra.mrb[44].mxu0 %vm1467_vm5, %v2555_v23  ;;  %v2764_v23 = vand.u32 2147483648, %v2757_v7 }
 0x9cb   : > { %v2547_v27 = vpop.f32.mrb[48].mxu1  ;;  %5920 = vmatpush3.bf16.msra.mxu1 %v7588_v44  ;;  %5941 = vmatprep.mubr.msk.bf16.mxu0 %vm6866_vm0, %v6865_v13 }
 0x9cc   : > { %v2556_v51 = vpack.c.bf16 %v2547_v27, %v2547_v27  ;;  %v5891_v61 = vpop.f32.mrb[49].mxu1  ;;  %5945 = vmatprep.subr.bf16.mxu1 %v6865_v13  ;;  %5926 = vmatpush3.bf16.msra.mxu0 %v6386_v38 }
 0x9cd   : > { %v2550_v32 = vpop.f32.mrb[50].mxu1  ;;  %5927 = vmatprep.subr.bf16.mxu0 %v6865_v13 }
 0x9ce   : > { %v5892_v34 = vpop.f32.mrb[51].mxu1  ;;  %5922 = vmatmul.mubr.msk.bf16.vlgmr.msra.gmra.mrb[56].mxu1 %vm1467_vm5, %v2556_v51 }
 0x9cf   : > { %5961 = vmatprep.mubr.msk.bf16.mxu1 %vm6866_vm0, %v6865_v13  ;;  %5946 = vmatpush3.bf16.msra.mxu1 %v6382_v26  ;;  %v6399_v26 = vld [vmem:[%s7320_s9 + $0x88] sm:$0xff]  }
 0x9d0   : > { %5947 = vmatprep.subr.bf16.mxu1 %v6865_v13  ;;  %5928 = vmatpush3.bf16.msra.mxu0 %v6388_v40  ;;  %v6495_v19 = vpop.eup %6494  ;;  %v5377_v40 = vld [vmem:[%s7358_s10] ss:$0 sm:$0xff] }
 0x9d1   : > { %5929 = vmatprep.subr.bf16.mxu0 %v6865_v13  ;;  %v2760_v55 = vmul.f32 %v6495_v19, %v2757_v7 }
 0x9d3   : > { %5948 = vmatpush3.bf16.msra.mxu1 %v6383_v29  ;;  %v2762_v58 = vsel %vm2761_vm8, %v2757_v7, %v2760_v55  ;;  %v6400_v29 = vld [vmem:[%s7320_s9 + $0x90] sm:$0xff]  }
 0x9d4   : > { %5949 = vmatprep.subr.bf16.mxu1 %v6865_v13  ;;  %5930 = vmatpush3.bf16.msra.mxu0 %v6390_v45  ;;  %v2765_v59 = vsel %vm2763_vm9, %v2764_v23, %v2762_v58 }
 0x9d5   : > { %5931 = vmatprep.subr.bf16.mxu0 %v6865_v13  ;;  %v2779_v30 = vadd.f32 1e-06, %v2765_v59 }
 0x9d7   : > { %5950 = vmatpush3.bf16.msra.mxu1 %v6384_v31  ;;  %v6401_v31 = vld [vmem:[%s7320_s9 + $0x98] sm:$0xff]  }
 0x9d8   : > { %5951 = vmatprep.subr.bf16.mxu1 %v6865_v13  ;;  %5932 = vmatpush3.bf16.msra.mxu0 %v6392_v18 }
 0x9d9   : > { %5933 = vmatprep.subr.bf16.mxu0 %v6865_v13 }
 0x9db   : > { %5952 = vmatpush3.bf16.msra.mxu1 %v6385_v57 }
 0x9dc   : > { %5953 = vmatprep.subr.bf16.mxu1 %v6865_v13  ;;  %5934 = vmatpush3.bf16.msra.mxu0 %v6394_v48 }
 0x9dd   : > { %5935 = vmatprep.subr.bf16.mxu0 %v6865_v13 }
 0x9df   : > { %5954 = vmatpush3.bf16.msra.mxu1 %v6387_v39 }
 0x9e0   : > { %5955 = vmatprep.subr.bf16.mxu1 %v6865_v13  ;;  %5936 = vmatpush3.bf16.msra.mxu0 %v6395_v52 }
 0x9e1   : > { %5937 = vmatprep.subr.bf16.mxu0 %v6865_v13 }
 0x9e3   : > { %5956 = vmatpush3.bf16.msra.mxu1 %v6389_v42 }
 0x9e4   : > { %5957 = vmatprep.subr.bf16.mxu1 %v6865_v13  ;;  %5938 = vmatpush3.bf16.msra.mxu0 %v6396_v53 }
 0x9e5   : > { %5939 = vmatprep.subr.bf16.mxu0 %v6865_v13 }
 0x9e7   : > { %5958 = vmatpush3.bf16.msra.mxu1 %v6391_v46 }
 0x9e8   : > { %5959 = vmatprep.subr.bf16.mxu1 %v6865_v13  ;;  %5940 = vmatpush3.bf16.msra.mxu0 %v6397_v41 }
 0x9e9   : > { %5965 = vmatprep.subr.bf16.mxu0 %v6865_v13 }
 0x9eb   : > { %5960 = vmatpush3.bf16.msra.mxu1 %v6393_v47 }
 0x9ec   : > { %5985 = vmatprep.subr.bf16.mxu1 %v6865_v13 }
 0x9ee   : > { %5962 = vmatmul.mubr.bf16.vlgmr.msra.gmra.mrb[60].mxu1 %v7742_v5 }
 0x9ef   : > { %5987 = vmatprep.mubr.msk.bf16.mxu1 %vm6866_vm0, %v6865_v13 }
 0xa6c   : > { %v2594_v62 = vpop.f32.mrb[40].mxu0 }
 0xa6d   : > { %v5899_v28 = vpop.f32.mrb[41].mxu0 }
 0xa6e   : > { %v2597_v50 = vpop.f32.mrb[42].mxu0 }
 0xa6f   : > { %v5900_v43 = vpop.f32.mrb[43].mxu0 }
 0xa99   : > { %v2637_v63 = vpop.f32.mrb[52].mxu1 }
 0xa9a   : > { %v2729_v44 = vadd.f32 %v2637_v63, %v2594_v62  ;;  %v5907_v1 = vpop.f32.mrb[53].mxu1  ;;  %v5375_v62 = vld [vmem:[%s7343_s2 + $0x1] ss:$0 sm:$0xff] }
 0xa9b   : > { %v2640_v2 = vpop.f32.mrb[54].mxu1  ;;  %v2777_v50 = vmul.f32 %v5375_v62, %v7659_v37  ;;  %v5376_v1 = vld [vmem:[%s7348_s20 + $0x1] ss:$0 sm:$0xff] }
 0xa9c   : > { %v5908_v3 = vpop.f32.mrb[55].mxu1 }
 0xa9d   : > { %v2680_v4 = vpop.f32.mrb[44].mxu0 }
 0xa9e   : > { %v2730_v0 = vadd.f32 %v2729_v44, %v2680_v4  ;;  %v5915_v8 = vpop.f32.mrb[45].mxu0 }
 0xa9f   : > { %v2683_v56 = vpop.f32.mrb[46].mxu0  ;;  %v5402_v8 = vld [vmem:[%s7358_s10 + $0x1] ss:$0 sm:$0xff] }
 0xaa0   : > { %v5916_v9 = vpop.f32.mrb[47].mxu0 }
 0xaa1   : > { %v2723_v10 = vpop.f32.mrb[56].mxu1 }
 0xaa2   : > { %v2731_v11 = vadd.f32 %v2730_v0, %v2723_v10  ;;  %v5923_v16 = vpop.f32.mrb[57].mxu1 }
 0xaa3   : > { %v2726_v17 = vpop.f32.mrb[58].mxu1 }
 0xaa4   : > { %v2738_v20 = vadd.f32 %v7643_v6, %v2731_v11  ;;  %v5924_v22 = vpop.f32.mrb[59].mxu1 }
 0xaa6   : > { %v7704_v25 = vadd.f32 %v6543_v24, %v2738_v20  ;;  %v6398_v24 = vld [vmem:[%s7320_s9 + $0x80] sm:$0xff]  }
 0xaa8   : > { %2745 = vadd.xlane.f32.xlu0 %v7704_v25 }
 0xac1   : > { %v3007_v56 = vpop.f32.mrb[60].mxu1 }
 0xac2   : > { %v3008_v9 = vadd.f32 %v5402_v8, %v3007_v56  ;;  %v5963_v10 = vpop.f32.mrb[61].mxu1 }
 0xac3   : > { %v3010_v37 = vpop.f32.mrb[62].mxu1 }
 0xac4   : > { %v3011_v11 = vadd.f32 %v5402_v8, %v3010_v37  ;;  %v5964_v16 = vpop.f32.mrb[63].mxu1  ;;  %v5427_v37 = vld [vmem:[%s7358_s10 + $0x2] ss:$0 sm:$0xff] }
 0xac6   : > { %v6305_v17 = vpack.i.bf16 %v3011_v11, %v3008_v9  ;;  %v7762_v20 = vpack.c.bf16 %v3011_v11, %v3008_v9 }
 0xac8   : > { %6306 = vrot.lane.b32.xlu1 %v6305_v17, %s6867_s4  ;;  %v3223_v22 = vsel %vm1467_vm5, %v7762_v20, 0 }
 0xac9   : > { %5986 = vmatpush3.bf16.xpose.msra.mxu1 %v3223_v22 }
 0xaca   : > { %5991 = vmatprep.subr.bf16.mxu1 %v6865_v13 }
 0xacc   : > { %6316 = vrot.lane.b32.xlu1 %v6305_v17, %s6869_s12 }
 0xb35   : > { %v2746_v6 = vpop.xlane.xlu0 %2745 }
 0xb36   : > { %v2748_v33 = vmul.f32 0.0078125, %v2746_v6  ;;  %v6402_v6 = vld [vmem:[%s7320_s9 + $0xa0] sm:$0xff]  }
 0xb38   : > { %v7714_v35 = vsub.f32 %v7704_v25, %v2748_v33  ;;  %v6403_v33 = vld [vmem:[%s7320_s9 + $0xa8] sm:$0xff]  }
 0xb3a   : > { %v2752_v36 = vmul.f32 %v7714_v35, %v7714_v35  ;;  %v2778_v43 = vmul.f32 %v5375_v62, %v7714_v35  ;;  %v6404_v35 = vld [vmem:[%s7320_s9 + $0xb0] sm:$0xff]   ;;  %v6307_v57 = vpop.permute.xlu1 %6306 }
 0xb3b   : > { %v6309_v38 = vunpack.i.h.bf16 %v6307_v57  ;;  %v6308_v39 = vunpack.i.l.bf16 %v6307_v57 }
 0xb3c   : > { %2755 = vadd.xlane.f32.xlu0 %v2752_v36  ;;  %v6405_v36 = vld [vmem:[%s7320_s9 + $0xb8] sm:$0xff]  }
 0xb3d   : > { %v7789_v18 = vpack.c.bf16 %v6309_v38, %v6308_v39 }
 0xb3f   : > { %v3269_v53 = vsel %vm1467_vm5, %v7789_v18, 0 }
 0xbc9   : > { %v2756_v21 = vpop.xlane.xlu0 %2755 }
 0xbca   : > { %v2758_v54 = vmul.f32 0.007874016, %v2756_v21 }
 0xbcc   : > { %6496 = vrsqrt.f32 %v2758_v54  ;;  %vm2768_vm10 = vcmp.eq.f32.partialorder %v2758_v54, inf  ;;  %v2771_v51 = vand.u32 2147483648, %v2758_v54  ;;  %vm2770_vm11 = vcmp.eq.f32.partialorder %v2758_v54, 0.0 }
 0xbcd   : > { %6498 = vrcp.f32 %v2779_v30 }
 0xbd6   : > { %v6497_v60 = vpop.eup %6496 }
 0xbd7   : > { %v2767_v27 = vmul.f32 %v6497_v60, %v2758_v54  ;;  %v6499_v28 = vpop.eup %6498 }
 0xbd8   : > { %v2782_v63 = vmul.f32 %v6499_v28, %v2777_v50 }
 0xbd9   : > { %v2769_v61 = vsel %vm2768_vm10, %v2758_v54, %v2767_v27 }
 0xbda   : > { %v2772_v32 = vsel %vm2770_vm11, %v2771_v51, %v2769_v61  ;;  %v2789_v3 = vadd.f32 %v5376_v1, %v2782_v63 }
 0xbdb   : > { %v2780_v34 = vadd.f32 1e-06, %v2772_v32 }
 0xbdd   : > { %6500 = vrcp.f32 %v2780_v34 }
 0xbe7   : > { %v6501_v44 = vpop.eup %6500 }
 0xbe8   : > { %v2784_v2 = vmul.f32 %v6501_v44, %v2778_v43 }
 0xbea   : > { %v2790_v4 = vadd.f32 %v5376_v1, %v2784_v2 }
 0xbec   : > { %v2791_v0 = vpack.c.bf16 %v2790_v4, %v2789_v3  ;;  %v5436_v3 = vld [vmem:[%s8244_s11] ss:$0 sm:$0xff] }
 0xbee   : > { %5942 = vmatmul.mubr.bf16.vlgmr.msra.gmra.mrb[48].mxu0 %v2791_v0 }
 0xbef   : > { %5981 = vmatprep.mubr.msk.bf16.mxu0 %vm6866_vm0, %v6865_v13  ;;  %5966 = vmatpush3.bf16.msra.mxu0 %v6398_v24 }
 0xbf0   : > { %5967 = vmatprep.subr.bf16.mxu0 %v6865_v13 }
 0xbf3   : > { %5968 = vmatpush3.bf16.msra.mxu0 %v6399_v26 }
 0xbf4   : > { %5969 = vmatprep.subr.bf16.mxu0 %v6865_v13 }
 0xbf7   : > { %5970 = vmatpush3.bf16.msra.mxu0 %v6400_v29 }
 0xbf8   : > { %5971 = vmatprep.subr.bf16.mxu0 %v6865_v13 }
 0xbfb   : > { %5972 = vmatpush3.bf16.msra.mxu0 %v6401_v31 }
 0xbfc   : > { %5973 = vmatprep.subr.bf16.mxu0 %v6865_v13 }
 0xbff   : > { %5974 = vmatpush3.bf16.msra.mxu0 %v6402_v6 }
 0xc00   : > { %5975 = vmatprep.subr.bf16.mxu0 %v6865_v13 }
 0xc03   : > { %5976 = vmatpush3.bf16.msra.mxu0 %v6403_v33 }
 0xc04   : > { %5977 = vmatprep.subr.bf16.mxu0 %v6865_v13 }
 0xc07   : > { %5978 = vmatpush3.bf16.msra.mxu0 %v6404_v35 }
 0xc08   : > { %5979 = vmatprep.subr.bf16.mxu0 %v6865_v13 }
 0xc0b   : > { %5980 = vmatpush3.bf16.msra.mxu0 %v6405_v36 }
 0xc0c   : > { %6009 = vmatprep.subr.bf16.mxu0 %v6865_v13 }
 0xc0e   : > { %5982 = vmatmul.mubr.bf16.vlgmr.msra.gmra.mrb[52].mxu0 %v7742_v5  ;;  %v6317_v5 = vpop.permute.xlu1 %6316 }
 0xc0f   : > { %6011 = vmatprep.mubr.msk.bf16.mxu0 %vm6866_vm0, %v6865_v13  ;;  %v6319_v41 = vunpack.i.h.bf16 %v6317_v5  ;;  %v6318_v15 = vunpack.i.l.bf16 %v6317_v5 }
 0xc11   : > { %v7804_v21 = vpack.c.bf16 %v6319_v41, %v6318_v15 }
 0xc13   : > { %v3315_v60 = vsel %vm1467_vm5, %v7804_v21, 0 }
 0xcc1   : > { %v2896_v42 = vpop.f32.mrb[48].mxu0 }
 0xcc2   : > { %v5943_v45 = vpop.f32.mrb[49].mxu0  ;;  %v2897_v47 = vadd.f32 %v5377_v40, %v2896_v42 }
 0xcc3   : > { %v2899_v46 = vpop.f32.mrb[50].mxu0 }
 0xcc4   : > { %v2900_v48 = vadd.f32 %v5377_v40, %v2899_v46  ;;  %v5944_v12 = vpop.f32.mrb[51].mxu0 }
 0xcc6   : > { %v7791_v49 = vpack.c.bf16 %v2900_v48, %v2897_v47  ;;  %v6320_v52 = vpack.i.bf16 %v2900_v48, %v2897_v47 }
 0xcc8   : > { %6321 = vrot.lane.b32.xlu1 %v6320_v52, %s6869_s12  ;;  %6311 = vrot.lane.b32.xlu0 %v6320_v52, %s6867_s4 }
 0xcc9   : > { %5988 = vmatmul.mubr.msk.bf16.vlgmr.msra.gmra.mrb[64].mxu1 %vm1467_vm5, %v7791_v49 }
 0xcca   : > { %5992 = vmatpush3.bf16.xpose.msra.mxu1 %v3269_v53  ;;  %5993 = vmatprep.mubr.msk.bf16.mxu1 %vm6866_vm0, %v6865_v13 }
 0xccb   : > { %5997 = vmatprep.subr.bf16.mxu1 %v6865_v13 }
 0xccc   : > { %6326 = vrot.lane.b32.xlu1 %v6305_v17, %s6868_s7  ;;  %6331 = vrot.lane.b32.xlu0 %v6320_v52, %s6868_s7 }
 0xce1   : > { %v3118_v63 = vpop.f32.mrb[52].mxu0 }
 0xce2   : > { %v5983_v44 = vpop.f32.mrb[53].mxu0  ;;  %v3119_v11 = vadd.f32 %v5427_v37, %v3118_v63 }
 0xce3   : > { %v3121_v1 = vpop.f32.mrb[54].mxu0 }
 0xce4   : > { %v5984_v2 = vpop.f32.mrb[55].mxu0  ;;  %v3122_v16 = vadd.f32 %v5427_v37, %v3121_v1 }
 0xce6   : > { %v7837_v17 = vpack.i.bf16 %v3122_v16, %v3119_v11  ;;  %v7841_v22 = vpack.c.bf16 %v3122_v16, %v3119_v11 }
 0xce8   : > { %v3455_v24 = vsel %vm1704_vm6, %v7841_v22, 0 }
 0xce9   : > { %6010 = vmatpush3.bf16.msra.mxu0 %v3455_v24 }
 0xcea   : > { %6021 = vmatprep.subr.bf16.mxu0 %v6865_v13 }
 0xd3a   : > { %v6322_v7 = vpop.permute.xlu1 %6321  ;;  %v6312_v19 = vpop.permute.xlu0 %6311 }
 0xd3b   : > { %v6314_v54 = vunpack.i.h.bf16 %v6312_v19  ;;  %v6313_v55 = vunpack.i.l.bf16 %v6312_v19  ;;  %v6324_v27 = vunpack.i.h.bf16 %v6322_v7  ;;  %v6323_v51 = vunpack.i.l.bf16 %v6322_v7 }
 0xd3d   : > { %v7806_v58 = vpack.c.bf16 %v6314_v54, %v6313_v55  ;;  %v7817_v32 = vpack.c.bf16 %v6324_v27, %v6323_v51 }
 0xd3e   : > { %v6327_v23 = vpop.permute.xlu1 %6326  ;;  %v6332_v34 = vpop.permute.xlu0 %6331 }
 0xd3f   : > { %v6329_v59 = vunpack.i.h.bf16 %v6327_v23  ;;  %v6328_v30 = vunpack.i.l.bf16 %v6327_v23  ;;  %5994 = vmatmul.mubr.msk.bf16.vlgmr.msra.gmra.mrb[68].mxu1 %vm1467_vm5, %v7806_v58  ;;  %v6334_v28 = vunpack.i.h.bf16 %v6332_v34  ;;  %v6333_v50 = vunpack.i.l.bf16 %v6332_v34 }
 0xd40   : > { %5998 = vmatpush3.bf16.xpose.msra.mxu1 %v3315_v60  ;;  %5999 = vmatprep.mubr.msk.bf16.mxu1 %vm6866_vm0, %v6865_v13 }
 0xd41   : > { %6003 = vmatprep.subr.bf16.mxu1 %v6865_v13  ;;  %v7815_v61 = vpack.c.bf16 %v6329_v59, %v6328_v30  ;;  %v7826_v43 = vpack.c.bf16 %v6334_v28, %v6333_v50 }
 0xd43   : > { %v3361_v62 = vsel %vm1467_vm5, %v7815_v61, 0 }
 0xd47   : > { %6000 = vmatmul.mubr.msk.bf16.vlgmr.msra.gmra.mrb[72].mxu1 %vm1467_vm5, %v7817_v32 }
 0xd48   : > { %6004 = vmatpush3.bf16.xpose.msra.mxu1 %v3361_v62  ;;  %6005 = vmatprep.mubr.msk.bf16.mxu1 %vm6866_vm0, %v6865_v13 }
 0xd49   : > { %6015 = vmatprep.subr.bf16.mxu1 %v6865_v13 }
 0xd4f   : > { %6006 = vmatmul.mubr.msk.bf16.vlgmr.msra.gmra.mrb[76].mxu1 %vm1467_vm5, %v7826_v43 }
 0xd50   : > { %6017 = vmatprep.mubr.msk.bf16.mxu1 %vm6866_vm0, %v6865_v13 }
 0xd9c   : > { %v3259_v4 = vpop.f32.mrb[64].mxu1 }
 0xd9d   : > { %v3260_v0 = vadd.f32 %v5436_v3, %v3259_v4  ;;  %v5989_v8 = vpop.f32.mrb[65].mxu1 }
 0xd9e   : > { %v3262_v56 = vpop.f32.mrb[66].mxu1 }
 0xd9f   : > { %v5990_v9 = vpop.f32.mrb[67].mxu1  ;;  %v3403_v10 = vsel %vm1652_vm7, %v3260_v0, -inf }
 0xda0   : > { %3404 = vmax.xlane.f32.xlu1 %v3403_v10 }
 0xdb1   : > { %6336 = vrot.lane.b32.xlu1 %v7837_v17, %s6867_s4 }
 0xe12   : > { %v3305_v26 = vpop.f32.mrb[68].mxu1 }
 0xe13   : > { %v3306_v29 = vadd.f32 %v5436_v3, %v3305_v26  ;;  %v5995_v31 = vpop.f32.mrb[69].mxu1 }
 0xe14   : > { %v3308_v6 = vpop.f32.mrb[70].mxu1 }
 0xe15   : > { %v5996_v33 = vpop.f32.mrb[71].mxu1  ;;  %v3406_v35 = vsel %vm1652_vm7, %v3306_v29, -inf }
 0xe16   : > { %3407 = vmax.xlane.f32.xlu0 %v3406_v35 }
 0xe1a   : > { %v3351_v36 = vpop.f32.mrb[72].mxu1 }
 0xe1b   : > { %v3352_v57 = vadd.f32 %v5436_v3, %v3351_v36  ;;  %v6001_v38 = vpop.f32.mrb[73].mxu1 }
 0xe1c   : > { %v3354_v39 = vpop.f32.mrb[74].mxu1 }
 0xe1d   : > { %v6002_v40 = vpop.f32.mrb[75].mxu1  ;;  %v3409_v42 = vsel %vm1652_vm7, %v3352_v57, -inf }
 0xe1e   : > { %3410 = vmax.xlane.f32.xlu0 %v3409_v42 }
 0xe22   : > { %v3397_v45 = vpop.f32.mrb[76].mxu1 }
 0xe23   : > { %v3398_v46 = vadd.f32 %v5436_v3, %v3397_v45  ;;  %v6007_v47 = vpop.f32.mrb[77].mxu1 }
 0xe24   : > { %v3400_v48 = vpop.f32.mrb[78].mxu1 }
 0xe25   : > { %v6008_v12 = vpop.f32.mrb[79].mxu1  ;;  %v3412_v52 = vsel %vm1652_vm7, %v3398_v46, -inf }
 0xe26   : > { %3413 = vmax.xlane.f32.xlu0 %v3412_v52  ;;  %v7883_v52 = vld [vmem:[%s7326_s8 + $0x10] sm:$0xff]  }
 0xe2d   : > { %v3405_v53 = vpop.xlane.xlu1 %3404 }
 0xe2e   : > { %v3415_v5 = vsub.f32 %v3260_v0, %v3405_v53 }
 0xe30   : > { %v3419_v41 = vmul.f32 1.442695, %v3415_v5  ;;  %v7887_v5 = vld [vmem:[%s7326_s8 + $0x8] sm:$0xff]  }
 0xe31   : > { %v6337_v19 = vpop.permute.xlu1 %6336 }
 0xe32   : > { %6502 = vpow2.f32 %v3419_v41  ;;  %v6339_v54 = vunpack.i.h.bf16 %v6337_v19  ;;  %v6338_v55 = vunpack.i.l.bf16 %v6337_v19  ;;  %v7900_v41 = vld [vmem:[%s7326_s8 + $0x18] sm:$0xff]  }
 0xe34   : > { %v7850_v23 = vpack.c.bf16 %v6339_v54, %v6338_v55 }
 0xe36   : > { %v3501_v59 = vsel %vm1704_vm6, %v7850_v23, 0 }
 0xe37   : > { %6016 = vmatpush3.bf16.msra.mxu1 %v3501_v59 }
 0xe38   : > { %6027 = vmatprep.subr.bf16.mxu1 %v6865_v13 }
 0xe3c   : > { %v6503_v15 = vpop.eup %6502 }
 0xe3d   : > { %v3427_v7 = vsel %vm1652_vm7, %v6503_v15, 0.0 }
 0xe3e   : > { %3428 = vadd.xlane.f32.xlu1 %v3427_v7  ;;  %v7905_v7 = vld [vmem:[%s7326_s8 + $0x20] sm:$0xff]  }
 0xea3   : > { %v3408_v30 = vpop.xlane.xlu0 %3407 }
 0xea4   : > { %v3416_v60 = vsub.f32 %v3306_v29, %v3408_v30  ;;  %v7910_v30 = vld [vmem:[%s7326_s8 + $0x28] sm:$0xff]  }
 0xea6   : > { %v3421_v27 = vmul.f32 1.442695, %v3416_v60 }
 0xea8   : > { %6504 = vpow2.f32 %v3421_v27  ;;  %v7918_v27 = vld [vmem:[%s7326_s8 + $0x30] sm:$0xff]  }
 0xeab   : > { %v3411_v51 = vpop.xlane.xlu0 %3410 }
 0xeac   : > { %v3417_v34 = vsub.f32 %v3352_v57, %v3411_v51 }
 0xeae   : > { %v3423_v62 = vmul.f32 1.442695, %v3417_v34 }
 0xeb0   : > { %6506 = vpow2.f32 %v3423_v62 }
 0xeb2   : > { %v6505_v28 = vpop.eup %6504 }
 0xeb3   : > { %v3414_v50 = vpop.xlane.xlu0 %3413  ;;  %v3430_v63 = vsel %vm1652_vm7, %v6505_v28, 0.0 }
 0xeb4   : > { %v3418_v44 = vsub.f32 %v3398_v46, %v3414_v50  ;;  %3431 = vadd.xlane.f32.xlu0 %v3430_v63  ;;  %v7878_v46 = vld [vmem:[%s7326_s8] sm:$0xff]   ;;  %v7923_v50 = vld [vmem:[%s7326_s8 + $0x38] sm:$0xff]   ;;  %v3871_v63 = vrot.slane %v7762_v20, 4 }
 0xeb6   : > { %v3425_v1 = vmul.f32 1.442695, %v3418_v44 }
 0xeb8   : > { %6508 = vpow2.f32 %v3425_v1 }
 0xeba   : > { %v6507_v2 = vpop.eup %6506 }
 0xebb   : > { %v3433_v3 = vsel %vm1652_vm7, %v6507_v2, 0.0 }
 0xebc   : > { %3434 = vadd.xlane.f32.xlu1 %v3433_v3 }
 0xec2   : > { %v6509_v4 = vpop.eup %6508 }
 0xec3   : > { %v3436_v0 = vsel %vm1652_vm7, %v6509_v4, 0.0 }
 0xec4   : > { %3437 = vadd.xlane.f32.xlu0 %v3436_v0 }
 0xecb   : > { %v3429_v8 = vpop.xlane.xlu1 %3428 }
 0xecc   : > { %6510 = vrcp.f32 %v3429_v8 }
 0xecd   : > { %6346 = vrot.lane.b32.xlu1 %v7837_v17, %s6868_s7 }
 0xed6   : > { %v6511_v56 = vpop.eup %6510 }
 0xed7   : > { %v3443_v9 = vmul.f32 %v6511_v56, %v6503_v15  ;;  %v3876_v56 = vsel %vm1467_vm5, %v3871_v63, 0 }
 0xed9   : > { %v3447_v10 = vpack.c.bf16 %v3443_v9, %v3443_v9 }
 0xeda   : > { %6341 = vrot.lane.b32.xlu0 %v7837_v17, %s6869_s12 }
 0xedb   : > { %6012 = vmatmul.mubr.msk.bf16.vlgmr.msra.gmra.mrb[56].mxu0 %vm1652_vm7, %v3447_v10 }
 0xedc   : > { %6023 = vmatprep.mubr.msk.bf16.mxu0 %vm6866_vm0, %v6865_v13 }
 0xf41   : > { %v3432_v37 = vpop.xlane.xlu0 %3431 }
 0xf42   : > { %6512 = vrcp.f32 %v3432_v37 }
 0xf49   : > { %v3435_v11 = vpop.xlane.xlu1 %3434 }
 0xf4a   : > { %6514 = vrcp.f32 %v3435_v11  ;;  %v3971_v11 = vrot.slane %v7804_v21, 4 }
 0xf4c   : > { %v6513_v16 = vpop.eup %6512 }
 0xf4d   : > { %v3444_v24 = vmul.f32 %v6513_v16, %v6505_v28  ;;  %v6347_v26 = vpop.permute.xlu1 %6346  ;;  %v3869_v16 = vrot.slane %v7791_v49, 4  ;;  %v4117_v49 = vrot.slane %v7841_v22, 4 }
 0xf4e   : > { %v6349_v29 = vunpack.i.h.bf16 %v6347_v26  ;;  %v6348_v31 = vunpack.i.l.bf16 %v6347_v26  ;;  %v3976_v26 = vsel %vm1467_vm5, %v3971_v11, 0 }
 0xf4f   : > { %v3448_v6 = vpack.c.bf16 %v3444_v24, %v3444_v24  ;;  %v4021_v24 = vrot.slane %v7815_v61, 4  ;;  %v4165_v61 = vrot.slane %v7850_v23, 4 }
 0xf50   : > { %v7865_v33 = vpack.c.bf16 %v6349_v29, %v6348_v31  ;;  %v3919_v29 = vrot.slane %v7806_v58, 4  ;;  %v3969_v58 = vrot.slane %v7817_v32, 4  ;;  %v4122_v31 = vsel %vm1704_vm6, %v4117_v49, 0 }
 0xf51   : > { %v3438_v35 = vpop.xlane.xlu0 %3437  ;;  %6018 = vmatmul.mubr.msk.bf16.vlgmr.msra.gmra.mrb[80].mxu1 %vm1652_vm7, %v3448_v6  ;;  %v4026_v21 = vsel %vm1467_vm5, %v4021_v24, 0  ;;  %v4019_v6 = vrot.slane %v7826_v43, 4  ;;  %v4170_v22 = vsel %vm1704_vm6, %v4165_v61, 0 }
 0xf52   : > { %6516 = vrcp.f32 %v3438_v35  ;;  %v3593_v17 = vsel %vm1704_vm6, %v7865_v33, 0  ;;  %6029 = vmatprep.mubr.msk.bf16.mxu1 %vm6866_vm0, %v6865_v13 }
 0xf53   : > { %6028 = vmatpush3.bf16.msra.mxu1 %v3593_v17 }
 0xf54   : > { %6041 = vmatprep.subr.bf16.mxu1 %v6865_v13  ;;  %v6515_v36 = vpop.eup %6514 }
 0xf55   : > { %v6342_v57 = vpop.permute.xlu0 %6341  ;;  %v3445_v40 = vmul.f32 %v6515_v36, %v6507_v2 }
 0xf56   : > { %v6344_v38 = vunpack.i.h.bf16 %v6342_v57  ;;  %v6343_v39 = vunpack.i.l.bf16 %v6342_v57 }
 0xf57   : > { %v3449_v48 = vpack.c.bf16 %v3445_v40, %v3445_v40 }
 0xf58   : > { %v7873_v42 = vpack.c.bf16 %v6344_v38, %v6343_v39 }
 0xf5a   : > { %v3547_v45 = vsel %vm1704_vm6, %v7873_v42, 0 }
 0xf5b   : > { %6022 = vmatpush3.bf16.msra.mxu0 %v3547_v45 }
 0xf5c   : > { %v6517_v47 = vpop.eup %6516  ;;  %6033 = vmatprep.subr.bf16.mxu0 %v6865_v13 }
 0xf5d   : > { %v3446_v12 = vmul.f32 %v6517_v47, %v6509_v4  ;;  %v3921_v4 = vrot.slane %v7789_v18, 4 }
 0xf5e   : > { %6024 = vmatmul.mubr.msk.bf16.vlgmr.msra.gmra.mrb[60].mxu0 %vm1652_vm7, %v3449_v48 }
 0xf5f   : > { %v3450_v53 = vpack.c.bf16 %v3446_v12, %v3446_v12  ;;  %6034 = vmatpush3.bf16.msra.mxu0 %v7878_v46  ;;  %6037 = vmatprep.mubr.msk.bf16.mxu0 %vm6866_vm0, %v6865_v13  ;;  %v3926_v18 = vsel %vm1467_vm5, %v3921_v4, 0 }
 0xf60   : > { %6035 = vmatprep.subr.bf16.mxu0 %v6865_v13 }
 0xf61   : > { %6030 = vmatmul.mubr.msk.bf16.vlgmr.msra.gmra.mrb[84].mxu1 %vm1652_vm7, %v3450_v53 }
 0xf62   : > { %6042 = vmatpush3.bf16.msra.mxu1 %v7883_v52  ;;  %6045 = vmatprep.mubr.msk.bf16.mxu1 %vm6866_vm0, %v6865_v13 }
 0xf63   : > { %6036 = vmatpush3.bf16.msra.mxu0 %v7887_v5  ;;  %6043 = vmatprep.subr.bf16.mxu1 %v6865_v13 }
 0xf64   : > { %6049 = vmatprep.subr.bf16.mxu0 %v6865_v13 }
 0xf66   : > { %6044 = vmatpush3.bf16.msra.mxu1 %v7900_v41 }
 0xf67   : > { %6057 = vmatprep.subr.bf16.mxu1 %v6865_v13 }
 0xfae   : > { %v3491_v15 = vpop.f32.mrb[56].mxu0 }
 0xfaf   : > { %v3635_v19 = vpack.c.bf16 %v3491_v15, %v3491_v15  ;;  %v6013_v54 = vpop.f32.mrb[57].mxu0 }
 0xfb0   : > { %v3494_v55 = vpop.f32.mrb[58].mxu0 }
 0xfb1   : > { %v6014_v59 = vpop.f32.mrb[59].mxu0  ;;  %6038 = vmatmul.mubr.msk.bf16.vlgmr.msra.gmra.mrb[64].mxu0 %vm1467_vm5, %v3635_v19 }
 0xfb2   : > { %6050 = vmatpush3.bf16.msra.mxu0 %v7905_v7  ;;  %6053 = vmatprep.mubr.msk.bf16.mxu0 %vm6866_vm0, %v6865_v13  ;;  %v5457_v59 = vld [vmem:[%s8244_s11 + $0x1] ss:$0 sm:$0xff] }
 0xfb3   : > { %6051 = vmatprep.subr.bf16.mxu0 %v6865_v13 }
 0xfb6   : > { %6052 = vmatpush3.bf16.msra.mxu0 %v7910_v30 }
 0xfb7   : > { %6065 = vmatprep.subr.bf16.mxu0 %v6865_v13 }
0x1024   : > { %v3537_v60 = vpop.f32.mrb[80].mxu1 }
0x1025   : > { %v3636_v51 = vpack.c.bf16 %v3537_v60, %v3537_v60  ;;  %v6019_v34 = vpop.f32.mrb[81].mxu1 }
0x1026   : > { %v3540_v62 = vpop.f32.mrb[82].mxu1 }
0x1027   : > { %v6020_v28 = vpop.f32.mrb[83].mxu1  ;;  %6046 = vmatmul.mubr.msk.bf16.vlgmr.msra.gmra.mrb[88].mxu1 %vm1467_vm5, %v3636_v51 }
0x1028   : > { %6058 = vmatpush3.bf16.msra.mxu1 %v7918_v27  ;;  %6061 = vmatprep.mubr.msk.bf16.mxu1 %vm6866_vm0, %v6865_v13 }
0x1029   : > { %6059 = vmatprep.subr.bf16.mxu1 %v6865_v13 }
0x102c   : > { %6060 = vmatpush3.bf16.msra.mxu1 %v7923_v50 }
0x102d   : > { %6071 = vmatprep.subr.bf16.mxu1 %v6865_v13 }
0x1031   : > { %v3583_v44 = vpop.f32.mrb[60].mxu0 }
0x1032   : > { %v3637_v1 = vpack.c.bf16 %v3583_v44, %v3583_v44  ;;  %v6025_v2 = vpop.f32.mrb[61].mxu0 }
0x1033   : > { %v3586_v3 = vpop.f32.mrb[62].mxu0 }
0x1034   : > { %v6026_v0 = vpop.f32.mrb[63].mxu0  ;;  %v3629_v8 = vpop.f32.mrb[84].mxu1  ;;  %6054 = vmatmul.mubr.msk.bf16.vlgmr.msra.gmra.mrb[68].mxu0 %vm1467_vm5, %v3637_v1 }
0x1035   : > { %v3638_v9 = vpack.c.bf16 %v3629_v8, %v3629_v8  ;;  %6066 = vmatpush3.bf16.xpose.msra.mxu0 %v3876_v56  ;;  %v6031_v10 = vpop.f32.mrb[85].mxu1  ;;  %6067 = vmatprep.mubr.msk.bf16.mxu0 %vm6866_vm0, %v6865_v13 }
0x1036   : > { %v3632_v37 = vpop.f32.mrb[86].mxu1  ;;  %6077 = vmatprep.subr.bf16.mxu0 %v6865_v13 }
0x1037   : > { %v6032_v20 = vpop.f32.mrb[87].mxu1  ;;  %6062 = vmatmul.mubr.msk.bf16.vlgmr.msra.gmra.mrb[92].mxu1 %vm1467_vm5, %v3638_v9 }
0x1038   : > { %6072 = vmatpush3.bf16.xpose.msra.mxu1 %v3926_v18  ;;  %6073 = vmatprep.mubr.msk.bf16.mxu1 %vm6866_vm0, %v6865_v13 }
0x1039   : > { %6083 = vmatprep.subr.bf16.mxu1 %v6865_v13 }
0x103c   : > { %6068 = vmatmul.mubr.msk.bf16.vlgmr.msra.gmra.mrb[72].mxu0 %vm1467_vm5, %v3869_v16 }
0x103d   : > { %6078 = vmatpush3.bf16.xpose.msra.mxu0 %v3976_v26  ;;  %6079 = vmatprep.mubr.msk.bf16.mxu0 %vm6866_vm0, %v6865_v13 }
0x103e   : > { %6089 = vmatprep.subr.bf16.mxu0 %v6865_v13 }
0x103f   : > { %6074 = vmatmul.mubr.msk.bf16.vlgmr.msra.gmra.mrb[96].mxu1 %vm1467_vm5, %v3919_v29 }
0x1040   : > { %6084 = vmatpush3.bf16.xpose.msra.mxu1 %v4026_v21  ;;  %6085 = vmatprep.mubr.msk.bf16.mxu1 %vm6866_vm0, %v6865_v13 }
0x1041   : > { %6095 = vmatprep.subr.bf16.mxu1 %v6865_v13 }
0x1044   : > { %6080 = vmatmul.mubr.msk.bf16.vlgmr.msra.gmra.mrb[76].mxu0 %vm1467_vm5, %v3969_v58 }
0x1045   : > { %6090 = vmatpush3.bf16.msra.mxu0 %v4122_v31  ;;  %6091 = vmatprep.mubr.msk.bf16.mxu0 %vm6866_vm0, %v6865_v13 }
0x1046   : > { %6101 = vmatprep.subr.bf16.mxu0 %v6865_v13 }
0x1047   : > { %6086 = vmatmul.mubr.msk.bf16.vlgmr.msra.gmra.mrb[100].mxu1 %vm1467_vm5, %v4019_v6 }
0x1048   : > { %6096 = vmatpush3.bf16.msra.mxu1 %v4170_v22  ;;  %6097 = vmatprep.mubr.msk.bf16.mxu1 %vm6866_vm0, %v6865_v13 }
0x1049   : > { %6107 = vmatprep.subr.bf16.mxu1 %v6865_v13 }
0x1084   : > { %v3688_v32 = vpop.f32.mrb[64].mxu0 }
0x1085   : > { %v6039_v23 = vpop.f32.mrb[65].mxu0 }
0x1086   : > { %v3691_v35 = vpop.f32.mrb[66].mxu0 }
0x1087   : > { %v6040_v43 = vpop.f32.mrb[67].mxu0 }
0x10fa   : > { %v3743_v17 = vpop.f32.mrb[88].mxu1 }
0x10fb   : > { %v3859_v36 = vadd.f32 %v3743_v17, %v3688_v32  ;;  %v6047_v57 = vpop.f32.mrb[89].mxu1 }
0x10fc   : > { %v3746_v38 = vpop.f32.mrb[90].mxu1 }
0x10fd   : > { %v6048_v39 = vpop.f32.mrb[91].mxu1 }
0x1107   : > { %v3798_v40 = vpop.f32.mrb[68].mxu0 }
0x1108   : > { %v3860_v45 = vadd.f32 %v3859_v36, %v3798_v40  ;;  %v6055_v47 = vpop.f32.mrb[69].mxu0  ;;  %v7980_v40 = vld [vmem:[%s7358_s10 + $0x3] ss:$0 sm:$0xff] }
0x1109   : > { %v3801_v48 = vpop.f32.mrb[70].mxu0 }
0x110a   : > { %v6056_v12 = vpop.f32.mrb[71].mxu0  ;;  %v3853_v53 = vpop.f32.mrb[92].mxu1 }
0x110b   : > { %v3861_v15 = vadd.f32 %v3860_v45, %v3853_v53  ;;  %v6063_v19 = vpop.f32.mrb[93].mxu1 }
0x110c   : > { %v3856_v54 = vpop.f32.mrb[94].mxu1 }
0x110d   : > { %v6064_v55 = vpop.f32.mrb[95].mxu1  ;;  %v4492_v47 = vadd.f32 %v7980_v40, %v3861_v15 }
0x110f   : > { %v3912_v60 = vpop.f32.mrb[72].mxu0  ;;  %v7986_v19 = vadd.f32 %v4492_v47, %v7648_v14 }
0x1110   : > { %v3913_v51 = vadd.f32 %v5457_v59, %v3912_v60  ;;  %v6069_v34 = vpop.f32.mrb[73].mxu0 }
0x1111   : > { %v3915_v62 = vpop.f32.mrb[74].mxu0 }
0x1112   : > { %v6070_v28 = vpop.f32.mrb[75].mxu0  ;;  %v3962_v63 = vpop.f32.mrb[96].mxu1  ;;  %v4068_v44 = vsel %vm1652_vm7, %v3913_v51, -inf  ;;  %v4213_v62 = vrot.slane %v7873_v42, 4 }
0x1113   : > { %v3963_v1 = vadd.f32 %v5457_v59, %v3962_v63  ;;  %v6075_v2 = vpop.f32.mrb[97].mxu1  ;;  %4069 = vmax.xlane.f32.xlu1 %v4068_v44 }
0x1114   : > { %v3965_v3 = vpop.f32.mrb[98].mxu1  ;;  %v4261_v2 = vrot.slane %v7865_v33, 4 }
0x1115   : > { %v6076_v4 = vpop.f32.mrb[99].mxu1  ;;  %v4071_v0 = vsel %vm1652_vm7, %v3963_v1, -inf  ;;  %v4218_v3 = vsel %vm1704_vm6, %v4213_v62, 0 }
0x1116   : > { %4072 = vmax.xlane.f32.xlu0 %v4071_v0 }
0x1117   : > { %v4012_v8 = vpop.f32.mrb[76].mxu0 }
0x1118   : > { %v4013_v56 = vadd.f32 %v5457_v59, %v4012_v8  ;;  %v6081_v9 = vpop.f32.mrb[77].mxu0  ;;  %v4266_v8 = vsel %vm1704_vm6, %v4261_v2, 0  ;;  %v6425_v2 = vld [vmem:[%s7328_s23 + $0x34] ss:$8 sps:$4 sm:$0xff]  }
0x1119   : > { %v4015_v10 = vpop.f32.mrb[78].mxu0 }
0x111a   : > { %v6082_v37 = vpop.f32.mrb[79].mxu0  ;;  %v4062_v20 = vpop.f32.mrb[100].mxu1  ;;  %v4074_v18 = vsel %vm1652_vm7, %v4013_v56, -inf }
0x111b   : > { %v4063_v11 = vadd.f32 %v5457_v59, %v4062_v20  ;;  %v6087_v16 = vpop.f32.mrb[101].mxu1  ;;  %4075 = vmax.xlane.f32.xlu0 %v4074_v18 }
0x111c   : > { %v4065_v24 = vpop.f32.mrb[102].mxu1 }
0x111d   : > { %v6088_v26 = vpop.f32.mrb[103].mxu1  ;;  %v4077_v29 = vsel %vm1652_vm7, %v4063_v11, -inf }
0x111e   : > { %4078 = vmax.xlane.f32.xlu1 %v4077_v29 }
0x11a0   : > { %v4070_v21 = vpop.xlane.xlu1 %4069 }
0x11a1   : > { %v4080_v49 = vsub.f32 %v3913_v51, %v4070_v21 }
0x11a3   : > { %v4084_v58 = vmul.f32 1.442695, %v4080_v49  ;;  %v4073_v61 = vpop.xlane.xlu0 %4072 }
0x11a4   : > { %v4081_v31 = vsub.f32 %v3963_v1, %v4073_v61 }
0x11a5   : > { %6518 = vpow2.f32 %v4084_v58 }
0x11a6   : > { %v4086_v6 = vmul.f32 1.442695, %v4081_v31 }
0x11a8   : > { %6520 = vpow2.f32 %v4086_v6  ;;  %v4076_v22 = vpop.xlane.xlu0 %4075 }
0x11a9   : > { %v4082_v32 = vsub.f32 %v4013_v56, %v4076_v22 }
0x11ab   : > { %v4088_v23 = vmul.f32 1.442695, %v4082_v32  ;;  %v4079_v35 = vpop.xlane.xlu1 %4078 }
0x11ac   : > { %v4083_v43 = vsub.f32 %v4063_v11, %v4079_v35 }
0x11ad   : > { %6522 = vpow2.f32 %v4088_v23 }
0x11ae   : > { %v4090_v17 = vmul.f32 1.442695, %v4083_v43 }
0x11af   : > { %v6519_v36 = vpop.eup %6518 }
0x11b0   : > { %6524 = vpow2.f32 %v4090_v17  ;;  %v4092_v57 = vsel %vm1652_vm7, %v6519_v36, 0.0 }
0x11b1   : > { %4093 = vadd.xlane.f32.xlu0 %v4092_v57 }
0x11b2   : > { %v6521_v38 = vpop.eup %6520 }
0x11b3   : > { %v4095_v39 = vsel %vm1652_vm7, %v6521_v38, 0.0 }
0x11b4   : > { %4096 = vadd.xlane.f32.xlu1 %v4095_v39 }
0x11b7   : > { %v6523_v45 = vpop.eup %6522 }
0x11b8   : > { %v4098_v48 = vsel %vm1652_vm7, %v6523_v45, 0.0 }
0x11b9   : > { %4099 = vadd.xlane.f32.xlu0 %v4098_v48 }
0x11ba   : > { %v6525_v12 = vpop.eup %6524 }
0x11bb   : > { %v4101_v53 = vsel %vm1652_vm7, %v6525_v12, 0.0 }
0x11bc   : > { %4102 = vadd.xlane.f32.xlu1 %v4101_v53 }
0x11bd   : > { %4498 = vadd.xlane.f32.xlu0 %v7986_v19 }
0x123e   : > { %v4094_v54 = vpop.xlane.xlu0 %4093 }
0x123f   : > { %6526 = vrcp.f32 %v4094_v54 }
0x1241   : > { %v4097_v55 = vpop.xlane.xlu1 %4096 }
0x1242   : > { %6528 = vrcp.f32 %v4097_v55 }
0x1246   : > { %v4100_v59 = vpop.xlane.xlu0 %4099 }
0x1247   : > { %6530 = vrcp.f32 %v4100_v59 }
0x1249   : > { %v6527_v60 = vpop.eup %6526  ;;  %v4103_v15 = vpop.xlane.xlu1 %4102 }
0x124a   : > { %v4108_v51 = vmul.f32 %v6527_v60, %v6519_v36  ;;  %6532 = vrcp.f32 %v4103_v15  ;;  %v4499_v34 = vpop.xlane.xlu0 %4498 }
0x124b   : > { %v4502_v28 = vmul.f32 0.0078125, %v4499_v34 }
0x124c   : > { %v6529_v63 = vpop.eup %6528  ;;  %v4112_v14 = vpack.c.bf16 %v4108_v51, %v4108_v51 }
0x124d   : > { %v4109_v44 = vmul.f32 %v6529_v63, %v6521_v38  ;;  %v7991_v1 = vsub.f32 %v7986_v19, %v4502_v28  ;;  %v6414_v28 = vld [vmem:[%s7328_s23] ss:$8 sps:$4 sm:$0xff]   ;;  %v6417_v63 = vld [vmem:[%s7328_s23 + $0x10] ss:$8 sps:$4 sm:$0xff]  }
0x124e   : > { %6092 = vmatmul.mubr.msk.bf16.vlgmr.msra.gmra.mrb[80].mxu0 %vm1652_vm7, %v4112_v14  ;;  %v6422_v14 = vld [vmem:[%s7328_s23 + $0x24] ss:$8 sps:$4 sm:$0xff]  }
0x124f   : > { %6102 = vmatpush3.bf16.msra.mxu0 %v4218_v3  ;;  %v4113_v4 = vpack.c.bf16 %v4109_v44, %v4109_v44  ;;  %v4506_v0 = vmul.f32 %v7991_v1, %v7991_v1  ;;  %6103 = vmatprep.mubr.msk.bf16.mxu0 %vm6866_vm0, %v6865_v13  ;;  %v6420_v44 = vld [vmem:[%s7328_s23 + $0x20] ss:$8 sps:$4 sm:$0xff]   ;;  %v6423_v3 = vld [vmem:[%s7328_s23 + $0x30] ss:$8 sps:$4 sm:$0xff]  }
0x1250   : > { %6113 = vmatprep.subr.bf16.mxu0 %v6865_v13 }
0x1251   : > { %v6531_v42 = vpop.eup %6530  ;;  %6098 = vmatmul.mubr.msk.bf16.vlgmr.msra.gmra.mrb[104].mxu1 %vm1652_vm7, %v4113_v4  ;;  %4508 = vadd.xlane.f32.xlu0 %v4506_v0  ;;  %v6426_v4 = vld [vmem:[%s7328_s23 + $0x40] ss:$8 sps:$4 sm:$0xff]   ;;  %v6428_v0 = vld [vmem:[%s7328_s23 + $0x44] ss:$8 sps:$4 sm:$0xff]  }
0x1252   : > { %v4110_v33 = vmul.f32 %v6531_v42, %v6523_v45  ;;  %6108 = vmatpush3.bf16.msra.mxu1 %v4266_v8  ;;  %6109 = vmatprep.mubr.msk.bf16.mxu1 %vm6866_vm0, %v6865_v13  ;;  %v6431_v42 = vld [vmem:[%s7328_s23 + $0x54] ss:$8 sps:$4 sm:$0xff]   ;;  %v6429_v8 = vld [vmem:[%s7328_s23 + $0x50] ss:$8 sps:$4 sm:$0xff]  }
0x1253   : > { %6121 = vmatprep.subr.bf16.mxu1 %v6865_v13 }
0x1254   : > { %v6533_v56 = vpop.eup %6532  ;;  %v4114_v9 = vpack.c.bf16 %v4110_v33, %v4110_v33  ;;  %v6870_v33 = vmov 0  }
0x1255   : > { %v4111_v10 = vmul.f32 %v6533_v56, %v6525_v12  ;;  %v6434_v56 = vld [vmem:[%s7328_s23 + $0x64] ss:$8 sps:$4 sm:$0xff]  }
0x1256   : > { %6104 = vmatmul.mubr.msk.bf16.vlgmr.msra.gmra.mrb[84].mxu0 %vm1652_vm7, %v4114_v9  ;;  %v6432_v9 = vld [vmem:[%s7328_s23 + $0x60] ss:$8 sps:$4 sm:$0xff]  }
0x1257   : > { %v4115_v37 = vpack.c.bf16 %v4111_v10, %v4111_v10  ;;  %6114 = vmatpush3.bf16.msra.mxu0 %v7878_v46  ;;  %6117 = vmatprep.mubr.msk.bf16.mxu0 %vm6866_vm0, %v6865_v13  ;;  %v6437_v10 = vld [vmem:[%s7328_s23 + $0x74] ss:$8 sps:$4 sm:$0xff]  }
0x1258   : > { %6115 = vmatprep.subr.bf16.mxu0 %v6865_v13 }
0x1259   : > { %6110 = vmatmul.mubr.msk.bf16.vlgmr.msra.gmra.mrb[108].mxu1 %vm1652_vm7, %v4115_v37  ;;  %v6435_v37 = vld [vmem:[%s7328_s23 + $0x70] ss:$8 sps:$4 sm:$0xff]  }
0x125a   : > { %6122 = vmatpush3.bf16.msra.mxu1 %v7883_v52  ;;  %6125 = vmatprep.mubr.msk.bf16.mxu1 %vm6866_vm0, %v6865_v13 }
0x125b   : > { %6116 = vmatpush3.bf16.msra.mxu0 %v7887_v5  ;;  %6123 = vmatprep.subr.bf16.mxu1 %v6865_v13 }
0x125c   : > { %6129 = vmatprep.subr.bf16.mxu0 %v6865_v13 }
0x125e   : > { %6124 = vmatpush3.bf16.msra.mxu1 %v7900_v41 }
0x125f   : > { %6137 = vmatprep.subr.bf16.mxu1 %v6865_v13 }
0x1321   : > { %v4158_v46 = vpop.f32.mrb[80].mxu0 }
0x1322   : > { %v4308_v20 = vpack.c.bf16 %v4158_v46, %v4158_v46  ;;  %v6093_v18 = vpop.f32.mrb[81].mxu0  ;;  %v6438_v46 = vld [vmem:[%s7369_s21 + $0x40] sm:$0xff]  }
0x1323   : > { %v4161_v11 = vpop.f32.mrb[82].mxu0  ;;  %v6440_v18 = vld [vmem:[%s7369_s21 + $0x48] sm:$0xff]  }
0x1324   : > { %v6094_v16 = vpop.f32.mrb[83].mxu0  ;;  %v4206_v24 = vpop.f32.mrb[104].mxu1  ;;  %6118 = vmatmul.mubr.msk.bf16.vlgmr.msra.gmra.mrb[88].mxu0 %vm1467_vm5, %v4308_v20  ;;  %v6439_v20 = vld [vmem:[%s7369_s21] sm:$0xff]   ;;  %v6441_v11 = vld [vmem:[%s7369_s21 + $0x8] sm:$0xff]  }
0x1325   : > { %v4309_v52 = vpack.c.bf16 %v4206_v24, %v4206_v24  ;;  %v6099_v26 = vpop.f32.mrb[105].mxu1  ;;  %6130 = vmatpush3.bf16.msra.mxu0 %v7905_v7  ;;  %6133 = vmatprep.mubr.msk.bf16.mxu0 %vm6866_vm0, %v6865_v13  ;;  %v6442_v16 = vld [vmem:[%s7369_s21 + $0x50] sm:$0xff]  }
0x1326   : > { %v4209_v5 = vpop.f32.mrb[106].mxu1  ;;  %6131 = vmatprep.subr.bf16.mxu0 %v6865_v13  ;;  %v6443_v24 = vld [vmem:[%s7369_s21 + $0x10] sm:$0xff]   ;;  %v6445_v26 = vld [vmem:[%s7369_s21 + $0x18] sm:$0xff]  }
0x1327   : > { %v6100_v41 = vpop.f32.mrb[107].mxu1  ;;  %6126 = vmatmul.mubr.msk.bf16.vlgmr.msra.gmra.mrb[112].mxu1 %vm1467_vm5, %v4309_v52  ;;  %v6444_v52 = vld [vmem:[%s7369_s21 + $0x58] sm:$0xff]   ;;  %v6446_v5 = vld [vmem:[%s7369_s21 + $0x60] sm:$0xff]  }
0x1328   : > { %6138 = vmatpush3.bf16.msra.mxu1 %v7918_v27  ;;  %6141 = vmatprep.mubr.msk.bf16.mxu1 %vm6866_vm0, %v6865_v13  ;;  %v6447_v41 = vld [vmem:[%s7369_s21 + $0x20] sm:$0xff]  }
0x1329   : > { %v4254_v29 = vpop.f32.mrb[84].mxu0  ;;  %6132 = vmatpush3.bf16.msra.mxu0 %v7910_v30  ;;  %6139 = vmatprep.subr.bf16.mxu1 %v6865_v13 }
0x132a   : > { %v4310_v7 = vpack.c.bf16 %v4254_v29, %v4254_v29  ;;  %v6105_v21 = vpop.f32.mrb[85].mxu0  ;;  %v6448_v29 = vld [vmem:[%s7369_s21 + $0x68] sm:$0xff]  }
0x132b   : > { %v4257_v49 = vpop.f32.mrb[86].mxu0 }
0x132c   : > { %v6106_v58 = vpop.f32.mrb[87].mxu0  ;;  %v4302_v61 = vpop.f32.mrb[108].mxu1  ;;  %6134 = vmatmul.mubr.msk.bf16.vlgmr.msra.gmra.mrb[92].mxu0 %vm1467_vm5, %v4310_v7  ;;  %6140 = vmatpush3.bf16.msra.mxu1 %v7923_v50 }
0x132d   : > { %v4311_v31 = vpack.c.bf16 %v4302_v61, %v4302_v61  ;;  %v6111_v6 = vpop.f32.mrb[109].mxu1  ;;  %4687 = vmatprep.mubr.bf16.mxu0 %v6870_v33  ;;  %5683 = vmatprep.subr.bf16.mxu1 %v6438_v46  ;;  %v4509_v7 = vpop.xlane.xlu0 %4508 }
0x132e   : > { %v4305_v27 = vpop.f32.mrb[110].mxu1  ;;  %v4512_v21 = vmul.f32 0.007874016, %v4509_v7 }
0x132f   : > { %v6112_v22 = vpop.f32.mrb[111].mxu1  ;;  %6142 = vmatmul.mubr.msk.bf16.vlgmr.msra.gmra.mrb[116].mxu1 %vm1467_vm5, %v4311_v31 }
0x1330   : > { %5684 = vmatpush3.bf16.msra.mxu1 %v6439_v20  ;;  %6534 = vrsqrt.f32 %v4512_v21  ;;  %vm4516_vm12 = vcmp.eq.f32.partialorder %v4512_v21, inf  ;;  %v4519_v27 = vand.u32 2147483648, %v4512_v21  ;;  %vm4518_vm13 = vcmp.eq.f32.partialorder %v4512_v21, 0.0 }
0x1331   : > { %5685 = vmatprep.subr.bf16.mxu1 %v6440_v18 }
0x1334   : > { %5686 = vmatpush3.bf16.msra.mxu1 %v6441_v11  ;;  %v5489_v11 = vld [vmem:[%s975_s25] ss:$0 sm:$0xff] }
0x1335   : > { %5687 = vmatprep.subr.bf16.mxu1 %v6442_v16 }
0x1338   : > { %5688 = vmatpush3.bf16.msra.mxu1 %v6443_v24 }
0x1339   : > { %5689 = vmatprep.subr.bf16.mxu1 %v6444_v52 }
0x133a   : > { %v6535_v49 = vpop.eup %6534 }
0x133b   : > { %v4515_v31 = vmul.f32 %v6535_v49, %v4512_v21 }
0x133c   : > { %5690 = vmatpush3.bf16.msra.mxu1 %v6445_v26 }
0x133d   : > { %5691 = vmatprep.subr.bf16.mxu1 %v6446_v5  ;;  %v4517_v6 = vsel %vm4516_vm12, %v4512_v21, %v4515_v31 }
0x133e   : > { %v4520_v22 = vsel %vm4518_vm13, %v4519_v27, %v4517_v6 }
0x1340   : > { %5692 = vmatpush3.bf16.msra.mxu1 %v6447_v41 }
0x1341   : > { %5693 = vmatprep.subr.bf16.mxu1 %v6448_v29 }
0x13f7   : > { %v4349_v32 = vpop.f32.mrb[88].mxu0 }
0x13f8   : > { %v6119_v23 = vpop.f32.mrb[89].mxu0 }
0x13f9   : > { %v4352_v30 = vpop.f32.mrb[90].mxu0 }
0x13fa   : > { %v6120_v35 = vpop.f32.mrb[91].mxu0  ;;  %v4392_v13 = vpop.f32.mrb[112].mxu1 }
0x13fb   : > { %v4484_v43 = vadd.f32 %v4392_v13, %v4349_v32  ;;  %v6127_v17 = vpop.f32.mrb[113].mxu1  ;;  %v4534_v32 = vadd.f32 1e-06, %v4520_v22 }
0x13fc   : > { %v4395_v36 = vpop.f32.mrb[114].mxu1 }
0x13fd   : > { %v6128_v57 = vpop.f32.mrb[115].mxu1  ;;  %v5471_v36 = vld [vmem:[%s7343_s2 + $0x2] ss:$0 sm:$0xff] }
0x13ff   : > { %v4435_v38 = vpop.f32.mrb[92].mxu0 }
0x1400   : > { %v4485_v39 = vadd.f32 %v4484_v43, %v4435_v38  ;;  %v6135_v45 = vpop.f32.mrb[93].mxu0  ;;  %v4532_v38 = vmul.f32 %v5471_v36, %v7991_v1  ;;  %v6452_v1 = vld [vmem:[%s7369_s21 + $0x78] sm:$0xff]  }
0x1401   : > { %v4438_v50 = vpop.f32.mrb[94].mxu0 }
0x1402   : > { %v6136_v47 = vpop.f32.mrb[95].mxu0  ;;  %v4478_v48 = vpop.f32.mrb[116].mxu1 }
0x1403   : > { %v4486_v12 = vadd.f32 %v4485_v39, %v4478_v48  ;;  %v6143_v53 = vpop.f32.mrb[117].mxu1  ;;  %v5472_v47 = vld [vmem:[%s7348_s20 + $0x2] ss:$0 sm:$0xff]  ;;  %s8246_s20 = sld [smem:[#allocation42_spill]] (!%p5506_p9) }
0x1404   : > { %v4481_v54 = vpop.f32.mrb[118].mxu1 }
0x1405   : > { %v4493_v55 = vadd.f32 %v7980_v40, %v4486_v12  ;;  %v6144_v59 = vpop.f32.mrb[119].mxu1  ;;  %v6416_v40 = vld [vmem:[%s7328_s23 + $0x4] ss:$8 sps:$4 sm:$0xff]  }
0x1406   : > { %4655 = vmatprep.subr.bf16.mxu0 %v6416_v40  ;;  %v6450_v59 = vld [vmem:[%s7369_s21 + $0x70] sm:$0xff]  }
0x1407   : > { %v8036_v60 = vadd.f32 %v4493_v55, %v7704_v25  ;;  %4656 = vmatpush1.bf16.msra.mxu0 %v6414_v28  ;;  %v6419_v25 = vld [vmem:[%s7328_s23 + $0x14] ss:$8 sps:$4 sm:$0xff]   ;;  %v6449_v55 = vld [vmem:[%s7369_s21 + $0x28] sm:$0xff]   ;;  %v4563_v28 = vld [vmem:[%s7363_s5] sm:$0x3] }
0x1408   : > { %4657 = vmatprep.subr.bf16.mxu0 %v6419_v25  ;;  %5694 = vmatpush3.bf16.msra.mxu1 %v6449_v55  ;;  %v5508_v55 = vld [vmem:[%s8247_s26] ss:$0 sm:$0xff] (!%p5506_p9) }
0x1409   : > { %4500 = vadd.xlane.f32.xlu1 %v8036_v60  ;;  %5695 = vmatprep.subr.bf16.mxu1 %v6450_v59 }
0x140b   : > { %4658 = vmatpush1.bf16.msra.mxu0 %v6417_v63 }
0x140c   : > { %4659 = vmatprep.subr.bf16.mxu0 %v6422_v14 }
0x140f   : > { %4660 = vmatpush1.bf16.msra.mxu0 %v6420_v44 }
0x1410   : > { %4661 = vmatprep.subr.bf16.mxu0 %v6425_v2 }
0x1413   : > { %4662 = vmatpush1.bf16.msra.mxu0 %v6423_v3 }
0x1414   : > { %4663 = vmatprep.subr.bf16.mxu0 %v6428_v0 }
0x1417   : > { %4664 = vmatpush1.bf16.msra.mxu0 %v6426_v4 }
0x1418   : > { %4665 = vmatprep.subr.bf16.mxu0 %v6431_v42 }
0x141b   : > { %4666 = vmatpush1.bf16.msra.mxu0 %v6429_v8 }
0x141c   : > { %4667 = vmatprep.subr.bf16.mxu0 %v6434_v56 }
0x141f   : > { %4668 = vmatpush1.bf16.msra.mxu0 %v6432_v9 }
0x1420   : > { %4669 = vmatprep.subr.bf16.mxu0 %v6437_v10 }
0x1423   : > { %4670 = vmatpush1.bf16.msra.mxu0 %v6435_v37 }
0x1496   : > { %v4501_v15 = vpop.xlane.xlu1 %4500 }
0x1497   : > { %v4503_v51 = vmul.f32 0.0078125, %v4501_v15  ;;  %v6451_v15 = vld [vmem:[%s7369_s21 + $0x30] sm:$0xff]  }
0x1498   : > { %5696 = vmatpush3.bf16.msra.mxu1 %v6451_v15 }
0x1499   : > { %v8040_v34 = vsub.f32 %v8036_v60, %v4503_v51  ;;  %v6453_v51 = vld [vmem:[%s7369_s21 + $0x38] sm:$0xff]   ;;  %5697 = vmatprep.subr.bf16.mxu1 %v6452_v1 }
0x149b   : > { %v4507_v62 = vmul.f32 %v8040_v34, %v8040_v34  ;;  %v4533_v39 = vmul.f32 %v5471_v36, %v8040_v34  ;;  %v4565_v34 = vlaneseq }
0x149c   : > { %5698 = vmatpush3.bf16.msra.mxu1 %v6453_v51 }
0x149d   : > { %4510 = vadd.xlane.f32.xlu1 %v4507_v62  ;;  %v4566_v62 = vshrl.u32 %v4565_v34, 7 }
0x149f   : > { %v4567_v40 = vsub.s32 0, %v4566_v62  ;;  %v4571_v25 = vsub.s32 1, %v4566_v62 }
0x14a1   : > { %v4568_v63 = vrot.slane %v4563_v28, %v4567_v40  ;;  %v4572_v14 = vrot.slane %v4563_v28, %v4571_v25 }
0x152a   : > { %v4511_v58 = vpop.xlane.xlu1 %4510 }
0x152b   : > { %v4513_v61 = vmul.f32 0.007874016, %v4511_v58 }
0x152d   : > { %6536 = vrsqrt.f32 %v4513_v61  ;;  %vm4523_vm14 = vcmp.eq.f32.partialorder %v4513_v61, inf  ;;  %v4526_v35 = vand.u32 2147483648, %v4513_v61  ;;  %vm4525_vm15 = vcmp.eq.f32.partialorder %v4513_v61, 0.0 }
0x152e   : > { %6538 = vrcp.f32 %v4534_v32 }
0x1537   : > { %v6537_v23 = vpop.eup %6536 }
0x1538   : > { %v4522_v30 = vmul.f32 %v6537_v23, %v4513_v61  ;;  %v6539_v57 = vpop.eup %6538 }
0x1539   : > { %v4537_v45 = vmul.f32 %v6539_v57, %v4532_v38 }
0x153a   : > { %v4524_v13 = vsel %vm4523_vm14, %v4513_v61, %v4522_v30 }
0x153b   : > { %v4527_v43 = vsel %vm4525_vm15, %v4526_v35, %v4524_v13  ;;  %v4544_v12 = vadd.f32 %v5472_v47, %v4537_v45 }
0x153c   : > { %v4535_v17 = vadd.f32 1e-06, %v4527_v43 }
0x153e   : > { %6540 = vrcp.f32 %v4535_v17 }
0x1548   : > { %v6541_v50 = vpop.eup %6540 }
0x1549   : > { %v4539_v48 = vmul.f32 %v6541_v50, %v4533_v39 }
0x154b   : > { %v4545_v53 = vadd.f32 %v5472_v47, %v4539_v48 }
0x154d   : > { %v4546_v54 = vpack.c.bf16 %v4545_v53, %v4544_v12  ;;  %v5507_v12 = vld [vmem:[%s8246_s20] ss:$0 sm:$0xff] (!%p5506_p9) }
0x154f   : > { %4688 = vmatmul.mubr.bf16.vlgmr.msra.gmra.mrb[96].mxu0 %v4546_v54 }
0x1622   : > { %v4689_v44 = vpop.f32.mrb[96].mxu0 }
0x1623   : > { %v4690_v2 = vadd.f32 %v4689_v44, %v4568_v63  ;;  %v4691_v3 = vpop.f32.mrb[97].mxu0 }
0x1624   : > { %v4692_v4 = vadd.f32 %v4691_v3, %v4572_v14  ;;  %v4693_v0 = vpop.f32.mrb[98].mxu0 }
0x1625   : > { %v4694_v42 = vadd.f32 %v4693_v0, %v4568_v63  ;;  %v4695_v8 = vpop.f32.mrb[99].mxu0  ;;  %v4698_v56 = vmax.f32 %v4690_v2, 0.0 }
0x1626   : > { %v4696_v33 = vadd.f32 %v4695_v8, %v4572_v14  ;;  %v4699_v10 = vmax.f32 %v4692_v4, 0.0 }
0x1627   : > { %v4700_v9 = vmax.f32 %v4694_v42, 0.0 }
0x1628   : > { %v4701_v37 = vmax.f32 %v4696_v33, 0.0 }
0x1629   : > { %v4702_v46 = vpack.c.bf16 %v4700_v9, %v4698_v56 }
0x162a   : > { %v4703_v20 = vpack.c.bf16 %v4701_v37, %v4699_v10 }
0x162c   : > { %4871 = vmatprep.mubr.bf16.mxu1 %v4703_v20 }
0x162d   : > { %4872 = vmatmul.mubr.bf16.vlgmr.msra.gmra.mrb[120].mxu1 %v4702_v46 }
0x1700   : > { %v5699_v18 = vpop.f32.mrb[120].mxu1 }
0x1701   : > { %v5700_v16 = vpop.f32.mrb[121].mxu1 }
0x1702   : > { %v5701_v24 = vadd.f32 %v5700_v16, %v5699_v18  ;;  %v5702_v52 = vpop.f32.mrb[122].mxu1 }
0x1703   : > { %v5703_v26 = vpop.f32.mrb[123].mxu1 }
0x1704   : > { %v4874_v5 = vadd.f32 %v5701_v24, %v5489_v11  ;;  %v5704_v41 = vadd.f32 %v5703_v26, %v5702_v52  ;;  %4887 = sbr.rel (%p5506_p9) target bundleno = 6225 (0x1851), region = 128 }
0x1706   : > { %v4880_v29 = vadd.f32 %v4874_v5, %v7986_v19  ;;  %v4877_v7 = vadd.f32 %v5704_v41, %v5489_v11 }
0x1708   : > { %4882 = vst [vmem:[#allocation2] sm:$0xff] %v4880_v29  ;;  %v4881_v21 = vadd.f32 %v4877_v7, %v8036_v60  ;;  %4890 = vadd.xlane.f32.xlu0 (!%p5506_p9), %v4880_v29 }
0x170a   : > { %4883 = vst [vmem:[#allocation2 + $0x8] sm:$0xff] %v4881_v21 }
0x170c   : > { %4892 = vadd.xlane.f32.xlu0 %v4881_v21 }
0x1795   : > { %v4891_v49 = vpop.xlane.xlu0 %4890 }
0x1796   : > { %v4894_v58 = vmul.f32 0.0078125, %v4891_v49 }
0x1798   : > { %v4896_v61 = vsub.f32 %v4880_v29, %v4894_v58 }
0x1799   : > { %v4893_v31 = vpop.xlane.xlu0 %4892 }
0x179a   : > { %v4895_v6 = vmul.f32 0.0078125, %v4893_v31  ;;  %v4898_v27 = vmul.f32 %v4896_v61, %v4896_v61  ;;  %v4926_v53 = vmul.f32 %v5507_v12, %v4896_v61 }
0x179c   : > { %v4897_v22 = vsub.f32 %v4881_v21, %v4895_v6  ;;  %4900 = vadd.xlane.f32.xlu1 %v4898_v27 }
0x179e   : > { %v4899_v32 = vmul.f32 %v4897_v22, %v4897_v22  ;;  %v4927_v15 = vmul.f32 %v5507_v12, %v4897_v22 }
0x17a0   : > { %4902 = vadd.xlane.f32.xlu1 %v4899_v32 }
0x1829   : > { %v4901_v19 = vpop.xlane.xlu1 %4900 }
0x182a   : > { %v4904_v23 = vmul.f32 0.007874016, %v4901_v19 }
0x182c   : > { %6544 = vrsqrt.f32 %v4904_v23  ;;  %vm4908_vm0 = vcmp.eq.f32.partialorder %v4904_v23, inf  ;;  %v4911_v43 = vand.u32 2147483648, %v4904_v23  ;;  %vm4910_vm1 = vcmp.eq.f32.partialorder %v4904_v23, 0.0 }
0x182d   : > { %v4903_v60 = vpop.xlane.xlu1 %4902 }
0x182e   : > { %v4905_v30 = vmul.f32 0.007874016, %v4903_v60 }
0x1830   : > { %6546 = vrsqrt.f32 %v4905_v30  ;;  %vm4915_vm2 = vcmp.eq.f32.partialorder %v4905_v30, inf  ;;  %v4918_v45 = vand.u32 2147483648, %v4905_v30  ;;  %vm4917_vm3 = vcmp.eq.f32.partialorder %v4905_v30, 0.0 }
0x1836   : > { %v6545_v35 = vpop.eup %6544 }
0x1837   : > { %v4907_v13 = vmul.f32 %v6545_v35, %v4904_v23 }
0x1839   : > { %v4909_v17 = vsel %vm4908_vm0, %v4904_v23, %v4907_v13 }
0x183a   : > { %v6547_v36 = vpop.eup %6546  ;;  %v4912_v57 = vsel %vm4910_vm1, %v4911_v43, %v4909_v17 }
0x183b   : > { %v4928_v38 = vadd.f32 1e-06, %v4912_v57  ;;  %v4914_v39 = vmul.f32 %v6547_v36, %v4905_v30 }
0x183d   : > { %6548 = vrcp.f32 %v4928_v38  ;;  %v4916_v50 = vsel %vm4915_vm2, %v4905_v30, %v4914_v39 }
0x183e   : > { %v4919_v47 = vsel %vm4917_vm3, %v4918_v45, %v4916_v50 }
0x183f   : > { %v4929_v48 = vadd.f32 1e-06, %v4919_v47 }
0x1841   : > { %6550 = vrcp.f32 %v4929_v48 }
0x1847   : > { %v6549_v54 = vpop.eup %6548 }
0x1848   : > { %v4931_v59 = vmul.f32 %v6549_v54, %v4926_v53 }
0x184a   : > { %v4940_v1 = vadd.f32 %v5508_v55, %v4931_v59 }
0x184b   : > { %v6551_v51 = vpop.eup %6550 }
0x184c   : > { %4942 = vst [vmem:[#allocation15] sm:$0xff] %v4940_v1  ;;  %v4933_v34 = vmul.f32 %v6551_v51, %v4927_v15 }
0x184e   : > { %v4941_v62 = vadd.f32 %v5508_v55, %v4933_v34 }
0x1850   : > { %4943 = vst [vmem:[#allocation15 + $0x8] sm:$0xff] %v4941_v62 }
0x1851 PF: > { %p6196_p13 = scmp.eq.s32.totalorder %s7158_s16, 1  ;;  %s6871_s25 = smov [#allocation15]  }
0x1852   : > { %s4953_s21 = sshll.u32 %s6871_s25, 4  ;;  %s4954_s21 = int_to_ptr.vmem [resolvable:$true] %s4953_s21 }
0x1853   : > { %s6760_s4 = scalar_lea.vmem %s4954_s21, 256  ;;  %p6767_p2 = scmp.lt.s32.totalorder %s4954_s21, %s4954_s21 }
0x1854   : > { %p6761_p7 = scmp.ne.s32.totalorder %s4954_s21, %s6760_s4  ;;  %p6768_p12 = scmp.lt.s32.totalorder %s6760_s4, %s6760_s4 }
0x1856   : > { %p6762_p4 = pnand %p6761_p7, %p6196_p13  ;;  %p6769_p1 = por %p6768_p12, %p6767_p2 }
0x1858   : > { %p6763_p5 = pneg %p6762_p4 }
0x185a   : > { %p6770_p3 = pnand %p6769_p1, %p6763_p5 }
0x185c   : > { %6773 = shalt.err (!%p6770_p3)
}
0x185d   : > { %s8248_s14 = sld [smem:[#allocation44_spill]] }
0x1863   : > { %s6774_s0 = scalar_lea.hbm %s8248_s14, 256 }
0x1864   : > { %p6775_p11 = scmp.ne.s32.totalorder %s8248_s14, %s6774_s0  ;;  %p6780_p6 = scmp.lt.u32.totalorder %s6774_s0, %s8248_s14 }
0x1866   : > { %p6776_p0 = pnand %p6775_p11, %p6196_p13 }
0x1868   : > { %p6777_p10 = pneg %p6776_p0 }
0x186a   : > { %p6782_p8 = pnand %p6780_p6, %p6777_p10 }
0x186c   : > { %6785 = shalt.err (!%p6782_p8)
}
0x186d   : > { %s6872_s17 = smov 128   ;;  %s6873_s6 = smov 8  }
0x186e   : > { %6167 = dma.vmem_to_hbm [thread:$0]  (%p6196_p13), %s4954_s21, 256, %s8248_s14, [#allocation5], %s6872_s17, %s6872_s17, %s6873_s6  }
0x186f   : > { %6827 = dma.done.wait (%p6196_p13), [#allocation5], 256  }
0x1870   : > { %6829 = vsyncadd (%p6196_p13), [#allocation5], 4294967040 }
0x1871 PF: > { %s8249_s8 = sld [smem:[#allocation23_spill]]  ;;  %s8250_s29 = sld [smem:[#allocation21_spill]] }
0x1872   : > { %s8251_s10 = sld [smem:[#allocation25_spill]]  ;;  %s8252_s30 = sld [smem:[#allocation22_spill]] }
0x1873   : > { %s8253_s0 = sld [smem:[#allocation24_spill]]  ;;  %s8254_s27 = smov %s6836_s28 }
0x1877   : > { %s39_s19 = sadd.s32 1, %s8249_s8   ;;  %s8255_s28 = smov %s8250_s29 }
0x1878   : > { %p36_p9 = scmp.ge.s32.totalorder %s39_s19, 4   ;;  %s8256_s29 = smov %s8251_s10 }
0x187a   :  { %38 = sbr.rel (!%p36_p9) target bundleno = 30 (0x1e), region = 234 }
0x1881   :  { %4969 = vsyncpa [#allocation4], 1 }
0x1882   :  { %4971 = vsyncpa [#allocation4 + $0x1], 1 }
0x1883   :  { %4972 = vsyncpa [#allocation7], 1 }
0x1884   :  { %4974 = vsyncpa [#allocation7 + $0x1], 1 }
0x1885   :  { %4975 = vsyncpa [#allocation10], 1 }
0x1886   :  { %4977 = vsyncpa [#allocation10 + $0x1], 1 }
0x1887   :  { %4978 = vsyncpa [#allocation13], 1 }
0x1888   :  { %4980 = vsyncpa [#allocation13 + $0x1], 1 }
0x1889   :  { %4981 = vsyncpa [#allocation5], 1 }
0x188a   :  { %4983 = vsyncpa [#allocation5 + $0x1], 1 }

</bundles_post_ra>
